<compile_context>
chip_gen: v7x
topology: tpu7x:2x2x1
jax: 0.10.0
libtpu: 0.0.40
codegen_flags: <defaults>
</compile_context>

<pallas_src>
import functools

import jax
import jax.numpy as jnp
from jax.experimental import pallas as pl
from jax.experimental.pallas import tpu as pltpu

BN_EPS = 1e-5
_LANE = 128                       # conv-output channels padded to this (lane-dense)


def _round_up(x, m):
    return ((x + m - 1) // m) * m


def _largest_divisor_leq(n, cap):
    cap = max(1, min(n, cap))
    for d in range(cap, 0, -1):
        if n % d == 0:
            return d
    return 1


@functools.lru_cache(maxsize=1)
def _vmem_budget():
    """(vmem_limit_bytes, row_tile_target) derived from the local TPU generation."""
    cap = 64 * 1024 * 1024                        # conservative default (v7x-like)
    try:
        info = pltpu.get_tpu_info()
        cap = int(getattr(info, "vmem_capacity_bytes", cap))
    except Exception:
        pass
    limit = max(32 * 1024 * 1024, min(cap * 3 // 4, 100 * 1024 * 1024))
    target_rows = 4096 if cap >= 96 * 1024 * 1024 else 2048
    return limit, target_rows


# ---------------------------------------------------------------------------
# Kernel 1: conv as accumulated bf16 MXU matmuls + per-tile BN partial stats.
# ---------------------------------------------------------------------------
def _conv_stats_kernel(x_ref, mask_ref, w_ref, o_ref, sum_ref, ssq_ref, acc_ref,
                       *, row_offsets, k_tap):
    # x_ref   : (1, 1, mwin, k_tap)  bf16 activated, spatially padded LHS rows
    # mask_ref: (m, 1)               f32  1.0 on valid output columns, 0.0 on junk
    # w_ref   : (ntaps*k_tap, cp)    bf16 weights, rows ordered (kh, kw, cin)
    # o_ref   : (1, m, cp)           bf16 raw conv output rows (junk cols included)
    # sum/ssq : (1, 1, 1, cp)        f32  per-tile channel partial stats (valid only)
    # acc_ref : VMEM (m, cp) f32 accumulator
    m = acc_ref.shape[0]
    for i, roff in enumerate(row_offsets):
        lhs = x_ref[0, 0, roff:roff + m, :]                 # contiguous shifted view
        rhs = w_ref[i * k_tap:(i + 1) * k_tap, :]
        part = jnp.dot(lhs, rhs, preferred_element_type=jnp.float32)
        if i == 0:
            acc_ref[...] = part                             # first tap: no zero-fill
        else:
            acc_ref[...] += part
    acc = acc_ref[...]
    o_ref[...] = acc.reshape(o_ref.shape).astype(o_ref.dtype)
    masked = acc * mask_ref[...]
    sum_ref[...] = jnp.sum(masked, axis=0).reshape(sum_ref.shape)
    ssq_ref[...] = jnp.sum(masked * acc, axis=0).reshape(ssq_ref.shape)


# ---------------------------------------------------------------------------
# Kernel 2: BN + ReLU fused with 2x2 max-pool and PyTorch-style argmax indices.
# ---------------------------------------------------------------------------
def _bn_relu_pool_kernel(z_ref, a_ref, b_ref, v_ref, i_ref, *, tph, wq, wo, cp):
    # z_ref: (1, tph, 2, wq, 2*cp) bf16 conv3 pre-BN output rearranged as
    #        (n, pooled_row, row_parity, pooled_col, col_parity*channel)
    # a_ref, b_ref: (1, 2*cp) f32  BN scale/shift (duplicated for both col parities)
    # v_ref: (1, tph, wq, cp) f32  pooled activation
    # i_ref: (1, tph, wq, cp) i32  argmax index, flattened h*W + w (PyTorch style)
    t = pl.program_id(1)
    a = a_ref[...]
    b = b_ref[...]
    act0 = jnp.maximum(z_ref[0, :, 0, :, :] * a + b, 0.0)        # rows with even h
    act1 = jnp.maximum(z_ref[0, :, 1, :, :] * a + b, 0.0)        # rows with odd  h
    v00, v01 = act0[:, :, :cp], act0[:, :, cp:]
    v10, v11 = act1[:, :, :cp], act1[:, :, cp:]

    ph = jax.lax.broadcasted_iota(jnp.int32, (tph, wq, cp), 0) + t * tph
    pw = jax.lax.broadcasted_iota(jnp.int32, (tph, wq, cp), 1)
    base = 2 * ph * wo + 2 * pw
    best_v, best_i = v00, base
    for v, off in ((v01, 1), (v10, wo), (v11, wo + 1)):
        take = v > best_v                  # strict '>' keeps the FIRST max on ties
        best_v = jnp.where(take, v, best_v)
        best_i = jnp.where(take, base + off, best_i)
    v_ref[...] = best_v.reshape(v_ref.shape).astype(v_ref.dtype)
    i_ref[...] = best_i.reshape(i_ref.shape)


# ---------------------------------------------------------------------------
# Tiling helpers
# ---------------------------------------------------------------------------
def _pick_conv_th(ho, wg, lane_c, k_rows, cp, n_batch, vmem_limit, target_rows):
    cap = max(1, target_rows // max(wg, 1))
    if n_batch == 1 and ho >= 2:
        cap = min(cap, max(1, ho // 2))    # keep >= 2 grid steps (v7x: 2 TensorCores)
    divisors = [d for d in range(1, ho + 1) if ho % d == 0]
    # Output-block rows (d*wg) must be sublane-aligned unless d spans the full dim.
    ok = [d for d in divisors if (d * wg) % 8 == 0 or d == ho]

    def fits(d):
        m = d * wg
        mwin = _round_up((d + 2) * wg + 8, 8)
        need = (2 * mwin * lane_c * 2      # bf16 input window (double-buffered)
                + 2 * k_rows * cp * 2      # bf16 weights (double-buffered)
                + 2 * m * cp * 2           # bf16 output tile (double-buffered)
                + m * cp * 4               # f32 accumulator scratch
                + m * 4 * 2                # column mask
                + 8 * cp * 4)              # stats tiles
        return need <= int(vmem_limit * 0.7)

    good = [d for d in ok if d <= cap and fits(d)]
    if good:
        return max(good)
    feasible = [d for d in ok if fits(d)]
    return min(feasible) if feasible else min(ok)


# ---------------------------------------------------------------------------
# Wrappers
# ---------------------------------------------------------------------------
def _conv_bn_stats(x_act, w_mat, gamma_p, beta_p):
    """3x3/s1/p1 conv (bf16 MXU, f32 accumulate) + per-channel batch statistics.

    Returns (z, a_row, b_row): z is the pre-BN conv output (n, H, W, cp) bf16 view;
    a_row/b_row fold train-mode BN into a per-channel scale/shift.
    """
    n, hi, wi, c_in = x_act.shape
    k_rows, cp = w_mat.shape
    assert k_rows == 9 * c_in
    ho, wo = hi, wi                                   # k=3, stride=1, padding=1
    vmem_limit, target_rows = _vmem_budget()

    use_im2col = (9 * c_in) <= _LANE                  # tiny-cin: one deep matmul/tile
    wg = wo if use_im2col else wi + 2                 # row-group width in the matmul
    k_tap = 9 * c_in if use_im2col else c_in
    th = _pick_conv_th(ho, wg, k_tap, k_rows, cp, n, vmem_limit, target_rows)
    t = ho // th
    m = th * wg

    xp = jnp.pad(x_act, ((0, 0), (1, 1), (1, 1), (0, 0)))
    if use_im2col:
        patches = jnp.stack([xp[:, kh:kh + ho, kw:kw + wo, :]
                             for kh in range(3) for kw in range(3)], axis=-2)
        wins = patches.reshape(n, ho, wo, 9 * c_in)
        wins = wins.reshape(n, t, m, k_tap).astype(jnp.bfloat16)
        mwin = m
        row_offsets = (0,)
        mask = jnp.ones((m, 1), jnp.float32)
    else:
        # Only the 2 halo rows per tile are duplicated; the window is flattened so
        # each tap in the kernel is a contiguous shifted slice (no in-kernel copies).
        wins = jnp.stack([xp[:, j * th:j * th + th + 2] for j in range(t)], axis=1)
        wins = wins.reshape(n, t, (th + 2) * wg, c_in)
        mwin = _round_up((th + 2) * wg + 2, 8)
        wins = jnp.pad(wins, ((0, 0), (0, 0), (0, mwin - (th + 2) * wg), (0, 0)))
        wins = wins.astype(jnp.bfloat16)
        row_offsets = tuple(kh * wg + kw for kh in range(3) for kw in range(3))
        col = jnp.arange(m, dtype=jnp.int32) % wg
        mask = (col < wo).astype(jnp.float32).reshape(m, 1)

    kern = functools.partial(_conv_stats_kernel, row_offsets=row_offsets, k_tap=k_tap)
    flops = int(2 * n * ho * wo * 9 * c_in * cp)
    bytes_accessed = int(wins.size * 2 + w_mat.size * 2 + n * t * m * cp * 2
                         + 2 * n * t * cp * 4 + m * 4)

    z_raw, sums, ssqs = pl.pallas_call(
        kern,
        grid=(n, t),
        in_specs=[
            pl.BlockSpec((1, 1, mwin, k_tap), lambda i, j: (i, j, 0, 0)),
            pl.BlockSpec((m, 1), lambda i, j: (0, 0)),
            pl.BlockSpec((k_rows, cp), lambda i, j: (0, 0)),
        ],
        out_specs=[
            pl.BlockSpec((1, m, cp), lambda i, j: (i, j, 0)),
            pl.BlockSpec((1, 1, 1, cp), lambda i, j: (i, j, 0, 0)),
            pl.BlockSpec((1, 1, 1, cp), lambda i, j: (i, j, 0, 0)),
        ],
        out_shape=[
            jax.ShapeDtypeStruct((n, t * m, cp), jnp.bfloat16),
            jax.ShapeDtypeStruct((n, t, 1, cp), jnp.float32),
            jax.ShapeDtypeStruct((n, t, 1, cp), jnp.float32),
        ],
        scratch_shapes=[pltpu.VMEM((m, cp), jnp.float32)],
        compiler_params=pltpu.CompilerParams(
            dimension_semantics=("parallel", "parallel"),
            vmem_limit_bytes=vmem_limit),
        cost_estimate=pl.CostEstimate(flops=flops, transcendentals=0,
                                      bytes_accessed=bytes_accessed),
    )(wins, mask, w_mat)

    count = jnp.float32(n * ho * wo)
    mean = jnp.sum(sums, axis=(0, 1, 2)) / count
    # NOTE: E[x^2]-E[x]^2 in f32 from the exact f32 accumulator; clamped at 0.
    var = jnp.maximum(jnp.sum(ssqs, axis=(0, 1, 2)) / count - mean * mean, 0.0)
    inv_std = jax.lax.rsqrt(var + BN_EPS)
    a_row = (gamma_p * inv_std).reshape(1, cp)
    b_row = (beta_p - mean * gamma_p * inv_std).reshape(1, cp)
    z = z_raw.reshape(n, ho, wg, cp)[:, :, :wo, :]     # strip junk columns lazily
    return z, a_row, b_row


def _bn_relu_maxpool(z, a_row, b_row, vmem_limit, target_rows):
    n, hi, wi, cp = z.shape
    hq, wq = hi // 2, wi // 2
    zr = z.reshape(n, hq, 2, wq, 2 * cp)
    a2 = jnp.concatenate([a_row, a_row], axis=1)
    b2 = jnp.concatenate([b_row, b_row], axis=1)
    cap = max(1, target_rows // max(wq, 1))
    if n == 1 and hq >= 2:
        cap = min(cap, max(1, hq // 2))    # keep >= 2 grid steps for 2-TC parts
    tph = _largest_divisor_leq(hq, cap)
    tp = hq // tph
    kern = functools.partial(_bn_relu_pool_kernel, tph=tph, wq=wq, wo=wi, cp=cp)
    vals, idx = pl.pallas_call(
        kern,
        grid=(n, tp),
        in_specs=[
            pl.BlockSpec((1, tph, 2, wq, 2 * cp), lambda i, j: (i, j, 0, 0, 0)),
            pl.BlockSpec((1, 2 * cp), lambda i, j: (0, 0)),
            pl.BlockSpec((1, 2 * cp), lambda i, j: (0, 0)),
        ],
        out_specs=[
            pl.BlockSpec((1, tph, wq, cp), lambda i, j: (i, j, 0, 0)),
            pl.BlockSpec((1, tph, wq, cp), lambda i, j: (i, j, 0, 0)),
        ],
        out_shape=[
            jax.ShapeDtypeStruct((n, hq, wq, cp), jnp.float32),
            jax.ShapeDtypeStruct((n, hq, wq, cp), jnp.int32),
        ],
        compiler_params=pltpu.CompilerParams(
            dimension_semantics=("parallel", "parallel"),
            vmem_limit_bytes=vmem_limit),
    )(zr, a2, b2)
    return vals, idx


def _prep_conv_params(w, gamma, beta, cin_pad, cout_pad):
    cout, cin, k, _ = w.shape
    wt = jnp.transpose(w, (2, 3, 1, 0))                      # (kh, kw, cin, cout)
    wt = jnp.pad(wt, ((0, 0), (0, 0), (0, cin_pad - cin), (0, cout_pad - cout)))
    w_mat = wt.reshape(k * k * cin_pad, cout_pad).astype(jnp.bfloat16)
    g = jnp.pad(gamma, (0, cout_pad - cout)).astype(jnp.float32)
    b = jnp.pad(beta, (0, cout_pad - cout)).astype(jnp.float32)
    return w_mat, g, b


@jax.jit
def _segnet_down3_nchw(x_nchw, params):
    n, cin, hi, wi = x_nchw.shape
    cout = params[0]["weight"].shape[0]
    cp = _round_up(cout, _LANE)          # lane-dense conv-output / BN channel dim
    c_act = _round_up(cout, 8)           # channels actually carried between layers
    vmem_limit, target_rows = _vmem_budget()

    # NHWC once; pad raw input channels to a sublane-friendly multiple of 8.
    x = jnp.transpose(x_nchw, (0, 2, 3, 1)).astype(jnp.float32)
    cin_p = _round_up(cin, 8)
    x = jnp.pad(x, ((0, 0), (0, 0), (0, 0), (0, cin_p - cin)))

    act = x
    z = a_row = b_row = None
    for li, p in enumerate(params):
        w_mat, g_p, be_p = _prep_conv_params(
            p["weight"], p["bn_weight"], p["bn_bias"],
            cin_pad=act.shape[-1], cout_pad=cp)
        # NOTE: p["bias"] (the conv bias) is intentionally unused: training-mode BN
        # subtracts the batch mean, so a per-channel bias cancels exactly.
        z, a_row, b_row = _conv_bn_stats(act, w_mat, g_p, be_p)
        if li < len(params) - 1:
            # BN+ReLU for this layer: elementwise chain that XLA fuses with the bf16
            # window build inside the next _conv_bn_stats call (no standalone pass,
            # no extra f32 round-trip through HBM); channel padding is not carried.
            act = jnp.maximum(
                z[..., :c_act].astype(jnp.float32) * a_row[0, :c_act]
                + b_row[0, :c_act], 0.0).astype(jnp.bfloat16)
    pooled, idx = _bn_relu_maxpool(z, a_row, b_row, vmem_limit, target_rows)
    pooled = jnp.transpose(pooled[..., :cout], (0, 3, 1, 2))     # back to NCHW
    idx = jnp.transpose(idx[..., :cout], (0, 3, 1, 2))
    return pooled, idx


def segnet_down3(x_nchw, params):
    pooled, idx = _segnet_down3_nchw(x_nchw, params)
    n, _, hi, wi = x_nchw.shape
    cout = params[0]["weight"].shape[0]
    return pooled, idx, (n, cout, hi, wi)


# ---------------------------------------------------------------------------
# Pure-JAX f32 reference (includes the conv bias; used only for validation).
# ---------------------------------------------------------------------------
def _reference_segnet_down3(x_nchw, params):
    y = x_nchw
    for p in params:
        y = jax.lax.conv_general_dilated(
            y, p["weight"], window_strides=(1, 1), padding=((1, 1), (1, 1)),
            dimension_numbers=("NCHW", "OIHW", "NCHW"),
            precision=jax.lax.Precision.HIGHEST)
        y = y + p["bias"].reshape(1, -1, 1, 1)
        mean = jnp.mean(y, axis=(0, 2, 3), keepdims=True)
        var = jnp.mean((y - mean) ** 2, axis=(0, 2, 3), keepdims=True)
        y = (y - mean) * jax.lax.rsqrt(var + BN_EPS)
        y = y * p["bn_weight"].reshape(1, -1, 1, 1) + p["bn_bias"].reshape(1, -1, 1, 1)
        y = jnp.maximum(y, 0.0)
    n, c, hi, wi = y.shape
    hq, wq = hi // 2, wi // 2
    y6 = y.reshape(n, c, hq, 2, wq, 2)
    cand = jnp.stack([y6[:, :, :, 0, :, 0], y6[:, :, :, 0, :, 1],
                      y6[:, :, :, 1, :, 0], y6[:, :, :, 1, :, 1]], axis=-1)
    vals = jnp.max(cand, axis=-1)
    arg = jnp.argmax(cand, axis=-1)
    ph = jnp.arange(hq).reshape(1, 1, hq, 1)
    pw = jnp.arange(wq).reshape(1, 1, 1, wq)
    base = 2 * ph * wi + 2 * pw
    offs = jnp.array([0, 1, wi, wi + 1], dtype=jnp.int32)
    idx = (base + offs[arg]).astype(jnp.int32)
    return vals, idx, y


if __name__ == "__main__":
    # COUT=16 exercises both conv paths: layer 1 uses the im2col path (9*8 <= 128),
    # layers 2-3 use the halo-window / 9-tap path (9*16 > 128).
    N, CIN, H, W = 2, 4, 16, 16
    COUT, KSIZE = 16, 3

    key = jax.random.PRNGKey(0)
    keys = jax.random.split(key, 16)
    x = jax.random.normal(keys[0], (N, CIN, H, W), dtype=jnp.float32)

    def make_layer(k_idx, cin, cout):
        kw_, kb_, kg_, kbe_ = jax.random.split(keys[k_idx], 4)
        fan_in = cin * KSIZE * KSIZE
        return {
            "weight": jax.random.normal(kw_, (cout, cin, KSIZE, KSIZE),
                                        jnp.float32) / jnp.sqrt(jnp.float32(fan_in)),
            "bias": 0.1 * jax.random.normal(kb_, (cout,), jnp.float32),
            "bn_weight": 1.0 + 0.1 * jax.random.normal(kg_, (cout,), jnp.float32),
            "bn_bias": 0.1 * jax.random.normal(kbe_, (cout,), jnp.float32),
        }

    params = [make_layer(1, CIN, COUT), make_layer(2, COUT, COUT),
              make_layer(3, COUT, COUT)]

    pooled, idx, unpooled_shape = segnet_down3(x, params)
    pooled, idx = jax.block_until_ready((pooled, idx))

    assert pooled.shape == (N, COUT, H // 2, W // 2), pooled.shape
    assert idx.shape == (N, COUT, H // 2, W // 2), idx.shape
    assert idx.dtype == jnp.int32
    assert unpooled_shape == (N, COUT, H, W)
    assert bool(jnp.all(jnp.isfinite(pooled)))
    assert bool(jnp.all((idx >= 0) & (idx < H * W)))

    # Validate against a pure-JAX f32 reference of the PyTorch forward.  Tolerances
    # account for bf16 MXU operands and bf16 inter-layer activations (3 conv layers).
    ref_vals, ref_idx, ref_act = _reference_segnet_down3(x, params)
    max_err = float(jnp.max(jnp.abs(pooled - ref_vals)))
    assert max_err < 6e-2, f"pooled value mismatch: {max_err}"

    # Index semantics: gathering the reference activation map at the kernel's
    # indices must reproduce the pooled maxima (robust to fp / bf16 ties).
    act_flat = ref_act.reshape(N, COUT, H * W)
    gathered = jnp.take_along_axis(
        act_flat, idx.reshape(N, COUT, -1), axis=2).reshape(idx.shape)
    max_idx_err = float(jnp.max(jnp.abs(gathered - ref_vals)))
    assert max_idx_err < 1.2e-1, f"argmax index mismatch: {max_idx_err}"

    print("KERNEL_OK")
</pallas_src>

<mosaic_0001>
module attributes {stable_mosaic.version = 11 : i64} {
  func.func @_conv_stats_kernel(%arg0: i32, %arg1: i32, %arg2: memref<1x1x256x72xbf16, #tpu.memory_space<vmem>>, %arg3: memref<256x1xf32, #tpu.memory_space<vmem>>, %arg4: memref<72x128xbf16, #tpu.memory_space<vmem>>, %arg5: memref<1x256x128xbf16, #tpu.memory_space<vmem>>, %arg6: memref<1x1x1x128xf32, #tpu.memory_space<vmem>>, %arg7: memref<1x1x1x128xf32, #tpu.memory_space<vmem>>, %arg8: memref<256x128xf32, #tpu.memory_space<vmem>>) attributes {dimension_semantics = [#tpu.dimension_semantics<parallel>, #tpu.dimension_semantics<parallel>], iteration_bounds = array<i64: 2, 1>, scalar_prefetch = 0 : i64, scratch_operands = 1 : i64, tpu.core_type = #tpu.core_type<tc>, window_params = [{transform_indices = @transform_0, window_bounds = array<i64: 1, 1, 256, 72>}, {pipeline_mode = #tpu.pipeline_mode<synchronous>, transform_indices = @transform_1, window_bounds = array<i64: 256, 1>}, {pipeline_mode = #tpu.pipeline_mode<synchronous>, transform_indices = @transform_2, window_bounds = array<i64: 72, 128>}, {transform_indices = @transform_3, window_bounds = array<i64: 1, 256, 128>}, {transform_indices = @transform_4, window_bounds = array<i64: 1, 1, 1, 128>}, {transform_indices = @transform_5, window_bounds = array<i64: 1, 1, 1, 128>}]} {
    %c0 = arith.constant 0 : index
    %c0_0 = arith.constant 0 : index
    %c0_1 = arith.constant 0 : index
    %c0_2 = arith.constant 0 : index
    %0 = vector.load %arg2[%c0, %c0_0, %c0_1, %c0_2] : memref<1x1x256x72xbf16, #tpu.memory_space<vmem>>, vector<1x1x256x72xbf16>
    %1 = vector.shape_cast %0 : vector<1x1x256x72xbf16> to vector<256x72xbf16>
    %c0_3 = arith.constant 0 : index
    %c0_4 = arith.constant 0 : index
    %2 = vector.load %arg4[%c0_3, %c0_4] : memref<72x128xbf16, #tpu.memory_space<vmem>>, vector<72x128xbf16>
    %cst = arith.constant dense<0.000000e+00> : vector<256x128xf32>
    %3 = tpu.matmul %1, %2, %cst {dimension_numbers = #tpu.dot_dimension_numbers<[1], [0], [0], [1], [0, 0, 1, 1], [], []>} : vector<256x72xbf16>, vector<72x128xbf16>, vector<256x128xf32> -> vector<256x128xf32>
    %c0_5 = arith.constant 0 : index
    %c0_6 = arith.constant 0 : index
    %4 = vector.load %arg8[%c0_5, %c0_6] : memref<256x128xf32, #tpu.memory_space<vmem>>, vector<256x128xf32>
    tpu.vector_store %arg8[%c0_5, %c0_6], %3 {strides = array<i32>} : memref<256x128xf32, #tpu.memory_space<vmem>>, vector<256x128xf32>,
    %c0_7 = arith.constant 0 : index
    %c0_8 = arith.constant 0 : index
    %5 = vector.load %arg8[%c0_7, %c0_8] : memref<256x128xf32, #tpu.memory_space<vmem>>, vector<256x128xf32>
    %6 = vector.shape_cast %5 : vector<256x128xf32> to vector<1x256x128xf32>
    %7 = arith.truncf %6 : vector<1x256x128xf32> to vector<1x256x128xbf16>
    %c0_9 = arith.constant 0 : index
    %c0_10 = arith.constant 0 : index
    %c0_11 = arith.constant 0 : index
    %8 = vector.load %arg5[%c0_9, %c0_10, %c0_11] : memref<1x256x128xbf16, #tpu.memory_space<vmem>>, vector<1x256x128xbf16>
    tpu.vector_store %arg5[%c0_9, %c0_10, %c0_11], %7 {strides = array<i32>} : memref<1x256x128xbf16, #tpu.memory_space<vmem>>, vector<1x256x128xbf16>,
    %c0_12 = arith.constant 0 : index
    %c0_13 = arith.constant 0 : index
    %9 = vector.load %arg3[%c0_12, %c0_13] : memref<256x1xf32, #tpu.memory_space<vmem>>, vector<256x1xf32>
    %10 = vector.broadcast %9 : vector<256x1xf32> to vector<256x128xf32>
    %11 = arith.mulf %5, %10 : vector<256x128xf32>
    %cst_14 = arith.constant dense<0.000000e+00> : vector<128xf32>
    %12 = vector.multi_reduction <add>, %11, %cst_14 [0] : vector<256x128xf32> to vector<128xf32>
    %13 = vector.shape_cast %12 : vector<128xf32> to vector<1x1x1x128xf32>
    %c0_15 = arith.constant 0 : index
    %c0_16 = arith.constant 0 : index
    %c0_17 = arith.constant 0 : index
    %c0_18 = arith.constant 0 : index
    %14 = vector.load %arg6[%c0_15, %c0_16, %c0_17, %c0_18] : memref<1x1x1x128xf32, #tpu.memory_space<vmem>>, vector<1x1x1x128xf32>
    tpu.vector_store %arg6[%c0_15, %c0_16, %c0_17, %c0_18], %13 {strides = array<i32>} : memref<1x1x1x128xf32, #tpu.memory_space<vmem>>, vector<1x1x1x128xf32>,
    %15 = arith.mulf %11, %5 : vector<256x128xf32>
    %cst_19 = arith.constant dense<0.000000e+00> : vector<128xf32>
    %16 = vector.multi_reduction <add>, %15, %cst_19 [0] : vector<256x128xf32> to vector<128xf32>
    %17 = vector.shape_cast %16 : vector<128xf32> to vector<1x1x1x128xf32>
    %c0_20 = arith.constant 0 : index
    %c0_21 = arith.constant 0 : index
    %c0_22 = arith.constant 0 : index
    %c0_23 = arith.constant 0 : index
    %18 = vector.load %arg7[%c0_20, %c0_21, %c0_22, %c0_23] : memref<1x1x1x128xf32, #tpu.memory_space<vmem>>, vector<1x1x1x128xf32>
    tpu.vector_store %arg7[%c0_20, %c0_21, %c0_22, %c0_23], %17 {strides = array<i32>} : memref<1x1x1x128xf32, #tpu.memory_space<vmem>>, vector<1x1x1x128xf32>,
    return
  }
  func.func @transform_0(%arg0: i32, %arg1: i32) -> (i32, i32, i32, i32) {
    %c0_i32 = arith.constant 0 : i32
    %c0_i32_0 = arith.constant 0 : i32
    %c0_i32_1 = arith.constant 0 : i32
    return %arg0, %arg1, %c0_i32, %c0_i32_0 : i32, i32, i32, i32
  }
  func.func @transform_1(%arg0: i32, %arg1: i32) -> (i32, i32) {
    %c0_i32 = arith.constant 0 : i32
    %c0_i32_0 = arith.constant 0 : i32
    %c0_i32_1 = arith.constant 0 : i32
    return %c0_i32, %c0_i32_0 : i32, i32
  }
  func.func @transform_2(%arg0: i32, %arg1: i32) -> (i32, i32) {
    %c0_i32 = arith.constant 0 : i32
    %c0_i32_0 = arith.constant 0 : i32
    %c0_i32_1 = arith.constant 0 : i32
    return %c0_i32, %c0_i32_0 : i32, i32
  }
  func.func @transform_3(%arg0: i32, %arg1: i32) -> (i32, i32, i32) {
    %c0_i32 = arith.constant 0 : i32
    %c0_i32_0 = arith.constant 0 : i32
    return %arg0, %arg1, %c0_i32 : i32, i32, i32
  }
  func.func @transform_4(%arg0: i32, %arg1: i32) -> (i32, i32, i32, i32) {
    %c0_i32 = arith.constant 0 : i32
    %c0_i32_0 = arith.constant 0 : i32
    %c0_i32_1 = arith.constant 0 : i32
    return %arg0, %arg1, %c0_i32, %c0_i32_0 : i32, i32, i32, i32
  }
  func.func @transform_5(%arg0: i32, %arg1: i32) -> (i32, i32, i32, i32) {
    %c0_i32 = arith.constant 0 : i32
    %c0_i32_0 = arith.constant 0 : i32
    %c0_i32_1 = arith.constant 0 : i32
    return %arg0, %arg1, %c0_i32, %c0_i32_0 : i32, i32, i32, i32
  }
}

module attributes {stable_mosaic.version = 11 : i64} {
  func.func @_conv_stats_kernel(%arg0: i32, %arg1: i32, %arg2: memref<1x1x328x16xbf16, #tpu.memory_space<vmem>>, %arg3: memref<288x1xf32, #tpu.memory_space<vmem>>, %arg4: memref<144x128xbf16, #tpu.memory_space<vmem>>, %arg5: memref<1x288x128xbf16, #tpu.memory_space<vmem>>, %arg6: memref<1x1x1x128xf32, #tpu.memory_space<vmem>>, %arg7: memref<1x1x1x128xf32, #tpu.memory_space<vmem>>, %arg8: memref<288x128xf32, #tpu.memory_space<vmem>>) attributes {dimension_semantics = [#tpu.dimension_semantics<parallel>, #tpu.dimension_semantics<parallel>], iteration_bounds = array<i64: 2, 1>, scalar_prefetch = 0 : i64, scratch_operands = 1 : i64, tpu.core_type = #tpu.core_type<tc>, window_params = [{transform_indices = @transform_0, window_bounds = array<i64: 1, 1, 328, 16>}, {pipeline_mode = #tpu.pipeline_mode<synchronous>, transform_indices = @transform_1, window_bounds = array<i64: 288, 1>}, {pipeline_mode = #tpu.pipeline_mode<synchronous>, transform_indices = @transform_2, window_bounds = array<i64: 144, 128>}, {transform_indices = @transform_3, window_bounds = array<i64: 1, 288, 128>}, {transform_indices = @transform_4, window_bounds = array<i64: 1, 1, 1, 128>}, {transform_indices = @transform_5, window_bounds = array<i64: 1, 1, 1, 128>}]} {
    %c0 = arith.constant 0 : index
    %c0_0 = arith.constant 0 : index
    %c0_1 = arith.constant 0 : index
    %c0_2 = arith.constant 0 : index
    %0 = vector.load %arg2[%c0, %c0_0, %c0_1, %c0_2] : memref<1x1x328x16xbf16, #tpu.memory_space<vmem>>, vector<1x1x288x16xbf16>
    %1 = vector.shape_cast %0 : vector<1x1x288x16xbf16> to vector<288x16xbf16>
    %c0_3 = arith.constant 0 : index
    %c0_4 = arith.constant 0 : index
    %2 = vector.load %arg4[%c0_3, %c0_4] : memref<144x128xbf16, #tpu.memory_space<vmem>>, vector<16x128xbf16>
    %cst = arith.constant dense<0.000000e+00> : vector<288x128xf32>
    %3 = tpu.matmul %1, %2, %cst {dimension_numbers = #tpu.dot_dimension_numbers<[1], [0], [0], [1], [0, 0, 1, 1], [], []>} : vector<288x16xbf16>, vector<16x128xbf16>, vector<288x128xf32> -> vector<288x128xf32>
    %c0_5 = arith.constant 0 : index
    %c0_6 = arith.constant 0 : index
    %4 = vector.load %arg8[%c0_5, %c0_6] : memref<288x128xf32, #tpu.memory_space<vmem>>, vector<288x128xf32>
    tpu.vector_store %arg8[%c0_5, %c0_6], %3 {strides = array<i32>} : memref<288x128xf32, #tpu.memory_space<vmem>>, vector<288x128xf32>,
    %c0_7 = arith.constant 0 : index
    %c0_8 = arith.constant 0 : index
    %c1 = arith.constant 1 : index
    %c0_9 = arith.constant 0 : index
    %5 = vector.load %arg2[%c0_7, %c0_8, %c1, %c0_9] : memref<1x1x328x16xbf16, #tpu.memory_space<vmem>>, vector<1x1x288x16xbf16>
    %6 = vector.shape_cast %5 : vector<1x1x288x16xbf16> to vector<288x16xbf16>
    %c16 = arith.constant 16 : index
    %c0_10 = arith.constant 0 : index
    %7 = vector.load %arg4[%c16, %c0_10] : memref<144x128xbf16, #tpu.memory_space<vmem>>, vector<16x128xbf16>
    %cst_11 = arith.constant dense<0.000000e+00> : vector<288x128xf32>
    %8 = tpu.matmul %6, %7, %cst_11 {dimension_numbers = #tpu.dot_dimension_numbers<[1], [0], [0], [1], [0, 0, 1, 1], [], []>} : vector<288x16xbf16>, vector<16x128xbf16>, vector<288x128xf32> -> vector<288x128xf32>
    %c0_12 = arith.constant 0 : index
    %c0_13 = arith.constant 0 : index
    %9 = vector.load %arg8[%c0_12, %c0_13] : memref<288x128xf32, #tpu.memory_space<vmem>>, vector<288x128xf32>
    %10 = arith.addf %9, %8 : vector<288x128xf32>
    %c0_14 = arith.constant 0 : index
    %c0_15 = arith.constant 0 : index
    %11 = vector.load %arg8[%c0_14, %c0_15] : memref<288x128xf32, #tpu.memory_space<vmem>>, vector<288x128xf32>
    tpu.vector_store %arg8[%c0_14, %c0_15], %10 {strides = array<i32>} : memref<288x128xf32, #tpu.memory_space<vmem>>, vector<288x128xf32>,
    %c0_16 = arith.constant 0 : index
    %c0_17 = arith.constant 0 : index
    %c2 = arith.constant 2 : index
    %c0_18 = arith.constant 0 : index
    %12 = vector.load %arg2[%c0_16, %c0_17, %c2, %c0_18] : memref<1x1x328x16xbf16, #tpu.memory_space<vmem>>, vector<1x1x288x16xbf16>
    %13 = vector.shape_cast %12 : vector<1x1x288x16xbf16> to vector<288x16xbf16>
    %c32 = arith.constant 32 : index
    %c0_19 = arith.constant 0 : index
    %14 = vector.load %arg4[%c32, %c0_19] : memref<144x128xbf16, #tpu.memory_space<vmem>>, vector<16x128xbf16>
    %cst_20 = arith.constant dense<0.000000e+00> : vector<288x128xf32>
    %15 = tpu.matmul %13, %14, %cst_20 {dimension_numbers = #tpu.dot_dimension_numbers<[1], [0], [0], [1], [0, 0, 1, 1], [], []>} : vector<288x16xbf16>, vector<16x128xbf16>, vector<288x128xf32> -> vector<288x128xf32>
    %c0_21 = arith.constant 0 : index
    %c0_22 = arith.constant 0 : index
    %16 = vector.load %arg8[%c0_21, %c0_22] : memref<288x128xf32, #tpu.memory_space<vmem>>, vector<288x128xf32>
    %17 = arith.addf %16, %15 : vector<288x128xf32>
    %c0_23 = arith.constant 0 : index
    %c0_24 = arith.constant 0 : index
    %18 = vector.load %arg8[%c0_23, %c0_24] : memref<288x128xf32, #tpu.memory_space<vmem>>, vector<288x128xf32>
    tpu.vector_store %arg8[%c0_23, %c0_24], %17 {strides = array<i32>} : memref<288x128xf32, #tpu.memory_space<vmem>>, vector<288x128xf32>,
    %c0_25 = arith.constant 0 : index
    %c0_26 = arith.constant 0 : index
    %c18 = arith.constant 18 : index
    %c0_27 = arith.constant 0 : index
    %19 = vector.load %arg2[%c0_25, %c0_26, %c18, %c0_27] : memref<1x1x328x16xbf16, #tpu.memory_space<vmem>>, vector<1x1x288x16xbf16>
    %20 = vector.shape_cast %19 : vector<1x1x288x16xbf16> to vector<288x16xbf16>
    %c48 = arith.constant 48 : index
    %c0_28 = arith.constant 0 : index
    %21 = vector.load %arg4[%c48, %c0_28] : memref<144x128xbf16, #tpu.memory_space<vmem>>, vector<16x128xbf16>
    %cst_29 = arith.constant dense<0.000000e+00> : vector<288x128xf32>
    %22 = tpu.matmul %20, %21, %cst_29 {dimension_numbers = #tpu.dot_dimension_numbers<[1], [0], [0], [1], [0, 0, 1, 1], [], []>} : vector<288x16xbf16>, vector<16x128xbf16>, vector<288x128xf32> -> vector<288x128xf32>
    %c0_30 = arith.constant 0 : index
    %c0_31 = arith.constant 0 : index
    %23 = vector.load %arg8[%c0_30, %c0_31] : memref<288x128xf32, #tpu.memory_space<vmem>>, vector<288x128xf32>
    %24 = arith.addf %23, %22 : vector<288x128xf32>
    %c0_32 = arith.constant 0 : index
    %c0_33 = arith.constant 0 : index
    %25 = vector.load %arg8[%c0_32, %c0_33] : memref<288x128xf32, #tpu.memory_space<vmem>>, vector<288x128xf32>
    tpu.vector_store %arg8[%c0_32, %c0_33], %24 {strides = array<i32>} : memref<288x128xf32, #tpu.memory_space<vmem>>, vector<288x128xf32>,
    %c0_34 = arith.constant 0 : index
    %c0_35 = arith.constant 0 : index
    %c19 = arith.constant 19 : index
    %c0_36 = arith.constant 0 : index
    %26 = vector.load %arg2[%c0_34, %c0_35, %c19, %c0_36] : memref<1x1x328x16xbf16, #tpu.memory_space<vmem>>, vector<1x1x288x16xbf16>
    %27 = vector.shape_cast %26 : vector<1x1x288x16xbf16> to vector<288x16xbf16>
    %c64 = arith.constant 64 : index
    %c0_37 = arith.constant 0 : index
    %28 = vector.load %arg4[%c64, %c0_37] : memref<144x128xbf16, #tpu.memory_space<vmem>>, vector<16x128xbf16>
    %cst_38 = arith.constant dense<0.000000e+00> : vector<288x128xf32>
    %29 = tpu.matmul %27, %28, %cst_38 {dimension_numbers = #tpu.dot_dimension_numbers<[1], [0], [0], [1], [0, 0, 1, 1], [], []>} : vector<288x16xbf16>, vector<16x128xbf16>, vector<288x128xf32> -> vector<288x128xf32>
    %c0_39 = arith.constant 0 : index
    %c0_40 = arith.constant 0 : index
    %30 = vector.load %arg8[%c0_39, %c0_40] : memref<288x128xf32, #tpu.memory_space<vmem>>, vector<288x128xf32>
    %31 = arith.addf %30, %29 : vector<288x128xf32>
    %c0_41 = arith.constant 0 : index
    %c0_42 = arith.constant 0 : index
    %32 = vector.load %arg8[%c0_41, %c0_42] : memref<288x128xf32, #tpu.memory_space<vmem>>, vector<288x128xf32>
    tpu.vector_store %arg8[%c0_41, %c0_42], %31 {strides = array<i32>} : memref<288x128xf32, #tpu.memory_space<vmem>>, vector<288x128xf32>,
    %c0_43 = arith.constant 0 : index
    %c0_44 = arith.constant 0 : index
    %c20 = arith.constant 20 : index
    %c0_45 = arith.constant 0 : index
    %33 = vector.load %arg2[%c0_43, %c0_44, %c20, %c0_45] : memref<1x1x328x16xbf16, #tpu.memory_space<vmem>>, vector<1x1x288x16xbf16>
    %34 = vector.shape_cast %33 : vector<1x1x288x16xbf16> to vector<288x16xbf16>
    %c80 = arith.constant 80 : index
    %c0_46 = arith.constant 0 : index
    %35 = vector.load %arg4[%c80, %c0_46] : memref<144x128xbf16, #tpu.memory_space<vmem>>, vector<16x128xbf16>
    %cst_47 = arith.constant dense<0.000000e+00> : vector<288x128xf32>
    %36 = tpu.matmul %34, %35, %cst_47 {dimension_numbers = #tpu.dot_dimension_numbers<[1], [0], [0], [1], [0, 0, 1, 1], [], []>} : vector<288x16xbf16>, vector<16x128xbf16>, vector<288x128xf32> -> vector<288x128xf32>
    %c0_48 = arith.constant 0 : index
    %c0_49 = arith.constant 0 : index
    %37 = vector.load %arg8[%c0_48, %c0_49] : memref<288x128xf32, #tpu.memory_space<vmem>>, vector<288x128xf32>
    %38 = arith.addf %37, %36 : vector<288x128xf32>
    %c0_50 = arith.constant 0 : index
    %c0_51 = arith.constant 0 : index
    %39 = vector.load %arg8[%c0_50, %c0_51] : memref<288x128xf32, #tpu.memory_space<vmem>>, vector<288x128xf32>
    tpu.vector_store %arg8[%c0_50, %c0_51], %38 {strides = array<i32>} : memref<288x128xf32, #tpu.memory_space<vmem>>, vector<288x128xf32>,
    %c0_52 = arith.constant 0 : index
    %c0_53 = arith.constant 0 : index
    %c36 = arith.constant 36 : index
    %c0_54 = arith.constant 0 : index
    %40 = vector.load %arg2[%c0_52, %c0_53, %c36, %c0_54] : memref<1x1x328x16xbf16, #tpu.memory_space<vmem>>, vector<1x1x288x16xbf16>
    %41 = vector.shape_cast %40 : vector<1x1x288x16xbf16> to vector<288x16xbf16>
    %c96 = arith.constant 96 : index
    %c0_55 = arith.constant 0 : index
    %42 = vector.load %arg4[%c96, %c0_55] : memref<144x128xbf16, #tpu.memory_space<vmem>>, vector<16x128xbf16>
    %cst_56 = arith.constant dense<0.000000e+00> : vector<288x128xf32>
    %43 = tpu.matmul %41, %42, %cst_56 {dimension_numbers = #tpu.dot_dimension_numbers<[1], [0], [0], [1], [0, 0, 1, 1], [], []>} : vector<288x16xbf16>, vector<16x128xbf16>, vector<288x128xf32> -> vector<288x128xf32>
    %c0_57 = arith.constant 0 : index
    %c0_58 = arith.constant 0 : index
    %44 = vector.load %arg8[%c0_57, %c0_58] : memref<288x128xf32, #tpu.memory_space<vmem>>, vector<288x128xf32>
    %45 = arith.addf %44, %43 : vector<288x128xf32>
    %c0_59 = arith.constant 0 : index
    %c0_60 = arith.constant 0 : index
    %46 = vector.load %arg8[%c0_59, %c0_60] : memref<288x128xf32, #tpu.memory_space<vmem>>, vector<288x128xf32>
    tpu.vector_store %arg8[%c0_59, %c0_60], %45 {strides = array<i32>} : memref<288x128xf32, #tpu.memory_space<vmem>>, vector<288x128xf32>,
    %c0_61 = arith.constant 0 : index
    %c0_62 = arith.constant 0 : index
    %c37 = arith.constant 37 : index
    %c0_63 = arith.constant 0 : index
    %47 = vector.load %arg2[%c0_61, %c0_62, %c37, %c0_63] : memref<1x1x328x16xbf16, #tpu.memory_space<vmem>>, vector<1x1x288x16xbf16>
    %48 = vector.shape_cast %47 : vector<1x1x288x16xbf16> to vector<288x16xbf16>
    %c112 = arith.constant 112 : index
    %c0_64 = arith.constant 0 : index
    %49 = vector.load %arg4[%c112, %c0_64] : memref<144x128xbf16, #tpu.memory_space<vmem>>, vector<16x128xbf16>
    %cst_65 = arith.constant dense<0.000000e+00> : vector<288x128xf32>
    %50 = tpu.matmul %48, %49, %cst_65 {dimension_numbers = #tpu.dot_dimension_numbers<[1], [0], [0], [1], [0, 0, 1, 1], [], []>} : vector<288x16xbf16>, vector<16x128xbf16>, vector<288x128xf32> -> vector<288x128xf32>
    %c0_66 = arith.constant 0 : index
    %c0_67 = arith.constant 0 : index
    %51 = vector.load %arg8[%c0_66, %c0_67] : memref<288x128xf32, #tpu.memory_space<vmem>>, vector<288x128xf32>
    %52 = arith.addf %51, %50 : vector<288x128xf32>
    %c0_68 = arith.constant 0 : index
    %c0_69 = arith.constant 0 : index
    %53 = vector.load %arg8[%c0_68, %c0_69] : memref<288x128xf32, #tpu.memory_space<vmem>>, vector<288x128xf32>
    tpu.vector_store %arg8[%c0_68, %c0_69], %52 {strides = array<i32>} : memref<288x128xf32, #tpu.memory_space<vmem>>, vector<288x128xf32>,
    %c0_70 = arith.constant 0 : index
    %c0_71 = arith.constant 0 : index
    %c38 = arith.constant 38 : index
    %c0_72 = arith.constant 0 : index
    %54 = vector.load %arg2[%c0_70, %c0_71, %c38, %c0_72] : memref<1x1x328x16xbf16, #tpu.memory_space<vmem>>, vector<1x1x288x16xbf16>
    %55 = vector.shape_cast %54 : vector<1x1x288x16xbf16> to vector<288x16xbf16>
    %c128 = arith.constant 128 : index
    %c0_73 = arith.constant 0 : index
    %56 = vector.load %arg4[%c128, %c0_73] : memref<144x128xbf16, #tpu.memory_space<vmem>>, vector<16x128xbf16>
    %cst_74 = arith.constant dense<0.000000e+00> : vector<288x128xf32>
    %57 = tpu.matmul %55, %56, %cst_74 {dimension_numbers = #tpu.dot_dimension_numbers<[1], [0], [0], [1], [0, 0, 1, 1], [], []>} : vector<288x16xbf16>, vector<16x128xbf16>, vector<288x128xf32> -> vector<288x128xf32>
    %c0_75 = arith.constant 0 : index
    %c0_76 = arith.constant 0 : index
    %58 = vector.load %arg8[%c0_75, %c0_76] : memref<288x128xf32, #tpu.memory_space<vmem>>, vector<288x128xf32>
    %59 = arith.addf %58, %57 : vector<288x128xf32>
    %c0_77 = arith.constant 0 : index
    %c0_78 = arith.constant 0 : index
    %60 = vector.load %arg8[%c0_77, %c0_78] : memref<288x128xf32, #tpu.memory_space<vmem>>, vector<288x128xf32>
    tpu.vector_store %arg8[%c0_77, %c0_78], %59 {strides = array<i32>} : memref<288x128xf32, #tpu.memory_space<vmem>>, vector<288x128xf32>,
    %c0_79 = arith.constant 0 : index
    %c0_80 = arith.constant 0 : index
    %61 = vector.load %arg8[%c0_79, %c0_80] : memref<288x128xf32, #tpu.memory_space<vmem>>, vector<288x128xf32>
    %62 = vector.shape_cast %61 : vector<288x128xf32> to vector<1x288x128xf32>
    %63 = arith.truncf %62 : vector<1x288x128xf32> to vector<1x288x128xbf16>
    %c0_81 = arith.constant 0 : index
    %c0_82 = arith.constant 0 : index
    %c0_83 = arith.constant 0 : index
    %64 = vector.load %arg5[%c0_81, %c0_82, %c0_83] : memref<1x288x128xbf16, #tpu.memory_space<vmem>>, vector<1x288x128xbf16>
    tpu.vector_store %arg5[%c0_81, %c0_82, %c0_83], %63 {strides = array<i32>} : memref<1x288x128xbf16, #tpu.memory_space<vmem>>, vector<1x288x128xbf16>,
    %c0_84 = arith.constant 0 : index
    %c0_85 = arith.constant 0 : index
    %65 = vector.load %arg3[%c0_84, %c0_85] : memref<288x1xf32, #tpu.memory_space<vmem>>, vector<288x1xf32>
    %66 = vector.broadcast %65 : vector<288x1xf32> to vector<288x128xf32>
    %67 = arith.mulf %61, %66 : vector<288x128xf32>
    %cst_86 = arith.constant dense<0.000000e+00> : vector<128xf32>
    %68 = vector.multi_reduction <add>, %67, %cst_86 [0] : vector<288x128xf32> to vector<128xf32>
    %69 = vector.shape_cast %68 : vector<128xf32> to vector<1x1x1x128xf32>
    %c0_87 = arith.constant 0 : index
    %c0_88 = arith.constant 0 : index
    %c0_89 = arith.constant 0 : index
    %c0_90 = arith.constant 0 : index
    %70 = vector.load %arg6[%c0_87, %c0_88, %c0_89, %c0_90] : memref<1x1x1x128xf32, #tpu.memory_space<vmem>>, vector<1x1x1x128xf32>
    tpu.vector_store %arg6[%c0_87, %c0_88, %c0_89, %c0_90], %69 {strides = array<i32>} : memref<1x1x1x128xf32, #tpu.memory_space<vmem>>, vector<1x1x1x128xf32>,
    %71 = arith.mulf %67, %61 : vector<288x128xf32>
    %cst_91 = arith.constant dense<0.000000e+00> : vector<128xf32>
    %72 = vector.multi_reduction <add>, %71, %cst_91 [0] : vector<288x128xf32> to vector<128xf32>
    %73 = vector.shape_cast %72 : vector<128xf32> to vector<1x1x1x128xf32>
    %c0_92 = arith.constant 0 : index
    %c0_93 = arith.constant 0 : index
    %c0_94 = arith.constant 0 : index
    %c0_95 = arith.constant 0 : index
    %74 = vector.load %arg7[%c0_92, %c0_93, %c0_94, %c0_95] : memref<1x1x1x128xf32, #tpu.memory_space<vmem>>, vector<1x1x1x128xf32>
    tpu.vector_store %arg7[%c0_92, %c0_93, %c0_94, %c0_95], %73 {strides = array<i32>} : memref<1x1x1x128xf32, #tpu.memory_space<vmem>>, vector<1x1x1x128xf32>,
    return
  }
  func.func @transform_0(%arg0: i32, %arg1: i32) -> (i32, i32, i32, i32) {
    %c0_i32 = arith.constant 0 : i32
    %c0_i32_0 = arith.constant 0 : i32
    %c0_i32_1 = arith.constant 0 : i32
    return %arg0, %arg1, %c0_i32, %c0_i32_0 : i32, i32, i32, i32
  }
  func.func @transform_1(%arg0: i32, %arg1: i32) -> (i32, i32) {
    %c0_i32 = arith.constant 0 : i32
    %c0_i32_0 = arith.constant 0 : i32
    %c0_i32_1 = arith.constant 0 : i32
    return %c0_i32, %c0_i32_0 : i32, i32
  }
  func.func @transform_2(%arg0: i32, %arg1: i32) -> (i32, i32) {
    %c0_i32 = arith.constant 0 : i32
    %c0_i32_0 = arith.constant 0 : i32
    %c0_i32_1 = arith.constant 0 : i32
    return %c0_i32, %c0_i32_0 : i32, i32
  }
  func.func @transform_3(%arg0: i32, %arg1: i32) -> (i32, i32, i32) {
    %c0_i32 = arith.constant 0 : i32
    %c0_i32_0 = arith.constant 0 : i32
    return %arg0, %arg1, %c0_i32 : i32, i32, i32
  }
  func.func @transform_4(%arg0: i32, %arg1: i32) -> (i32, i32, i32, i32) {
    %c0_i32 = arith.constant 0 : i32
    %c0_i32_0 = arith.constant 0 : i32
    %c0_i32_1 = arith.constant 0 : i32
    return %arg0, %arg1, %c0_i32, %c0_i32_0 : i32, i32, i32, i32
  }
  func.func @transform_5(%arg0: i32, %arg1: i32) -> (i32, i32, i32, i32) {
    %c0_i32 = arith.constant 0 : i32
    %c0_i32_0 = arith.constant 0 : i32
    %c0_i32_1 = arith.constant 0 : i32
    return %arg0, %arg1, %c0_i32, %c0_i32_0 : i32, i32, i32, i32
  }
}

module attributes {stable_mosaic.version = 11 : i64} {
  func.func @_bn_relu_pool_kernel(%arg0: i32, %arg1: i32, %arg2: memref<1x8x2x8x256xbf16, #tpu.memory_space<vmem>>, %arg3: memref<1x256xf32, #tpu.memory_space<vmem>>, %arg4: memref<1x256xf32, #tpu.memory_space<vmem>>, %arg5: memref<1x8x8x128xf32, #tpu.memory_space<vmem>>, %arg6: memref<1x8x8x128xi32, #tpu.memory_space<vmem>>) attributes {dimension_semantics = [#tpu.dimension_semantics<parallel>, #tpu.dimension_semantics<parallel>], iteration_bounds = array<i64: 2, 1>, scalar_prefetch = 0 : i64, scratch_operands = 0 : i64, tpu.core_type = #tpu.core_type<tc>, window_params = [{transform_indices = @transform_0, window_bounds = array<i64: 1, 8, 2, 8, 256>}, {pipeline_mode = #tpu.pipeline_mode<synchronous>, transform_indices = @transform_1, window_bounds = array<i64: 1, 256>}, {pipeline_mode = #tpu.pipeline_mode<synchronous>, transform_indices = @transform_2, window_bounds = array<i64: 1, 256>}, {transform_indices = @transform_3, window_bounds = array<i64: 1, 8, 8, 128>}, {transform_indices = @transform_4, window_bounds = array<i64: 1, 8, 8, 128>}]} {
    %c0 = arith.constant 0 : index
    %c0_0 = arith.constant 0 : index
    %0 = vector.load %arg3[%c0, %c0_0] : memref<1x256xf32, #tpu.memory_space<vmem>>, vector<1x256xf32>
    %c0_1 = arith.constant 0 : index
    %c0_2 = arith.constant 0 : index
    %1 = vector.load %arg4[%c0_1, %c0_2] : memref<1x256xf32, #tpu.memory_space<vmem>>, vector<1x256xf32>
    %c0_3 = arith.constant 0 : index
    %c0_4 = arith.constant 0 : index
    %c0_5 = arith.constant 0 : index
    %c0_6 = arith.constant 0 : index
    %c0_7 = arith.constant 0 : index
    %2 = vector.load %arg2[%c0_3, %c0_4, %c0_5, %c0_6, %c0_7] : memref<1x8x2x8x256xbf16, #tpu.memory_space<vmem>>, vector<1x8x1x8x256xbf16>
    %3 = vector.shape_cast %2 : vector<1x8x1x8x256xbf16> to vector<8x8x256xbf16>
    %4 = arith.extf %3 : vector<8x8x256xbf16> to vector<8x8x256xf32>
    %5 = vector.shape_cast %0 : vector<1x256xf32> to vector<1x1x256xf32>
    %6 = vector.broadcast %5 : vector<1x1x256xf32> to vector<8x8x256xf32>
    %7 = arith.mulf %4, %6 : vector<8x8x256xf32>
    %8 = vector.shape_cast %1 : vector<1x256xf32> to vector<1x1x256xf32>
    %9 = vector.broadcast %8 : vector<1x1x256xf32> to vector<8x8x256xf32>
    %10 = arith.addf %7, %9 : vector<8x8x256xf32>
    %cst = arith.constant 0.000000e+00 : f32
    %11 = vector.broadcast %cst : f32 to vector<8x8x256xf32>
    %12 = arith.maximumf %10, %11 : vector<8x8x256xf32>
    %c0_8 = arith.constant 0 : index
    %c0_9 = arith.constant 0 : index
    %c1 = arith.constant 1 : index
    %c0_10 = arith.constant 0 : index
    %c0_11 = arith.constant 0 : index
    %13 = vector.load %arg2[%c0_8, %c0_9, %c1, %c0_10, %c0_11] : memref<1x8x2x8x256xbf16, #tpu.memory_space<vmem>>, vector<1x8x1x8x256xbf16>
    %14 = vector.shape_cast %13 : vector<1x8x1x8x256xbf16> to vector<8x8x256xbf16>
    %15 = arith.extf %14 : vector<8x8x256xbf16> to vector<8x8x256xf32>
    %16 = vector.shape_cast %0 : vector<1x256xf32> to vector<1x1x256xf32>
    %17 = vector.broadcast %16 : vector<1x1x256xf32> to vector<8x8x256xf32>
    %18 = arith.mulf %15, %17 : vector<8x8x256xf32>
    %19 = vector.shape_cast %1 : vector<1x256xf32> to vector<1x1x256xf32>
    %20 = vector.broadcast %19 : vector<1x1x256xf32> to vector<8x8x256xf32>
    %21 = arith.addf %18, %20 : vector<8x8x256xf32>
    %cst_12 = arith.constant 0.000000e+00 : f32
    %22 = vector.broadcast %cst_12 : f32 to vector<8x8x256xf32>
    %23 = arith.maximumf %21, %22 : vector<8x8x256xf32>
    %24 = vector.extract_strided_slice %12 {offsets = [0, 0, 0], sizes = [8, 8, 128], strides = [1, 1, 1]} : vector<8x8x256xf32> to vector<8x8x128xf32>
    %25 = vector.extract_strided_slice %12 {offsets = [0, 0, 128], sizes = [8, 8, 128], strides = [1, 1, 1]} : vector<8x8x256xf32> to vector<8x8x128xf32>
    %26 = vector.extract_strided_slice %23 {offsets = [0, 0, 0], sizes = [8, 8, 128], strides = [1, 1, 1]} : vector<8x8x256xf32> to vector<8x8x128xf32>
    %27 = vector.extract_strided_slice %23 {offsets = [0, 0, 128], sizes = [8, 8, 128], strides = [1, 1, 1]} : vector<8x8x256xf32> to vector<8x8x128xf32>
    %28 = tpu.iota {dimensions = array<i32: 0>} : vector<8x8x128xi32>
    %c8_i32 = arith.constant 8 : i32
    %29 = arith.muli %arg1, %c8_i32 : i32
    %30 = vector.broadcast %29 : i32 to vector<8x8x128xi32>
    %31 = arith.addi %28, %30 : vector<8x8x128xi32>
    %32 = tpu.iota {dimensions = array<i32: 1>} : vector<8x8x128xi32>
    %c2_i32 = arith.constant 2 : i32
    %33 = vector.broadcast %c2_i32 : i32 to vector<8x8x128xi32>
    %34 = arith.muli %33, %31 : vector<8x8x128xi32>
    %c16_i32 = arith.constant 16 : i32
    %35 = vector.broadcast %c16_i32 : i32 to vector<8x8x128xi32>
    %36 = arith.muli %34, %35 : vector<8x8x128xi32>
    %c2_i32_13 = arith.constant 2 : i32
    %37 = vector.broadcast %c2_i32_13 : i32 to vector<8x8x128xi32>
    %38 = arith.muli %37, %32 : vector<8x8x128xi32>
    %39 = arith.addi %36, %38 : vector<8x8x128xi32>
    %40 = arith.cmpf ogt, %25, %24 : vector<8x8x128xf32>
    %41 = arith.select %40, %25, %24 : vector<8x8x128xi1>, vector<8x8x128xf32>
    %c1_i32 = arith.constant 1 : i32
    %42 = vector.broadcast %c1_i32 : i32 to vector<8x8x128xi32>
    %43 = arith.addi %39, %42 : vector<8x8x128xi32>
    %44 = arith.select %40, %43, %39 : vector<8x8x128xi1>, vector<8x8x128xi32>
    %45 = arith.cmpf ogt, %26, %41 : vector<8x8x128xf32>
    %46 = arith.select %45, %26, %41 : vector<8x8x128xi1>, vector<8x8x128xf32>
    %c16_i32_14 = arith.constant 16 : i32
    %47 = vector.broadcast %c16_i32_14 : i32 to vector<8x8x128xi32>
    %48 = arith.addi %39, %47 : vector<8x8x128xi32>
    %49 = arith.select %45, %48, %44 : vector<8x8x128xi1>, vector<8x8x128xi32>
    %50 = arith.cmpf ogt, %27, %46 : vector<8x8x128xf32>
    %51 = arith.select %50, %27, %46 : vector<8x8x128xi1>, vector<8x8x128xf32>
    %c17_i32 = arith.constant 17 : i32
    %52 = vector.broadcast %c17_i32 : i32 to vector<8x8x128xi32>
    %53 = arith.addi %39, %52 : vector<8x8x128xi32>
    %54 = arith.select %50, %53, %49 : vector<8x8x128xi1>, vector<8x8x128xi32>
    %55 = vector.shape_cast %51 : vector<8x8x128xf32> to vector<1x8x8x128xf32>
    %c0_15 = arith.constant 0 : index
    %c0_16 = arith.constant 0 : index
    %c0_17 = arith.constant 0 : index
    %c0_18 = arith.constant 0 : index
    %56 = vector.load %arg5[%c0_15, %c0_16, %c0_17, %c0_18] : memref<1x8x8x128xf32, #tpu.memory_space<vmem>>, vector<1x8x8x128xf32>
    tpu.vector_store %arg5[%c0_15, %c0_16, %c0_17, %c0_18], %55 {strides = array<i32>} : memref<1x8x8x128xf32, #tpu.memory_space<vmem>>, vector<1x8x8x128xf32>,
    %57 = vector.shape_cast %54 : vector<8x8x128xi32> to vector<1x8x8x128xi32>
    %c0_19 = arith.constant 0 : index
    %c0_20 = arith.constant 0 : index
    %c0_21 = arith.constant 0 : index
    %c0_22 = arith.constant 0 : index
    %58 = vector.load %arg6[%c0_19, %c0_20, %c0_21, %c0_22] : memref<1x8x8x128xi32, #tpu.memory_space<vmem>>, vector<1x8x8x128xi32>
    tpu.vector_store %arg6[%c0_19, %c0_20, %c0_21, %c0_22], %57 {strides = array<i32>} : memref<1x8x8x128xi32, #tpu.memory_space<vmem>>, vector<1x8x8x128xi32>,
    return
  }
  func.func @transform_0(%arg0: i32, %arg1: i32) -> (i32, i32, i32, i32, i32) {
    %c0_i32 = arith.constant 0 : i32
    %c0_i32_0 = arith.constant 0 : i32
    %c0_i32_1 = arith.constant 0 : i32
    %c0_i32_2 = arith.constant 0 : i32
    return %arg0, %arg1, %c0_i32, %c0_i32_0, %c0_i32_1 : i32, i32, i32, i32, i32
  }
  func.func @transform_1(%arg0: i32, %arg1: i32) -> (i32, i32) {
    %c0_i32 = arith.constant 0 : i32
    %c0_i32_0 = arith.constant 0 : i32
    %c0_i32_1 = arith.constant 0 : i32
    return %c0_i32, %c0_i32_0 : i32, i32
  }
  func.func @transform_2(%arg0: i32, %arg1: i32) -> (i32, i32) {
    %c0_i32 = arith.constant 0 : i32
    %c0_i32_0 = arith.constant 0 : i32
    %c0_i32_1 = arith.constant 0 : i32
    return %c0_i32, %c0_i32_0 : i32, i32
  }
  func.func @transform_3(%arg0: i32, %arg1: i32) -> (i32, i32, i32, i32) {
    %c0_i32 = arith.constant 0 : i32
    %c0_i32_0 = arith.constant 0 : i32
    %c0_i32_1 = arith.constant 0 : i32
    return %arg0, %arg1, %c0_i32, %c0_i32_0 : i32, i32, i32, i32
  }
  func.func @transform_4(%arg0: i32, %arg1: i32) -> (i32, i32, i32, i32) {
    %c0_i32 = arith.constant 0 : i32
    %c0_i32_0 = arith.constant 0 : i32
    %c0_i32_1 = arith.constant 0 : i32
    return %arg0, %arg1, %c0_i32, %c0_i32_0 : i32, i32, i32, i32
  }
}

</mosaic_0001>

<bundles_post_ra>
// kernel: _segnet_down3_nchw.4
= control target key start
LH: loop header
LB: loop body
LE: loop exit
PB: predicated region body
PF: predicated region fallthrough
CT: control target
= control target key end

     0   :  { %s1761_s18 = smov 0   ;;  %s1763_s19 = smov 0   ;;  %s2082_s0 = inlined_call_operand.vmem [shape: bf16[2,1,256,72], index: 0, kind: input, shape index: {}]   ;;  %s2083_s1 = inlined_call_operand.vmem [shape: f32[256,1], index: 1, kind: input, shape index: {}]   ;;  %s2084_s2 = inlined_call_operand.vmem [shape: bf16[72,128], index: 2, kind: input, shape index: {}]   ;;  %s2085_s3 = inlined_call_operand.vmem [shape: bf16[2,256,128], index: 3, kind: output, shape index: {0}]   ;;  %s2086_s4 = inlined_call_operand.vmem [shape: f32[2,1,1,128], index: 4, kind: output, shape index: {1}]   ;;  %s2087_s5 = inlined_call_operand.vmem [shape: f32[2,1,1,128], index: 5, kind: output, shape index: {2}]  }
   0x1   :  { %s1765_s20 = smov 0  }
   0x2 LB: > { %s28_s21 = sadd.s32 1, %s1724_s19  ;;  %p1378_p0 = scmp.ge.s32.totalorder %s1728_s20, 1  ;;  %s1728_s20 = sphi %s1765_s20, %s16_s20   ;;  %s1724_s19 = sphi %s1763_s19, %s2089_s19   ;;  %s1720_s18 = sphi %s1761_s18, %s2088_s18  }
   0x3   : > { %p30_p1 = scmp.ge.s32.totalorder %s28_s21, 2  ;;  %p216_p2 = scmp.lt.s32.totalorder %s1728_s20, 3 }
   0x5   : > { %s2091_s21 = smov (%p30_p1, %s28_s21), 0  ;;  %p217_p3 = pnand %p1378_p0, %p216_p2 }
   0x6   : > { %v1685_v0 = vld [vmem:[%s2084_s2] sm:$0xff] (!%p217_p3)   ;;  %v1686_v1 = vld [vmem:[%s2084_s2 + $0x8] sm:$0xff] (!%p217_p3)   ;;  %p264_p4 = scmp.lt.s32.totalorder (!%p217_p3), %s1720_s18, 1  ;;  %v1687_v2 = vld [vmem:[%s2084_s2 + $0x10] sm:$0xff] (!%p217_p3)   ;;  %v1730_v4 = vmov (!%p217_p3), 0   ;;  %vm444_vm0 = vcmask (!%p217_p3), 588800  }
   0x7   : > { %220 = sbr.rel (%p217_p3) target bundleno = 322 (0x142), region = 32  ;;  %1604 = vmatprep.subr.bf16.mxu0 (!%p217_p3), %v1685_v0  ;;  %1646 = vmatprep.subr.bf16.mxu1 (!%p217_p3), %v1685_v0  ;;  %v882_v3 = vld [vmem:[%s2083_s1] sm:$0xff] (!%p217_p3)  ;;  %v884_v5 = vld [vmem:[%s2083_s1 + $0x10] sm:$0xff] (!%p217_p3)  ;;  %v1688_v6 = vld [vmem:[%s2084_s2 + $0x18] sm:$0xff] (!%p217_p3)   ;;  %vm493_vm1 = vcmask (!%p217_p3), 1043456  }
   0x8   : > { %1605 = vmatpush3.bf16.msra.mxu0 (!%p217_p3), %v1685_v0  ;;  %1651 = vmatpush3.bf16.msra.mxu1 (!%p217_p3), %v1685_v0  ;;  %v883_v7 = vld [vmem:[%s2083_s1 + $0x8] sm:$0xff] (!%p217_p3)  ;;  %v885_v10 = vld [vmem:[%s2083_s1 + $0x18] sm:$0xff] (!%p217_p3)  ;;  %v886_v11 = vld [vmem:[%s2083_s1 + $0x20] sm:$0xff] (!%p217_p3) }
   0x9   : > { %1606 = vmatprep.subr.bf16.mxu0 (!%p217_p3), %v1686_v1  ;;  %1647 = vmatprep.subr.bf16.mxu1 (!%p217_p3), %v1686_v1  ;;  %v1689_v12 = vld [vmem:[%s2084_s2 + $0x20] ss:$0 sps:$4 sm:$0xff] (!%p217_p3)   ;;  %v887_v13 = vld [vmem:[%s2083_s1 + $0x28] sm:$0xff] (!%p217_p3)  ;;  %v888_v14 = vld [vmem:[%s2083_s1 + $0x30] sm:$0xff] (!%p217_p3) }
   0xa   : > { %1683 = vset.pattern.permute.xlu0 (!%p217_p3), %v1730_v4  ;;  %1684 = vset.pattern.permute.xlu1 (!%p217_p3), %v1730_v4  ;;  %v495_v15 = vsel (!%p217_p3), %vm493_vm1, %v1689_v12, 0  ;;  %v889_v20 = vld [vmem:[%s2083_s1 + $0x38] sm:$0xff] (!%p217_p3)  ;;  %v890_v21 = vld [vmem:[%s2083_s1 + $0x40] sm:$0xff] (!%p217_p3)  ;;  %v891_v22 = vld [vmem:[%s2083_s1 + $0x48] sm:$0xff] (!%p217_p3) }
   0xb   : > { %916 = vperm.xlu0 (!%p217_p3), %1683, %v882_v3   ;;  %926 = vperm.xlu1 (!%p217_p3), %1684, %v884_v5   ;;  %v892_v23 = vld [vmem:[%s2083_s1 + $0x50] sm:$0xff] (!%p217_p3)  ;;  %v893_v28 = vld [vmem:[%s2083_s1 + $0x58] sm:$0xff] (!%p217_p3)  ;;  %v894_v29 = vld [vmem:[%s2083_s1 + $0x60] sm:$0xff] (!%p217_p3) }
   0xc   : > { %1607 = vmatpush3.bf16.msra.mxu0 (!%p217_p3), %v1686_v1  ;;  %1652 = vmatpush3.bf16.msra.mxu1 (!%p217_p3), %v1686_v1  ;;  %v895_v30 = vld [vmem:[%s2083_s1 + $0x68] sm:$0xff] (!%p217_p3)  ;;  %v896_v31 = vld [vmem:[%s2083_s1 + $0x70] sm:$0xff] (!%p217_p3)  ;;  %v897_v36 = vld [vmem:[%s2083_s1 + $0x78] sm:$0xff] (!%p217_p3) }
   0xd   : > { %1608 = vmatprep.subr.bf16.mxu0 (!%p217_p3), %v1687_v2  ;;  %1648 = vmatprep.subr.bf16.mxu1 (!%p217_p3), %v1687_v2  ;;  %v898_v37 = vld [vmem:[%s2083_s1 + $0x80] sm:$0xff] (!%p217_p3)  ;;  %v899_v38 = vld [vmem:[%s2083_s1 + $0x88] sm:$0xff] (!%p217_p3)  ;;  %v900_v39 = vld [vmem:[%s2083_s1 + $0x90] sm:$0xff] (!%p217_p3) }
   0xe   : > { %s2093_s18 = smov (!%p264_p4, %s1720_s18), 1  ;;  %v901_v42 = vld [vmem:[%s2083_s1 + $0x98] sm:$0xff]  ;;  %v902_v43 = vld [vmem:[%s2083_s1 + $0xa0] sm:$0xff]  ;;  %v903_v44 = vld [vmem:[%s2083_s1 + $0xa8] sm:$0xff] }
   0xf   : > { %s1454_s30 = sshll.u32 %s2093_s18, 7  ;;  %921 = vperm.xlu0 %1683, %v883_v7   ;;  %931 = vperm.xlu1 %1684, %v885_v10   ;;  %v904_v45 = vld [vmem:[%s2083_s1 + $0xb0] sm:$0xff]  ;;  %v905_v46 = vld [vmem:[%s2083_s1 + $0xb8] sm:$0xff]  ;;  %v906_v47 = vld [vmem:[%s2083_s1 + $0xc0] sm:$0xff]  ;;  %s288_s24 = scalar_lea.vmem %s2086_s4, %s2093_s18 }
  0x10   : > { %s1805_s12 = scalar_lea.vmem %s2082_s0, %s1454_s30  ;;  %1609 = vmatpush3.bf16.msra.mxu0 %v1687_v2  ;;  %1653 = vmatpush3.bf16.msra.mxu1 %v1687_v2  ;;  %v907_v48 = vld [vmem:[%s2083_s1 + $0xc8] sm:$0xff]  ;;  %v908_v49 = vld [vmem:[%s2083_s1 + $0xd0] sm:$0xff]  ;;  %v909_v50 = vld [vmem:[%s2083_s1 + $0xd8] sm:$0xff]  ;;  %s1953_s22 = scalar_lea.vmem %s2085_s3, %s1454_s30 }
  0x11   : > { %v1690_v8 = vld [vmem:[%s1805_s12] sm:$0xff]   ;;  %1610 = vmatprep.subr.bf16.mxu0 %v1688_v6  ;;  %1649 = vmatprep.subr.bf16.mxu1 %v1688_v6  ;;  %v1692_v16 = vld [vmem:[%s1805_s12 + $0x8] sm:$0xff]   ;;  %v1694_v18 = vld [vmem:[%s1805_s12 + $0x10] sm:$0xff]   ;;  %s294_s27 = scalar_lea.vmem %s2087_s5, %s2093_s18 }
  0x12   : > { %v1691_v9 = vld [vmem:[%s1805_s12 + $0x40] sm:$0xff]   ;;  %1614 = vmatprep.mubr.msk.bf16.mxu0 %vm444_vm0, %v1690_v8  ;;  %v1693_v17 = vld [vmem:[%s1805_s12 + $0x48] sm:$0xff]   ;;  %v1695_v19 = vld [vmem:[%s1805_s12 + $0x50] sm:$0xff]  }
  0x13   : > { %1630 = vmatprep.mubr.msk.bf16.mxu1 %vm444_vm0, %v1691_v9  ;;  %936 = vperm.xlu0 %1683, %v886_v11   ;;  %v1696_v24 = vld [vmem:[%s1805_s12 + $0x18] sm:$0xff]   ;;  %v1698_v26 = vld [vmem:[%s1805_s12 + $0x20] sm:$0xff]   ;;  %v1700_v32 = vld [vmem:[%s1805_s12 + $0x28] sm:$0xff]  }
  0x14   : > { %1611 = vmatpush3.bf16.msra.mxu0 %v1688_v6  ;;  %1654 = vmatpush3.bf16.msra.mxu1 %v1688_v6  ;;  %v1697_v25 = vld [vmem:[%s1805_s12 + $0x58] sm:$0xff]   ;;  %v1699_v27 = vld [vmem:[%s1805_s12 + $0x60] sm:$0xff]   ;;  %v1701_v33 = vld [vmem:[%s1805_s12 + $0x68] sm:$0xff]  }
  0x15   : > { %1656 = vmatprep.subr.msk.bf16.mxu0 %vm493_vm1, %v1689_v12  ;;  %1657 = vmatprep.subr.msk.bf16.mxu1 %vm493_vm1, %v1689_v12  ;;  %v1702_v34 = vld [vmem:[%s1805_s12 + $0x30] sm:$0xff]   ;;  %v1704_v40 = vld [vmem:[%s1805_s12 + $0x38] sm:$0xff]   ;;  %v910_v51 = vld [vmem:[%s2083_s1 + $0xe0] sm:$0xff] }
  0x16   : > { %941 = vperm.xlu1 %1684, %v887_v13   ;;  %v1703_v35 = vld [vmem:[%s1805_s12 + $0x70] sm:$0xff]   ;;  %v1705_v41 = vld [vmem:[%s1805_s12 + $0x78] sm:$0xff]   ;;  %v911_v52 = vld [vmem:[%s2083_s1 + $0xe8] sm:$0xff] }
  0x17   : > { %946 = vperm.xlu0 %1683, %v888_v14   ;;  %v912_v53 = vld [vmem:[%s2083_s1 + $0xf0] sm:$0xff]  ;;  %v913_v54 = vld [vmem:[%s2083_s1 + $0xf8] sm:$0xff] }
  0x18   : > { %1613 = vmatpush3.bf16.msra.mxu0 %v495_v15  ;;  %1655 = vmatpush3.bf16.msra.mxu1 %v495_v15 }
  0x1a   : > { %951 = vperm.xlu1 %1684, %v889_v20  }
  0x1b   : > { %1615 = vmatmul.mubr.msk.bf16.vlgmr.msra.gmra.mrb[0].mxu0 %vm444_vm0, %v1692_v16  ;;  %1631 = vmatmul.mubr.msk.bf16.vlgmr.msra.gmra.mrb[0].mxu1 %vm444_vm0, %v1693_v17 }
  0x1c   : > { %1618 = vmatprep.mubr.msk.bf16.mxu0 %vm444_vm0, %v1694_v18  ;;  %1634 = vmatprep.mubr.msk.bf16.mxu1 %vm444_vm0, %v1695_v19 }
  0x1d   : > { %956 = vperm.xlu0 %1683, %v890_v21  }
  0x1e   : > { %961 = vperm.xlu1 %1684, %v891_v22  }
  0x21   : > { %966 = vperm.xlu0 %1683, %v892_v23  }
  0x22   : > { %971 = vperm.xlu1 %1684, %v893_v28  }
  0x23   : > { %1619 = vmatmul.mubr.msk.bf16.gmra.mrb[4].mxu0 %vm444_vm0, %v1696_v24  ;;  %1635 = vmatmul.mubr.msk.bf16.gmra.mrb[4].mxu1 %vm444_vm0, %v1697_v25 }
  0x24   : > { %1622 = vmatprep.mubr.msk.bf16.mxu0 %vm444_vm0, %v1698_v26  ;;  %1638 = vmatprep.mubr.msk.bf16.mxu1 %vm444_vm0, %v1699_v27 }
  0x25   : > { %976 = vperm.xlu0 %1683, %v894_v29  }
  0x26   : > { %981 = vperm.xlu1 %1684, %v895_v30  }
  0x29   : > { %986 = vperm.xlu0 %1683, %v896_v31  }
  0x2a   : > { %991 = vperm.xlu1 %1684, %v897_v36  }
  0x2b   : > { %1623 = vmatmul.mubr.msk.bf16.gmra.mrb[8].mxu0 %vm444_vm0, %v1700_v32  ;;  %1639 = vmatmul.mubr.msk.bf16.gmra.mrb[8].mxu1 %vm444_vm0, %v1701_v33 }
  0x2c   : > { %1626 = vmatprep.mubr.msk.bf16.mxu0 %vm444_vm0, %v1702_v34  ;;  %1642 = vmatprep.mubr.msk.bf16.mxu1 %vm444_vm0, %v1703_v35 }
  0x2d   : > { %996 = vperm.xlu0 %1683, %v898_v37  }
  0x2e   : > { %1001 = vperm.xlu1 %1684, %v899_v38  }
  0x31   : > { %1006 = vperm.xlu0 %1683, %v900_v39  }
  0x32   : > { %1011 = vperm.xlu1 %1684, %v901_v42  }
  0x33   : > { %1627 = vmatmul.mubr.msk.bf16.gmra.mrb[12].mxu0 %vm444_vm0, %v1704_v40  ;;  %1643 = vmatmul.mubr.msk.bf16.gmra.mrb[12].mxu1 %vm444_vm0, %v1705_v41 }
  0x35   : > { %1016 = vperm.xlu0 %1683, %v902_v43  }
  0x36   : > { %1021 = vperm.xlu1 %1684, %v903_v44  }
  0x39   : > { %1026 = vperm.xlu0 %1683, %v904_v45  }
  0x3a   : > { %1031 = vperm.xlu1 %1684, %v905_v46  }
  0x3d   : > { %1036 = vperm.xlu0 %1683, %v906_v47  }
  0x3e   : > { %1041 = vperm.xlu1 %1684, %v907_v48  }
  0x41   : > { %1046 = vperm.xlu0 %1683, %v908_v49  }
  0x42   : > { %1051 = vperm.xlu1 %1684, %v909_v50  }
  0x45   : > { %1056 = vperm.xlu0 %1683, %v910_v51  }
  0x46   : > { %1061 = vperm.xlu1 %1684, %v911_v52  }
  0x49   : > { %1066 = vperm.xlu0 %1683, %v912_v53  }
  0x4a   : > { %1071 = vperm.xlu1 %1684, %v913_v54  }
  0x8a   : > { %v917_v55 = vpop.permute.xlu0 %916  ;;  %v927_v56 = vpop.permute.xlu1 %926 }
  0x8e   : > { %v922_v57 = vpop.permute.xlu0 %921  ;;  %v932_v58 = vpop.permute.xlu1 %931 }
  0x92   : > { %v937_v59 = vpop.permute.xlu0 %936 }
  0x95   : > { %v942_v60 = vpop.permute.xlu1 %941 }
  0x96   : > { %v947_v61 = vpop.permute.xlu0 %946 }
  0x99   : > { %v952_v62 = vpop.permute.xlu1 %951 }
  0x9c   : > { %v1932_v63 = vpop.permute.xlu0 %956 }
  0x9d   : > { %v1934_v0 = vpop.permute.xlu1 %961 }
  0xa0   : > { %v1936_v1 = vpop.permute.xlu0 %966 }
  0xa1   : > { %v1938_v2 = vpop.permute.xlu1 %971 }
  0xa4   : > { %v1940_v3 = vpop.permute.xlu0 %976 }
  0xa5   : > { %v1942_v4 = vpop.permute.xlu1 %981 }
  0xa8   : > { %v1965_v20 = vpop.permute.xlu0 %986 }
  0xa9   : > { %v1967_v21 = vpop.permute.xlu1 %991 }
  0xac   : > { %v1984_v50 = vpop.permute.xlu0 %996 }
  0xad   : > { %v1986_v51 = vpop.permute.xlu1 %1001 }
  0xee   : > { %v1616_v5 = vpop.f32.mrb[0].mxu0  ;;  %v1944_v6 = vpop.f32.mrb[0].mxu1 }
  0xef   : > { %v531_v7 = vpop.f32.mrb[1].mxu0  ;;  %v1946_v8 = vpop.f32.mrb[1].mxu1  ;;  %v1076_v16 = vmul.f32 %v1616_v5, %v927_v56 }
  0xf0   : > { %v1617_v9 = vpop.f32.mrb[2].mxu0  ;;  %v1955_v10 = vpop.f32.mrb[2].mxu1  ;;  %v1074_v11 = vmul.f32 %v917_v55, %v531_v7 }
  0xf1   : > { %v1496_v12 = vpack.c.bf16 %v1617_v9, %v1616_v5  ;;  %v534_v13 = vpop.f32.mrb[3].mxu0  ;;  %v1957_v14 = vpop.f32.mrb[3].mxu1  ;;  %v1536_v15 = vpack.c.bf16 %v1955_v10, %v1944_v6  ;;  %v1077_v23 = vmul.f32 %v1617_v9, %v932_v58  ;;  %v1146_v28 = vmul.f32 %v1616_v5, %v1076_v16 }
  0xf2   : > { %v1491_v17 = vpack.c.bf16 %v534_v13, %v531_v7  ;;  %v1075_v18 = vmul.f32 %v922_v57, %v534_v13  ;;  %v1531_v19 = vpack.c.bf16 %v1957_v14, %v1946_v8  ;;  %v1144_v22 = vmul.f32 %v1074_v11, %v531_v7 }
  0xf3   : > { %1568 = vst [vmem:[%s1953_s22 + $0x8] sm:$0xff] %v1496_v12   ;;  %1576 = vst [vmem:[%s1953_s22 + $0x48] sm:$0xff] %v1536_v15   ;;  %v1147_v36 = vmul.f32 %v1617_v9, %v1077_v23 }
  0xf4   : > { %1492 = vst [vmem:[%s1953_s22] sm:$0xff] %v1491_v17   ;;  %v1106_v24 = vadd.f32 %v1075_v18, %v1074_v11  ;;  %v1145_v25 = vmul.f32 %v1075_v18, %v534_v13  ;;  %1575 = vst [vmem:[%s1953_s22 + $0x40] sm:$0xff] %v1531_v19  }
  0xf6   : > { %v1620_v26 = vpop.f32.mrb[4].mxu0  ;;  %v1971_v27 = vpop.f32.mrb[4].mxu1  ;;  %v1107_v29 = vadd.f32 %v1106_v24, %v1076_v16  ;;  %v1176_v30 = vadd.f32 %v1145_v25, %v1144_v22 }
  0xf7   : > { %v547_v31 = vpop.f32.mrb[5].mxu0  ;;  %v1973_v32 = vpop.f32.mrb[5].mxu1  ;;  %v1080_v46 = vmul.f32 %v1620_v26, %v947_v61 }
  0xf8   : > { %v1078_v33 = vmul.f32 %v937_v59, %v547_v31  ;;  %v1621_v34 = vpop.f32.mrb[6].mxu0  ;;  %v1975_v35 = vpop.f32.mrb[6].mxu1  ;;  %v1177_v37 = vadd.f32 %v1176_v30, %v1146_v28  ;;  %v1108_v38 = vadd.f32 %v1107_v29, %v1077_v23 }
  0xf9   : > { %v550_v39 = vpop.f32.mrb[7].mxu0  ;;  %v1977_v40 = vpop.f32.mrb[7].mxu1  ;;  %v1506_v42 = vpack.c.bf16 %v1621_v34, %v1620_v26  ;;  %v1546_v45 = vpack.c.bf16 %v1975_v35, %v1971_v27  ;;  %v1081_v53 = vmul.f32 %v1621_v34, %v952_v62 }
  0xfa   : > { %v1148_v41 = vmul.f32 %v1078_v33, %v547_v31  ;;  %v1109_v43 = vadd.f32 %v1108_v38, %v1078_v33  ;;  %v1178_v44 = vadd.f32 %v1177_v37, %v1147_v36  ;;  %v1501_v47 = vpack.c.bf16 %v550_v39, %v547_v31  ;;  %v1007_v28 = vpop.permute.xlu0 %1006  ;;  %v1012_v29 = vpop.permute.xlu1 %1011 }
  0xfb   : > { %1570 = vst [vmem:[%s1953_s22 + $0x18] sm:$0xff] %v1506_v42   ;;  %v1079_v48 = vmul.f32 %v942_v60, %v550_v39  ;;  %v1541_v49 = vpack.c.bf16 %v1977_v40, %v1973_v32  ;;  %1578 = vst [vmem:[%s1953_s22 + $0x58] sm:$0xff] %v1546_v45   ;;  %v1150_v60 = vmul.f32 %v1620_v26, %v1080_v46 }
  0xfc   : > { %v1179_v52 = vadd.f32 %v1178_v44, %v1148_v41  ;;  %1569 = vst [vmem:[%s1953_s22 + $0x10] sm:$0xff] %v1501_v47   ;;  %v1151_v15 = vmul.f32 %v1621_v34, %v1081_v53 }
  0xfd   : > { %v1110_v54 = vadd.f32 %v1109_v43, %v1079_v48  ;;  %v1149_v55 = vmul.f32 %v1079_v48, %v550_v39  ;;  %1577 = vst [vmem:[%s1953_s22 + $0x50] sm:$0xff] %v1541_v49  }
  0xfe   : > { %v1624_v56 = vpop.f32.mrb[8].mxu0  ;;  %v1991_v57 = vpop.f32.mrb[8].mxu1 }
  0xff   : > { %v563_v58 = vpop.f32.mrb[9].mxu0  ;;  %v1993_v59 = vpop.f32.mrb[9].mxu1  ;;  %v1111_v61 = vadd.f32 %v1110_v54, %v1080_v46  ;;  %v1180_v5 = vadd.f32 %v1179_v52, %v1149_v55  ;;  %v1084_v19 = vmul.f32 %v1624_v56, %v1936_v1 }
 0x100   : > { %v1082_v7 = vmul.f32 %v1932_v63, %v563_v58  ;;  %v1625_v9 = vpop.f32.mrb[10].mxu0  ;;  %v1996_v11 = vpop.f32.mrb[10].mxu1 }
 0x101   : > { %v1516_v62 = vpack.c.bf16 %v1625_v9, %v1624_v56  ;;  %v566_v12 = vpop.f32.mrb[11].mxu0  ;;  %v1998_v13 = vpop.f32.mrb[11].mxu1  ;;  %v1181_v16 = vadd.f32 %v1180_v5, %v1150_v60  ;;  %v1112_v17 = vadd.f32 %v1111_v61, %v1081_v53  ;;  %v1556_v63 = vpack.c.bf16 %v1996_v11, %v1991_v57 }
 0x102   : > { %v1152_v18 = vmul.f32 %v1082_v7, %v563_v58  ;;  %v1511_v22 = vpack.c.bf16 %v566_v12, %v563_v58  ;;  %v1083_v25 = vmul.f32 %v1934_v0, %v566_v12  ;;  %v1551_v26 = vpack.c.bf16 %v1998_v13, %v1993_v59  ;;  %v1017_v61 = vpop.permute.xlu0 %1016 }
 0x103   : > { %1572 = vst [vmem:[%s1953_s22 + $0x28] sm:$0xff] %v1516_v62   ;;  %v1113_v23 = vadd.f32 %v1112_v17, %v1082_v7  ;;  %v1182_v24 = vadd.f32 %v1181_v16, %v1151_v15  ;;  %1580 = vst [vmem:[%s1953_s22 + $0x68] sm:$0xff] %v1556_v63   ;;  %v1085_v1 = vmul.f32 %v1625_v9, %v1938_v2  ;;  %v1022_v62 = vpop.permute.xlu1 %1021 }
 0x104   : > { %1571 = vst [vmem:[%s1953_s22 + $0x20] sm:$0xff] %v1511_v22   ;;  %v1153_v33 = vmul.f32 %v1083_v25, %v566_v12  ;;  %1579 = vst [vmem:[%s1953_s22 + $0x60] sm:$0xff] %v1551_v26   ;;  %v1154_v0 = vmul.f32 %v1624_v56, %v1084_v19  ;;  %v1090_v12 = vmul.f32 %v1984_v50, %v1946_v8 }
 0x105   : > { %v1183_v30 = vadd.f32 %v1182_v24, %v1152_v18  ;;  %v1114_v31 = vadd.f32 %v1113_v23, %v1083_v25  ;;  %v1155_v47 = vmul.f32 %v1625_v9, %v1085_v1  ;;  %v1092_v23 = vmul.f32 %v1944_v6, %v1007_v28 }
 0x106   : > { %v1628_v34 = vpop.f32.mrb[12].mxu0  ;;  %v2011_v36 = vpop.f32.mrb[12].mxu1 }
 0x107   : > { %v579_v37 = vpop.f32.mrb[13].mxu0  ;;  %v2013_v38 = vpop.f32.mrb[13].mxu1  ;;  %v1115_v39 = vadd.f32 %v1114_v31, %v1084_v19  ;;  %v1184_v41 = vadd.f32 %v1183_v30, %v1153_v33  ;;  %v1088_v53 = vmul.f32 %v1628_v34, %v1965_v20  ;;  %v1093_v30 = vmul.f32 %v1955_v10, %v1012_v29 }
 0x108   : > { %v1086_v42 = vmul.f32 %v1940_v3, %v579_v37  ;;  %v1629_v43 = vpop.f32.mrb[14].mxu0  ;;  %v2016_v44 = vpop.f32.mrb[14].mxu1  ;;  %v1162_v33 = vmul.f32 %v1944_v6, %v1092_v23 }
 0x109   : > { %v1526_v45 = vpack.c.bf16 %v1629_v43, %v1628_v34  ;;  %v582_v2 = vpop.f32.mrb[15].mxu0  ;;  %v2018_v46 = vpop.f32.mrb[15].mxu1  ;;  %v1185_v48 = vadd.f32 %v1184_v41, %v1154_v0  ;;  %v1116_v49 = vadd.f32 %v1115_v39, %v1085_v1  ;;  %v1566_v3 = vpack.c.bf16 %v2016_v44, %v2011_v36 }
 0x10a   : > { %v1156_v52 = vmul.f32 %v1086_v42, %v579_v37  ;;  %v1521_v54 = vpack.c.bf16 %v582_v2, %v579_v37  ;;  %v1087_v58 = vmul.f32 %v1942_v4, %v582_v2  ;;  %v1561_v60 = vpack.c.bf16 %v2018_v46, %v2013_v38  ;;  %v1027_v22 = vpop.permute.xlu0 %1026  ;;  %v1032_v26 = vpop.permute.xlu1 %1031 }
 0x10b   : > { %1574 = vst [vmem:[%s1953_s22 + $0x38] sm:$0xff] %v1526_v45   ;;  %v1117_v55 = vadd.f32 %v1116_v49, %v1086_v42  ;;  %v1186_v56 = vadd.f32 %v1185_v48, %v1155_v47  ;;  %1582 = vst [vmem:[%s1953_s22 + $0x78] sm:$0xff] %v1566_v3   ;;  %v1089_v7 = vmul.f32 %v1629_v43, %v1967_v21 }
 0x10c   : > { %1573 = vst [vmem:[%s1953_s22 + $0x30] sm:$0xff] %v1521_v54   ;;  %v1157_v20 = vmul.f32 %v1087_v58, %v582_v2  ;;  %1581 = vst [vmem:[%s1953_s22 + $0x70] sm:$0xff] %v1561_v60   ;;  %v1158_v15 = vmul.f32 %v1628_v34, %v1088_v53  ;;  %v1091_v4 = vmul.f32 %v1986_v51, %v1957_v14 }
 0x10d   : > { %v1187_v5 = vadd.f32 %v1186_v56, %v1156_v52  ;;  %v1118_v9 = vadd.f32 %v1117_v55, %v1087_v58  ;;  %v1159_v18 = vmul.f32 %v1629_v43, %v1089_v7  ;;  %v1160_v21 = vmul.f32 %v1090_v12, %v1946_v8 }
 0x10e   : > { %v1161_v50 = vmul.f32 %v1091_v4, %v1957_v14  ;;  %v1094_v51 = vmul.f32 %v1017_v61, %v1973_v32  ;;  %v1037_v0 = vpop.permute.xlu0 %1036  ;;  %v1163_v28 = vmul.f32 %v1955_v10, %v1093_v30  ;;  %v1095_v8 = vmul.f32 %v1022_v62, %v1977_v40  ;;  %v1042_v42 = vpop.permute.xlu1 %1041 }
 0x10f   : > { %v1119_v16 = vadd.f32 %v1118_v9, %v1088_v53  ;;  %v1188_v17 = vadd.f32 %v1187_v5, %v1157_v20  ;;  %v1096_v29 = vmul.f32 %v1971_v27, %v1027_v22  ;;  %v1097_v6 = vmul.f32 %v1975_v35, %v1032_v26 }
 0x110   : > { %v1164_v14 = vmul.f32 %v1094_v51, %v1973_v32  ;;  %v1165_v2 = vmul.f32 %v1095_v8, %v1977_v40  ;;  %v1098_v52 = vmul.f32 %v1037_v0, %v1993_v59  ;;  %v1099_v32 = vmul.f32 %v1042_v42, %v1998_v13 }
 0x111   : > { %v1120_v19 = vadd.f32 %v1119_v16, %v1089_v7  ;;  %v1189_v63 = vadd.f32 %v1188_v17, %v1158_v15  ;;  %v1166_v10 = vmul.f32 %v1971_v27, %v1096_v29  ;;  %v1167_v55 = vmul.f32 %v1975_v35, %v1097_v6 }
 0x112   : > { %v1047_v49 = vpop.permute.xlu0 %1046  ;;  %v1052_v54 = vpop.permute.xlu1 %1051  ;;  %v1168_v40 = vmul.f32 %v1098_v52, %v1993_v59  ;;  %v1169_v9 = vmul.f32 %v1099_v32, %v1998_v13 }
 0x113   : > { %v1121_v24 = vadd.f32 %v1120_v19, %v1090_v12  ;;  %v1190_v25 = vadd.f32 %v1189_v63, %v1159_v18  ;;  %v1100_v60 = vmul.f32 %v1991_v57, %v1047_v49  ;;  %v1101_v27 = vmul.f32 %v1996_v11, %v1052_v54 }
 0x115   : > { %v1122_v1 = vadd.f32 %v1121_v24, %v1091_v4  ;;  %v1191_v31 = vadd.f32 %v1190_v25, %v1160_v21  ;;  %v1170_v35 = vmul.f32 %v1991_v57, %v1100_v60  ;;  %v1171_v4 = vmul.f32 %v1996_v11, %v1101_v27 }
 0x116   : > { %v1057_v7 = vpop.permute.xlu0 %1056  ;;  %v1062_v12 = vpop.permute.xlu1 %1061 }
 0x117   : > { %v1123_v34 = vadd.f32 %v1122_v1, %v1092_v23  ;;  %v1192_v37 = vadd.f32 %v1191_v31, %v1161_v50  ;;  %v1102_v15 = vmul.f32 %v1057_v7, %v2013_v38  ;;  %v1103_v59 = vmul.f32 %v1062_v12, %v2018_v46 }
 0x119   : > { %v1124_v39 = vadd.f32 %v1123_v34, %v1093_v30  ;;  %v1193_v41 = vadd.f32 %v1192_v37, %v1162_v33  ;;  %v1172_v13 = vmul.f32 %v1102_v15, %v2013_v38  ;;  %v1173_v26 = vmul.f32 %v1103_v59, %v2018_v46 }
 0x11a   : > { %v1067_v63 = vpop.permute.xlu0 %1066  ;;  %v1072_v24 = vpop.permute.xlu1 %1071 }
 0x11b   : > { %v1125_v43 = vadd.f32 %v1124_v39, %v1094_v51  ;;  %v1194_v45 = vadd.f32 %v1193_v41, %v1163_v28  ;;  %v1104_v22 = vmul.f32 %v2011_v36, %v1067_v63  ;;  %v1105_v57 = vmul.f32 %v2016_v44, %v1072_v24 }
 0x11d   : > { %v1195_v47 = vadd.f32 %v1194_v45, %v1164_v14  ;;  %v1126_v48 = vadd.f32 %v1125_v43, %v1095_v8  ;;  %v1174_v11 = vmul.f32 %v2011_v36, %v1104_v22  ;;  %v1175_v31 = vmul.f32 %v2016_v44, %v1105_v57 }
 0x11f   : > { %v1127_v53 = vadd.f32 %v1126_v48, %v1096_v29  ;;  %v1196_v3 = vadd.f32 %v1195_v47, %v1165_v2 }
 0x121   : > { %v1128_v56 = vadd.f32 %v1127_v53, %v1097_v6  ;;  %v1197_v58 = vadd.f32 %v1196_v3, %v1166_v10 }
 0x123   : > { %v1129_v61 = vadd.f32 %v1128_v56, %v1098_v52  ;;  %v1198_v5 = vadd.f32 %v1197_v58, %v1167_v55 }
 0x125   : > { %v1130_v20 = vadd.f32 %v1129_v61, %v1099_v32  ;;  %v1199_v62 = vadd.f32 %v1198_v5, %v1168_v40 }
 0x127   : > { %v1131_v16 = vadd.f32 %v1130_v20, %v1100_v60  ;;  %v1200_v17 = vadd.f32 %v1199_v62, %v1169_v9 }
 0x129   : > { %v1132_v18 = vadd.f32 %v1131_v16, %v1101_v27  ;;  %v1201_v19 = vadd.f32 %v1200_v17, %v1170_v35 }
 0x12b   : > { %v1133_v23 = vadd.f32 %v1132_v18, %v1102_v15  ;;  %v1202_v21 = vadd.f32 %v1201_v19, %v1171_v4 }
 0x12d   : > { %v1134_v25 = vadd.f32 %v1133_v23, %v1103_v59  ;;  %v1203_v30 = vadd.f32 %v1202_v21, %v1172_v13 }
 0x12f   : > { %v1135_v50 = vadd.f32 %v1134_v25, %v1104_v22  ;;  %v1204_v1 = vadd.f32 %v1203_v30, %v1173_v26 }
 0x131   : > { %v1136_v33 = vadd.f32 %v1135_v50, %v1105_v57  ;;  %v1205_v51 = vadd.f32 %v1204_v1, %v1174_v11 }
 0x133   : > { %v1137_v38 = vrot.slane %v1136_v33, 4  ;;  %v1206_v34 = vadd.f32 %v1205_v51, %v1175_v31 }
 0x135   : > { %v1138_v37 = vadd.f32 %v1137_v38, %v1136_v33  ;;  %v1207_v0 = vrot.slane %v1206_v34, 4 }
 0x137   : > { %v1139_v28 = vrot.slane %v1138_v37, 2  ;;  %v1208_v8 = vadd.f32 %v1207_v0, %v1206_v34 }
 0x139   : > { %v1140_v39 = vadd.f32 %v1139_v28, %v1138_v37  ;;  %v1209_v41 = vrot.slane %v1208_v8, 2 }
 0x13b   : > { %v1141_v46 = vrot.slane %v1140_v39, 1  ;;  %v1210_v42 = vadd.f32 %v1209_v41, %v1208_v8 }
 0x13d   : > { %v1142_v36 = vadd.f32 %v1141_v46, %v1140_v39  ;;  %v1211_v29 = vrot.slane %v1210_v42, 1 }
 0x13f   : > { %1143 = vst [vmem:[%s288_s24] sm:$0x1] %v1142_v36  ;;  %v1212_v44 = vadd.f32 %v1211_v29, %v1210_v42 }
 0x141   : > { %1213 = vst [vmem:[%s294_s27] sm:$0x1] %v1212_v44 }
 0x142 PF: > { %s16_s20 = sadd.s32 1, %s1728_s20   ;;  %s2088_s18 = smov %s1724_s19 }
 0x143   : > { %p13_p5 = scmp.ge.s32.totalorder %s16_s20, 4   ;;  %s2089_s19 = smov %s2091_s21 }
 0x145   :  { %15 = sbr.rel (!%p13_p5) target bundleno = 2 (0x2), region = 86 }

// kernel: _segnet_down3_nchw.7
= control target key start
LH: loop header
LB: loop body
LE: loop exit
PB: predicated region body
PF: predicated region fallthrough
CT: control target
= control target key end

     0   :  { %s818_s15 = smov 0   ;;  %s820_s16 = smov 0   ;;  %s1183_s0 = inlined_call_operand.vmem [shape: bf16[2,8,2,8,256], index: 0, kind: input, shape index: {}]   ;;  %s1184_s1 = inlined_call_operand.vmem [shape: f32[1,256], index: 1, kind: input, shape index: {}]   ;;  %s1185_s2 = inlined_call_operand.vmem [shape: f32[1,256], index: 2, kind: input, shape index: {}]   ;;  %s1186_s3 = inlined_call_operand.vmem [shape: f32[2,8,8,128], index: 3, kind: output, shape index: {0}]   ;;  %s1187_s4 = inlined_call_operand.vmem [shape: s32[2,8,8,128], index: 4, kind: output, shape index: {1}]  }
   0x1   :  { %s822_s17 = smov 0  }
   0x2 LB: > { %s27_s18 = sadd.s32 1, %s787_s16  ;;  %p725_p0 = scmp.ge.s32.totalorder %s791_s17, 1  ;;  %s791_s17 = sphi %s822_s17, %s15_s17   ;;  %s787_s16 = sphi %s820_s16, %s1249_s16   ;;  %s783_s15 = sphi %s818_s15, %s1248_s15  }
   0x3   : > { %p29_p1 = scmp.ge.s32.totalorder %s27_s18, 2  ;;  %p189_p2 = scmp.lt.s32.totalorder %s791_s17, 3 }
   0x5   : > { %s1251_s18 = smov (%p29_p1, %s27_s18), 0  ;;  %p190_p3 = pnand %p725_p0, %p189_p2 }
   0x6   : > { %p234_p4 = scmp.lt.s32.totalorder (!%p190_p3), %s783_s15, 1  ;;  %v291_v0 = vlaneseq (!%p190_p3)  ;;  %v264_v2 = vld [vmem:[%s1184_s1] sm:$0x3] (!%p190_p3) }
   0x7   : > { %193 = sbr.rel (%p190_p3) target bundleno = 83 (0x53), region = 32  ;;  %v265_v3 = vld [vmem:[%s1185_s2] sm:$0x3] (!%p190_p3) }
   0x8   : > { %v292_v1 = vshrl.u32 (!%p190_p3), %v291_v0, 7 }
   0xa   : > { %v293_v4 = vsub.s32 (!%p190_p3), 0, %v292_v1  ;;  %v297_v5 = vsub.s32 (!%p190_p3), 1, %v292_v1  ;;  %v850_v6 = vmul.u32 (!%p190_p3), 2, %v292_v1 }
   0xc   : > { %v853_v8 = vrot.slane (!%p190_p3), %v264_v2, %v293_v4  ;;  %v855_v9 = vrot.slane (!%p190_p3), %v264_v2, %v297_v5  ;;  %v857_v10 = vrot.slane (!%p190_p3), %v265_v3, %v293_v4  ;;  %v859_v11 = vrot.slane (!%p190_p3), %v265_v3, %v297_v5 }
   0xe   : > { %s1253_s15 = smov (!%p234_p4, %s783_s15), 1 }
   0xf   : > { %s742_s23 = sshll.u32 %s1253_s15, 7  ;;  %s743_s27 = sshll.u32 %s1253_s15, 6 }
  0x10   : > { %s848_s26 = scalar_lea.vmem %s1183_s0, %s742_s23  ;;  %s907_s30 = scalar_lea.vmem %s1186_s3, %s743_s27 }
  0x11   : > { %v266_v7 = vld [vmem:[%s848_s26] sm:$0xff]  ;;  %v732_v12 = vld [vmem:[%s848_s26 + $0x8] sm:$0xff]  ;;  %v267_v13 = vld [vmem:[%s848_s26 + $0x10] sm:$0xff]  ;;  %s1088_s7 = scalar_lea.vmem %s1187_s4, %s743_s27 }
  0x12   : > { %v274_v14 = vunpack.c.l.bf16 %v266_v7  ;;  %v275_v15 = vunpack.c.h.bf16 %v266_v7  ;;  %v369_v16 = vunpack.c.l.bf16 %v732_v12  ;;  %v370_v17 = vunpack.c.h.bf16 %v732_v12  ;;  %v733_v18 = vld [vmem:[%s848_s26 + $0x18] sm:$0xff]  ;;  %v268_v39 = vld [vmem:[%s848_s26 + $0x20] sm:$0xff]  ;;  %v734_v40 = vld [vmem:[%s848_s26 + $0x28] sm:$0xff] }
  0x13   : > { %v276_v19 = vunpack.c.l.bf16 %v267_v13  ;;  %v277_v20 = vunpack.c.h.bf16 %v267_v13  ;;  %v371_v21 = vunpack.c.l.bf16 %v733_v18  ;;  %v372_v22 = vunpack.c.h.bf16 %v733_v18  ;;  %v269_v45 = vld [vmem:[%s848_s26 + $0x30] sm:$0xff]  ;;  %v735_v7 = vld [vmem:[%s848_s26 + $0x38] sm:$0xff] }
  0x14   : > { %v301_v23 = vmul.f32 %v853_v8, %v274_v14  ;;  %v302_v24 = vmul.f32 %v855_v9, %v275_v15  ;;  %v385_v25 = vmul.f32 %v369_v16, %v853_v8  ;;  %v386_v26 = vmul.f32 %v370_v17, %v855_v9  ;;  %v270_v16 = vld [vmem:[%s848_s26 + $0x40] sm:$0xff] }
  0x15   : > { %v303_v27 = vmul.f32 %v853_v8, %v276_v19  ;;  %v304_v28 = vmul.f32 %v855_v9, %v277_v20  ;;  %v387_v29 = vmul.f32 %v371_v21, %v853_v8  ;;  %v388_v30 = vmul.f32 %v372_v22, %v855_v9 }
  0x16   : > { %v328_v31 = vadd.f32 %v857_v10, %v301_v23  ;;  %v329_v32 = vadd.f32 %v859_v11, %v302_v24  ;;  %v401_v33 = vadd.f32 %v385_v25, %v857_v10  ;;  %v402_v34 = vadd.f32 %v386_v26, %v859_v11 }
  0x17   : > { %v330_v35 = vadd.f32 %v857_v10, %v303_v27  ;;  %v331_v36 = vadd.f32 %v859_v11, %v304_v28  ;;  %v403_v37 = vadd.f32 %v387_v29, %v857_v10  ;;  %v404_v38 = vadd.f32 %v388_v30, %v859_v11 }
  0x18   : > { %v344_v41 = vmax.f32 %v328_v31, 0.0  ;;  %v345_v42 = vmax.f32 %v329_v32, 0.0  ;;  %v417_v43 = vmax.f32 %v401_v33, 0.0  ;;  %v418_v44 = vmax.f32 %v402_v34, 0.0 }
  0x19   : > { %v346_v46 = vmax.f32 %v330_v35, 0.0  ;;  %v347_v47 = vmax.f32 %v331_v36, 0.0  ;;  %v419_v48 = vmax.f32 %v403_v37, 0.0  ;;  %v420_v49 = vmax.f32 %v404_v38, 0.0  ;;  %v736_v37 = vld [vmem:[%s848_s26 + $0x48] sm:$0xff] }
  0x1a   : > { %vm884_vm0 = vcmp.gt.f32.partialorder %v345_v42, %v344_v41  ;;  %v278_v51 = vunpack.c.l.bf16 %v268_v39  ;;  %v279_v52 = vunpack.c.h.bf16 %v268_v39  ;;  %v373_v53 = vunpack.c.l.bf16 %v734_v40 }
  0x1b   : > { %v477_v54 = vsel %vm884_vm0, %v345_v42, %v344_v41  ;;  %vm890_vm1 = vcmp.gt.f32.partialorder %v347_v47, %v346_v46  ;;  %v374_v56 = vunpack.c.h.bf16 %v734_v40  ;;  %v280_v57 = vunpack.c.l.bf16 %v269_v45 }
  0x1c   : > { %vm894_vm2 = vcmp.gt.f32.partialorder %v417_v43, %v477_v54  ;;  %v478_v59 = vsel %vm890_vm1, %v347_v47, %v346_v46  ;;  %v305_v60 = vmul.f32 %v853_v8, %v278_v51  ;;  %v306_v61 = vmul.f32 %v855_v9, %v279_v52  ;;  %v271_v46 = vld [vmem:[%s848_s26 + $0x50] sm:$0xff]  ;;  %v737_v52 = vld [vmem:[%s848_s26 + $0x58] sm:$0xff] }
  0x1d   : > { %v509_v62 = vsel %vm894_vm2, %v417_v43, %v477_v54  ;;  %vm911_vm3 = vcmp.gt.f32.partialorder %v419_v48, %v478_v59  ;;  %v389_v0 = vmul.f32 %v373_v53, %v853_v8  ;;  %v390_v1 = vmul.f32 %v374_v56, %v855_v9 }
  0x1e   : > { %vm917_vm4 = vcmp.gt.f32.partialorder %v418_v44, %v509_v62  ;;  %v510_v3 = vsel %vm911_vm3, %v419_v48, %v478_v59  ;;  %v332_v4 = vadd.f32 %v857_v10, %v305_v60  ;;  %v333_v5 = vadd.f32 %v859_v11, %v306_v61 }
  0x1f   : > { %v541_v12 = vsel %vm917_vm4, %v418_v44, %v509_v62  ;;  %vm928_vm5 = vcmp.gt.f32.partialorder %v420_v49, %v510_v3  ;;  %v405_v14 = vadd.f32 %v389_v0, %v857_v10  ;;  %v406_v15 = vadd.f32 %v390_v1, %v859_v11 }
  0x20   : > { %565 = vst [vmem:[%s907_s30] sm:$0xff] %v541_v12  ;;  %v542_v17 = vsel %vm928_vm5, %v420_v49, %v510_v3  ;;  %v348_v18 = vmax.f32 %v332_v4, 0.0  ;;  %v349_v19 = vmax.f32 %v333_v5, 0.0  ;;  %v281_v20 = vunpack.c.h.bf16 %v269_v45 }
  0x21   : > { %566 = vst [vmem:[%s907_s30 + $0x8] sm:$0xff] %v542_v17  ;;  %v421_v21 = vmax.f32 %v405_v14, 0.0  ;;  %v422_v22 = vmax.f32 %v406_v15, 0.0  ;;  %v307_v23 = vmul.f32 %v853_v8, %v280_v57  ;;  %v375_v24 = vunpack.c.l.bf16 %v735_v7  ;;  %v272_v15 = vld [vmem:[%s848_s26 + $0x60] sm:$0xff] }
  0x22   : > { %vm940_vm6 = vcmp.gt.f32.partialorder %v349_v19, %v348_v18  ;;  %v308_v26 = vmul.f32 %v855_v9, %v281_v20  ;;  %v376_v27 = vunpack.c.h.bf16 %v735_v7  ;;  %v282_v28 = vunpack.c.l.bf16 %v270_v16 }
  0x23   : > { %v479_v29 = vsel %vm940_vm6, %v349_v19, %v348_v18  ;;  %v334_v30 = vadd.f32 %v857_v10, %v307_v23  ;;  %v391_v31 = vmul.f32 %v375_v24, %v853_v8  ;;  %v283_v32 = vunpack.c.h.bf16 %v270_v16 }
  0x24   : > { %vm949_vm7 = vcmp.gt.f32.partialorder %v421_v21, %v479_v29  ;;  %v335_v34 = vadd.f32 %v859_v11, %v308_v26  ;;  %v392_v35 = vmul.f32 %v376_v27, %v855_v9  ;;  %v309_v36 = vmul.f32 %v853_v8, %v282_v28 }
  0x25   : > { %v511_v38 = vsel %vm949_vm7, %v421_v21, %v479_v29  ;;  %v350_v39 = vmax.f32 %v334_v30, 0.0  ;;  %v407_v40 = vadd.f32 %v391_v31, %v857_v10  ;;  %v310_v41 = vmul.f32 %v855_v9, %v283_v32  ;;  %v738_v29 = vld [vmem:[%s848_s26 + $0x68] sm:$0xff] }
  0x26   : > { %vm961_vm8 = vcmp.gt.f32.partialorder %v422_v22, %v511_v38  ;;  %v351_v43 = vmax.f32 %v335_v34, 0.0  ;;  %v408_v44 = vadd.f32 %v392_v35, %v859_v11  ;;  %v336_v45 = vadd.f32 %v857_v10, %v309_v36 }
  0x27   : > { %v543_v47 = vsel %vm961_vm8, %v422_v22, %v511_v38  ;;  %v423_v48 = vmax.f32 %v407_v40, 0.0  ;;  %v337_v49 = vadd.f32 %v859_v11, %v310_v41  ;;  %v377_v51 = vunpack.c.l.bf16 %v736_v37 }
  0x28   : > { %567 = vst [vmem:[%s907_s30 + $0x10] sm:$0xff] %v543_v47  ;;  %v424_v53 = vmax.f32 %v408_v44, 0.0  ;;  %vm973_vm9 = vcmp.gt.f32.partialorder %v351_v43, %v350_v39  ;;  %v352_v56 = vmax.f32 %v336_v45, 0.0  ;;  %v378_v57 = vunpack.c.h.bf16 %v736_v37  ;;  %v273_v44 = vld [vmem:[%s848_s26 + $0x70] sm:$0xff] }
  0x29   : > { %v480_v59 = vsel %vm973_vm9, %v351_v43, %v350_v39  ;;  %v353_v60 = vmax.f32 %v337_v49, 0.0  ;;  %v393_v61 = vmul.f32 %v377_v51, %v853_v8  ;;  %v284_v62 = vunpack.c.l.bf16 %v271_v46 }
  0x2a   : > { %vm980_vm10 = vcmp.gt.f32.partialorder %v423_v48, %v480_v59  ;;  %v394_v1 = vmul.f32 %v378_v57, %v855_v9  ;;  %v285_v3 = vunpack.c.h.bf16 %v271_v46  ;;  %v379_v4 = vunpack.c.l.bf16 %v737_v52 }
  0x2b   : > { %v512_v5 = vsel %vm980_vm10, %v423_v48, %v480_v59  ;;  %v409_v7 = vadd.f32 %v393_v61, %v857_v10  ;;  %vm988_vm11 = vcmp.gt.f32.partialorder %v353_v60, %v352_v56  ;;  %v311_v14 = vmul.f32 %v853_v8, %v284_v62 }
  0x2c   : > { %vm994_vm12 = vcmp.gt.f32.partialorder %v424_v53, %v512_v5  ;;  %v410_v17 = vadd.f32 %v394_v1, %v859_v11  ;;  %v481_v18 = vsel %vm988_vm11, %v353_v60, %v352_v56  ;;  %v312_v19 = vmul.f32 %v855_v9, %v285_v3  ;;  %v739_v56 = vld [vmem:[%s848_s26 + $0x78] sm:$0xff] }
  0x2d   : > { %v544_v20 = vsel %vm994_vm12, %v424_v53, %v512_v5  ;;  %v425_v21 = vmax.f32 %v409_v7, 0.0  ;;  %v338_v22 = vadd.f32 %v857_v10, %v311_v14  ;;  %v380_v23 = vunpack.c.h.bf16 %v737_v52 }
  0x2e   : > { %568 = vst [vmem:[%s907_s30 + $0x18] sm:$0xff] %v544_v20  ;;  %v426_v24 = vmax.f32 %v410_v17, 0.0  ;;  %v339_v26 = vadd.f32 %v859_v11, %v312_v19  ;;  %v395_v27 = vmul.f32 %v379_v4, %v853_v8  ;;  %v286_v28 = vunpack.c.l.bf16 %v272_v15 }
  0x2f   : > { %vm1009_vm13 = vcmp.gt.f32.partialorder %v425_v21, %v481_v18  ;;  %v1220_v30 = vmov 0  ;;  %v354_v31 = vmax.f32 %v338_v22, 0.0  ;;  %v396_v32 = vmul.f32 %v380_v23, %v855_v9 }
  0x30   : > { %v1221_v30 = vsel %vm1009_vm13, 4294967295, %v1220_v30  ;;  %v287_v34 = vunpack.c.h.bf16 %v272_v15  ;;  %v513_v35 = vsel %vm1009_vm13, %v425_v21, %v481_v18  ;;  %v355_v36 = vmax.f32 %v339_v26, 0.0 }
  0x31   : > { %v411_v37 = vadd.f32 %v395_v27, %v857_v10  ;;  %v313_v38 = vmul.f32 %v853_v8, %v286_v28  ;;  %vm1018_vm14 = vcmp.gt.f32.partialorder %v426_v24, %v513_v35  ;;  %v1222_v39 = vmov 0 }
  0x32   : > { %v1223_v39 = vsel %vm1018_vm14, 4294967295, %v1222_v39  ;;  %v412_v40 = vadd.f32 %v396_v32, %v859_v11  ;;  %v314_v41 = vmul.f32 %v855_v9, %v287_v34  ;;  %v381_v43 = vunpack.c.l.bf16 %v738_v29 }
  0x33   : > { %v545_v45 = vsel %vm1018_vm14, %v426_v24, %v513_v35  ;;  %v427_v46 = vmax.f32 %v411_v37, 0.0  ;;  %vm1027_vm15 = vcmp.gt.f32.partialorder %v355_v36, %v354_v31  ;;  %v1224_v47 = vmov 0 }
  0x34   : > { %v1225_v47 = vsel %vm1027_vm15, 4294967295, %v1224_v47  ;;  %v340_v48 = vadd.f32 %v857_v10, %v313_v38  ;;  %569 = vst [vmem:[%s907_s30 + $0x20] sm:$0xff] %v545_v45  ;;  %v428_v49 = vmax.f32 %v412_v40, 0.0  ;;  %v482_v51 = vsel %vm1027_vm15, %v355_v36, %v354_v31 }
  0x35   : > { %v341_v52 = vadd.f32 %v859_v11, %v314_v41  ;;  %v382_v53 = vunpack.c.h.bf16 %v738_v29  ;;  %vm1037_vm13 = vcmp.gt.f32.partialorder %v427_v46, %v482_v51  ;;  %v397_v60 = vmul.f32 %v381_v43, %v853_v8 }
  0x36   : > { %v356_v59 = vmax.f32 %v340_v48, 0.0  ;;  %v288_v61 = vunpack.c.l.bf16 %v273_v44  ;;  %v514_v62 = vsel %vm1037_vm13, %v427_v46, %v482_v51  ;;  %v289_v4 = vunpack.c.h.bf16 %v273_v44 }
  0x37   : > { %v357_v1 = vmax.f32 %v341_v52, 0.0  ;;  %v398_v3 = vmul.f32 %v382_v53, %v855_v9  ;;  %vm1045_vm14 = vcmp.gt.f32.partialorder %v428_v49, %v514_v62  ;;  %v1228_v5 = vmov 0 }
  0x38   : > { %v1229_v5 = vsel %vm1045_vm14, 4294967295, %v1228_v5  ;;  %v413_v7 = vadd.f32 %v397_v60, %v857_v10  ;;  %v315_v14 = vmul.f32 %v853_v8, %v288_v61  ;;  %v383_v15 = vunpack.c.l.bf16 %v739_v56 }
  0x39   : > { %v546_v17 = vsel %vm1045_vm14, %v428_v49, %v514_v62  ;;  %v414_v18 = vadd.f32 %v398_v3, %v859_v11  ;;  %vm1054_vm15 = vcmp.gt.f32.partialorder %v357_v1, %v356_v59  ;;  %v1230_v19 = vmov 0 }
  0x3a   : > { %v1231_v19 = vsel %vm1054_vm15, 4294967295, %v1230_v19  ;;  %v316_v20 = vmul.f32 %v855_v9, %v289_v4  ;;  %570 = vst [vmem:[%s907_s30 + $0x28] sm:$0xff] %v546_v17  ;;  %v429_v21 = vmax.f32 %v413_v7, 0.0  ;;  %v483_v22 = vsel %vm1054_vm15, %v357_v1, %v356_v59 }
  0x3b   : > { %v342_v23 = vadd.f32 %v857_v10, %v315_v14  ;;  %v384_v24 = vunpack.c.h.bf16 %v739_v56  ;;  %v430_v26 = vmax.f32 %v414_v18, 0.0  ;;  %v399_v28 = vmul.f32 %v383_v15, %v853_v8 }
  0x3c   : > { %v343_v27 = vadd.f32 %v859_v11, %v316_v20  ;;  %v485_v29 = vadd.s32 1, %v850_v6  ;;  %vm1066_vm14 = vcmp.gt.f32.partialorder %v429_v21, %v483_v22  ;;  %v517_v35 = vadd.s32 16, %v850_v6 }
  0x3d   : > { %v358_v32 = vmax.f32 %v342_v23, 0.0  ;;  %v400_v34 = vmul.f32 %v384_v24, %v855_v9  ;;  %v515_v36 = vsel %vm1066_vm14, %v429_v21, %v483_v22  ;;  %v415_v38 = vadd.f32 %v399_v28, %v857_v10 }
  0x3e   : > { %v359_v37 = vmax.f32 %v343_v27, 0.0  ;;  %v493_v8 = vsel %vm884_vm0, %v485_v29, %v850_v6  ;;  %vm1078_vm15 = vcmp.gt.f32.partialorder %v430_v26, %v515_v36  ;;  %v1234_v40 = vmov 0 }
  0x3f   : > { %v1235_v40 = vsel %vm1078_vm15, 4294967295, %v1234_v40  ;;  %v416_v41 = vadd.f32 %v400_v34, %v859_v11  ;;  %v525_v9 = vsel %vm894_vm2, %v517_v35, %v493_v8  ;;  %v549_v10 = vadd.s32 17, %v850_v6 }
  0x40   : > { %v547_v50 = vsel %vm1078_vm15, %v430_v26, %v515_v36  ;;  %v431_v43 = vmax.f32 %v415_v38, 0.0  ;;  %vm1095_vm0 = vcmp.gt.f32.partialorder %v359_v37, %v358_v32  ;;  %v462_v11 = vadd.s32 32, %v850_v6 }
  0x41   : > { %571 = vst [vmem:[%s907_s30 + $0x30] sm:$0xff] %v547_v50  ;;  %v432_v45 = vmax.f32 %v416_v41, 0.0  ;;  %v484_v46 = vsel %vm1095_vm0, %v359_v37, %v358_v32  ;;  %v557_v58 = vsel %vm917_vm4, %v549_v10, %v525_v9  ;;  %v463_v48 = vadd.s32 64, %v850_v6 }
  0x42   : > { %vm1106_vm2 = vcmp.gt.f32.partialorder %v431_v43, %v484_v46  ;;  %573 = vst [vmem:[%s1088_s7] sm:$0xff] %v557_v58  ;;  %v486_v51 = vadd.s32 1, %v462_v11  ;;  %v518_v52 = vadd.s32 16, %v462_v11  ;;  %v550_v53 = vadd.s32 17, %v462_v11 }
  0x43   : > { %v516_v56 = vsel %vm1106_vm2, %v431_v43, %v484_v46  ;;  %v487_v59 = vadd.s32 1, %v463_v48  ;;  %v519_v60 = vadd.s32 16, %v463_v48  ;;  %v551_v61 = vadd.s32 17, %v463_v48 }
  0x44   : > { %vm1113_vm15 = vcmp.gt.f32.partialorder %v432_v45, %v516_v56  ;;  %v494_v62 = vsel %vm890_vm1, %v486_v51, %v462_v11  ;;  %v464_v1 = vadd.s32 96, %v850_v6  ;;  %v465_v3 = vadd.s32 128, %v850_v6 }
  0x45   : > { %v548_v4 = vsel %vm1113_vm15, %v432_v45, %v516_v56  ;;  %v526_v7 = vsel %vm911_vm3, %v518_v52, %v494_v62  ;;  %v495_v14 = vsel %vm940_vm6, %v487_v59, %v463_v48  ;;  %v466_v15 = vadd.s32 160, %v850_v6 }
  0x46   : > { %572 = vst [vmem:[%s907_s30 + $0x38] sm:$0xff] %v548_v4  ;;  %v558_v55 = vsel %vm928_vm5, %v550_v53, %v526_v7  ;;  %v527_v17 = vsel %vm949_vm7, %v519_v60, %v495_v14  ;;  %v488_v18 = vadd.s32 1, %v464_v1  ;;  %v520_v20 = vadd.s32 16, %v464_v1 }
  0x47   : > { %574 = vst [vmem:[%s1088_s7 + $0x8] sm:$0xff] %v558_v55  ;;  %v559_v21 = vsel %vm961_vm8, %v551_v61, %v527_v17  ;;  %v552_v63 = vadd.s32 17, %v464_v1  ;;  %v489_v22 = vadd.s32 1, %v465_v3  ;;  %v521_v25 = vadd.s32 16, %v465_v3 }
  0x48   : > { %575 = vst [vmem:[%s1088_s7 + $0x10] sm:$0xff] %v559_v21  ;;  %v496_v23 = vsel %vm973_vm9, %v488_v18, %v464_v1  ;;  %v553_v24 = vadd.s32 17, %v465_v3  ;;  %v490_v13 = vadd.s32 1, %v466_v15  ;;  %v522_v26 = vadd.s32 16, %v466_v15 }
  0x49   : > { %v528_v33 = vsel %vm980_vm10, %v520_v20, %v496_v23  ;;  %v497_v27 = vsel %vm988_vm11, %v489_v22, %v465_v3  ;;  %v554_v42 = vadd.s32 17, %v466_v15  ;;  %v467_v28 = vadd.s32 192, %v850_v6 }
  0x4a   : > { %v560_v29 = vsel %vm994_vm12, %v552_v63, %v528_v33  ;;  %vm1242_vm1 = vnez %v1221_v30  ;;  %vm1243_vm3 = vnez %v1225_v47  ;;  %v468_v34 = vadd.s32 224, %v850_v6 }
  0x4b   : > { %v529_v54 = vsel %vm1242_vm1, %v521_v25, %v497_v27  ;;  %v498_v32 = vsel %vm1243_vm3, %v490_v13, %v466_v15  ;;  %576 = vst [vmem:[%s1088_s7 + $0x18] sm:$0xff] %v560_v29  ;;  %vm1244_vm4 = vnez %v1223_v39  ;;  %v491_v35 = vadd.s32 1, %v467_v28 }
  0x4c   : > { %v561_v0 = vsel %vm1244_vm4, %v553_v24, %v529_v54  ;;  %v530_v12 = vsel %vm1037_vm13, %v522_v26, %v498_v32  ;;  %v523_v16 = vadd.s32 16, %v467_v28  ;;  %vm1245_vm5 = vnez %v1229_v5 }
  0x4d   : > { %577 = vst [vmem:[%s1088_s7 + $0x20] sm:$0xff] %v561_v0  ;;  %v562_v30 = vsel %vm1245_vm5, %v554_v42, %v530_v12  ;;  %v555_v36 = vadd.s32 17, %v467_v28  ;;  %v492_v47 = vadd.s32 1, %v468_v34  ;;  %v524_v37 = vadd.s32 16, %v468_v34 }
  0x4e   : > { %578 = vst [vmem:[%s1088_s7 + $0x28] sm:$0xff] %v562_v30  ;;  %vm1246_vm6 = vnez %v1231_v19  ;;  %v556_v39 = vadd.s32 17, %v468_v34  ;;  %vm1247_vm7 = vnez %v1235_v40 }
  0x4f   : > { %v499_v6 = vsel %vm1246_vm6, %v491_v35, %v467_v28  ;;  %v500_v38 = vsel %vm1095_vm0, %v492_v47, %v468_v34 }
  0x50   : > { %v531_v57 = vsel %vm1066_vm14, %v523_v16, %v499_v6  ;;  %v532_v5 = vsel %vm1106_vm2, %v524_v37, %v500_v38 }
  0x51   : > { %v563_v8 = vsel %vm1247_vm7, %v555_v36, %v531_v57  ;;  %v564_v41 = vsel %vm1113_vm15, %v556_v39, %v532_v5 }
  0x52   : > { %579 = vst [vmem:[%s1088_s7 + $0x30] sm:$0xff] %v563_v8  ;;  %580 = vst [vmem:[%s1088_s7 + $0x38] sm:$0xff] %v564_v41 }
  0x53 PF: > { %s15_s17 = sadd.s32 1, %s791_s17   ;;  %s1248_s15 = smov %s787_s16 }
  0x54   : > { %p12_p5 = scmp.ge.s32.totalorder %s15_s17, 4   ;;  %s1249_s16 = smov %s1251_s18 }
  0x56   :  { %14 = sbr.rel (!%p12_p5) target bundleno = 2 (0x2), region = 75 }

// kernel: _segnet_down3_nchw.5
= control target key start
LH: loop header
LB: loop body
LE: loop exit
PB: predicated region body
PF: predicated region fallthrough
CT: control target
= control target key end

     0   :  { %s7537_s18 = smov 0   ;;  %s7539_s19 = smov 0   ;;  %s8388_s0 = inlined_call_operand.vmem [shape: bf16[2,1,328,16], index: 0, kind: input, shape index: {}]   ;;  %s8389_s1 = inlined_call_operand.vmem [shape: f32[288,1], index: 1, kind: input, shape index: {}]   ;;  %s8390_s2 = inlined_call_operand.vmem [shape: bf16[144,128], index: 2, kind: input, shape index: {}]   ;;  %s8391_s3 = inlined_call_operand.vmem [shape: bf16[2,288,128], index: 3, kind: output, shape index: {0}]   ;;  %s8392_s4 = inlined_call_operand.vmem [shape: f32[2,1,1,128], index: 4, kind: output, shape index: {1}]   ;;  %s8393_s5 = inlined_call_operand.vmem [shape: f32[2,1,1,128], index: 5, kind: output, shape index: {2}]  }
   0x1   :  { %s7541_s20 = smov 0  }
   0x2 LB: > { %s28_s21 = sadd.s32 1, %s7500_s19  ;;  %p5945_p0 = scmp.ge.s32.totalorder %s7504_s20, 1  ;;  %s7504_s20 = sphi %s7541_s20, %s16_s20   ;;  %s7500_s19 = sphi %s7539_s19, %s8395_s19   ;;  %s7496_s18 = sphi %s7537_s18, %s8394_s18  }
   0x3   : > { %p30_p1 = scmp.ge.s32.totalorder %s28_s21, 2  ;;  %p216_p2 = scmp.lt.s32.totalorder %s7504_s20, 3 }
   0x5   : > { %s8397_s21 = smov (%p30_p1, %s28_s21), 0  ;;  %p217_p3 = pnand %p5945_p0, %p216_p2 }
   0x6   : > { %v7302_v0 = vld [vmem:[%s8390_s2] sm:$0xff] (!%p217_p3)   ;;  %p264_p4 = scmp.lt.s32.totalorder (!%p217_p3), %s7496_s18, 1  ;;  %v7566_v2 = vld [vmem:[%s8390_s2 + $0x28] sm:$0xff] (!%p217_p3)   ;;  %vm430_vm0 = vcmask (!%p217_p3), 130048   ;;  %v7581_v4 = vld [vmem:[%s8390_s2 + $0x10] sm:$0xff] (!%p217_p3)   ;;  %vm3133_vm2 = vcmask (!%p217_p3), 1045504  }
   0x7   : > { %220 = sbr.rel (%p217_p3) target bundleno = 589 (0x24d), region = 32  ;;  %v7305_v1 = vld [vmem:[%s8390_s2 + $0x20] sm:$0xff] (!%p217_p3)   ;;  %6641 = vmatprep.subr.bf16.mxu1 (!%p217_p3), %v7302_v0  ;;  %v7312_v3 = vld [vmem:[%s8390_s2 + $0x8] sm:$0xff] (!%p217_p3)   ;;  %vm2485_vm1 = vsmask.f32 (!%p217_p3), 6400  ;;  %v7604_v36 = vld [vmem:[%s8390_s2 + $0x30] sm:$0xff] (!%p217_p3)  }
   0x8   : > { %6642 = vmatpush3.bf16.msra.mxu1 (!%p217_p3), %v7302_v0  ;;  %6793 = vmatprep.subr.bf16.mxu0 (!%p217_p3), %v7305_v1  ;;  %vm830_vm3 = vsmask.f32 (!%p217_p3), 7424  ;;  %vm1456_vm4 = vcmask (!%p217_p3), 1046528   ;;  %vm4162_vm5 = vsmask.f32 (!%p217_p3), 5376  ;;  %vm4810_vm6 = vcmask (!%p217_p3), 1044480  }
   0x9   : > { %6794 = vmatpush3.bf16.msra.mxu0 (!%p217_p3), %v7305_v1  ;;  %6679 = vmatprep.subr.bf16.mxu1 (!%p217_p3), %v7312_v3 }
   0xa   : > { %6831 = vmatprep.subr.bf16.mxu0 (!%p217_p3), %v7566_v2 }
   0xe   : > { %s8399_s18 = smov (!%p264_p4, %s7496_s18), 1 }
   0xf   : > { %s7273_s28 = smul.u32 164, %s8399_s18  ;;  %s288_s22 = scalar_lea.vmem %s8392_s4, %s8399_s18 }
  0x10   : > { %s294_s25 = scalar_lea.vmem %s8393_s5, %s8399_s18 }
  0x11   : > { %s7576_s8 = scalar_lea.vmem %s8388_s0, %s7273_s28 }
  0x12   : > { %v7303_v5 = vld [vmem:[%s7576_s8] sm:$0xff]   ;;  %v7304_v6 = vld [vmem:[%s7576_s8 + $0x8] sm:$0xff]   ;;  %v7307_v8 = vld [vmem:[%s7576_s8 + $0x10] sm:$0xff]  }
  0x13   : > { %6643 = vmatprep.mubr.msk.bf16.mxu1 %vm430_vm0, %v7303_v5  ;;  %v7306_v7 = vld [vmem:[%s7576_s8 + $0x8] sm:$0xfe]   ;;  %v7309_v9 = vld [vmem:[%s7576_s8 + $0x10] sm:$0xff]   ;;  %v2495_v12 = vshrl.u32 %v7307_v8, 16  ;;  %v2498_v13 = vshll.u32 %v7307_v8, 16  ;;  %v7310_v14 = vld [vmem:[%s7576_s8 + $0x18] sm:$0xff]  }
  0x14   : > { %6644 = vmatmul.mubr.msk.bf16.vlgmr.msra.gmra.mrb[0].mxu1 %vm430_vm0, %v7304_v6  ;;  %v2487_v10 = vshrl.u32 %v7306_v7, 16  ;;  %v2490_v11 = vshll.u32 %v7306_v7, 16  ;;  %v2504_v19 = vshrl.u32 %v7310_v14, 16  ;;  %v2507_v20 = vshll.u32 %v7310_v14, 16  ;;  %v7311_v21 = vld [vmem:[%s7576_s8 + $0x18] sm:$0xff]   ;;  %v7313_v22 = vld [vmem:[%s7576_s8 + $0x20] sm:$0xff]  }
  0x15   : > { %6680 = vmatpush3.bf16.msra.mxu1 %v7312_v3  ;;  %6647 = vmatprep.mubr.msk.bf16.mxu1 %vm430_vm0, %v7309_v9  ;;  %v2497_v17 = vrot.slane %v2495_v12, 1  ;;  %v2500_v18 = vrot.slane %v2498_v13, 2  ;;  %v2513_v27 = vshrl.u32 %v7313_v22, 16  ;;  %v2516_v28 = vshll.u32 %v7313_v22, 16  ;;  %v7314_v29 = vld [vmem:[%s7576_s8 + $0x20] sm:$0xff]   ;;  %v7315_v30 = vld [vmem:[%s7576_s8 + $0x28] sm:$0xff]  }
  0x16   : > { %6717 = vmatprep.subr.bf16.mxu1 %v7581_v4  ;;  %v2489_v15 = vrot.slane %v2487_v10, 1  ;;  %v2492_v16 = vrot.slane %v2490_v11, 2  ;;  %v2506_v25 = vrot.slane %v2504_v19, 1  ;;  %v2509_v26 = vrot.slane %v2507_v20, 2  ;;  %v7316_v38 = vld [vmem:[%s7576_s8 + $0x28] sm:$0xff]   ;;  %v7317_v39 = vld [vmem:[%s7576_s8 + $0x30] sm:$0xff]  }
  0x17   : > { %v2501_v24 = vor.u32 %v2500_v18, %v2497_v17  ;;  %v2515_v33 = vrot.slane %v2513_v27, 1  ;;  %v2518_v34 = vrot.slane %v2516_v28, 2  ;;  %v2522_v35 = vshrl.u32 %v7315_v30, 16  ;;  %v7318_v43 = vld [vmem:[%s7576_s8 + $0x30] sm:$0xff]   ;;  %v7319_v47 = vld [vmem:[%s7576_s8 + $0x38] sm:$0xff]   ;;  %v7321_v54 = vld [vmem:[%s7576_s8 + $0x40] sm:$0xff]  }
  0x18   : > { %v2493_v23 = vor.u32 %v2492_v16, %v2489_v15  ;;  %v2510_v32 = vor.u32 %v2509_v26, %v2506_v25  ;;  %v2525_v37 = vshll.u32 %v7315_v30, 16  ;;  %v2531_v45 = vshrl.u32 %v7317_v39, 16  ;;  %v7323_v61 = vld [vmem:[%s7576_s8 + $0x48] sm:$0xff]   ;;  %v7320_v63 = vld [vmem:[%s7576_s8 + $0x38] sm:$0xff]   ;;  %v7322_v7 = vld [vmem:[%s7576_s8 + $0x40] sm:$0xff]  }
  0x19   : > { %v2519_v41 = vor.u32 %v2518_v34, %v2515_v33  ;;  %v2524_v42 = vrot.slane %v2522_v35, 1  ;;  %v2534_v46 = vshll.u32 %v7317_v39, 16  ;;  %v2540_v52 = vshrl.u32 %v7319_v47, 16  ;;  %v7327_v13 = vld [vmem:[%s7576_s8 + $0x58] sm:$0xff]   ;;  %v7324_v18 = vld [vmem:[%s7576_s8 + $0x48] sm:$0xff]   ;;  %v7326_v19 = vld [vmem:[%s7576_s8 + $0x50] sm:$0xff]  }
  0x1a   : > { %v2502_v31 = vsel %vm2485_vm1, %v2493_v23, %v2501_v24  ;;  %v2511_v40 = vsel %vm2485_vm1, %v2501_v24, %v2510_v32  ;;  %v2527_v44 = vrot.slane %v2525_v37, 2  ;;  %v2533_v50 = vrot.slane %v2531_v45, 1  ;;  %v7330_v24 = vld [vmem:[%s7576_s8 + $0x10] sm:$0xff]   ;;  %v7328_v30 = vld [vmem:[%s7576_s8 + $0x58] sm:$0xff]   ;;  %v7335_v39 = vld [vmem:[%s7576_s8 + $0x20] sm:$0xff]  }
  0x1b   : > { %6795 = vmatprep.mubr.msk.bf16.mxu0 %vm430_vm0, %v2502_v31  ;;  %v2520_v48 = vsel %vm2485_vm1, %v2510_v32, %v2519_v41  ;;  %v2536_v51 = vrot.slane %v2534_v46, 2  ;;  %v2543_v53 = vshll.u32 %v7319_v47, 16  ;;  %v2542_v56 = vrot.slane %v2540_v52, 1  ;;  %v7332_v32 = vld [vmem:[%s7576_s8 + $0x60] sm:$0xff]   ;;  %v7333_v37 = vld [vmem:[%s7576_s8 + $0x18] sm:$0xff]   ;;  %v7337_v45 = vld [vmem:[%s7576_s8 + $0x28] sm:$0xff]  }
  0x1c   : > { %6648 = vmatmul.mubr.msk.bf16.gmra.mrb[4].mxu1 %vm430_vm0, %v7311_v21  ;;  %6796 = vmatmul.mubr.msk.bf16.vlgmr.msra.gmra.mrb[0].mxu0 %vm430_vm0, %v2511_v40  ;;  %v2528_v49 = vor.u32 %v2527_v44, %v2524_v42  ;;  %v2549_v59 = vshrl.u32 %v7321_v54, 16  ;;  %v2552_v60 = vshll.u32 %v7321_v54, 16  ;;  %v2558_v3 = vshrl.u32 %v7323_v61, 16  ;;  %v7334_v40 = vld [vmem:[%s7576_s8 + $0x68] sm:$0xff]   ;;  %v7336_v42 = vld [vmem:[%s7576_s8 + $0x70] sm:$0xff]   ;;  %v7344_v44 = vld [vmem:[%s7576_s8] sm:$0xff]  }
  0x1d   : > { %6651 = vmatprep.mubr.msk.bf16.mxu1 %vm430_vm0, %v7314_v29  ;;  %6832 = vmatpush3.bf16.msra.mxu0 %v7566_v2  ;;  %v2537_v55 = vor.u32 %v2536_v51, %v2533_v50  ;;  %v2545_v58 = vrot.slane %v2543_v53, 2  ;;  %v7325_v2 = vld [vmem:[%s7576_s8 + $0x50] sm:$0xff]   ;;  %v2561_v5 = vshll.u32 %v7323_v61, 16  ;;  %v2576_v21 = vshrl.u32 %v7327_v13, 16  ;;  %v7329_v29 = vld [vmem:[%s7576_s8 + $0x8] sm:$0xfc]  }
  0x1e   : > { %6799 = vmatprep.mubr.msk.bf16.mxu0 %vm430_vm0, %v2520_v48  ;;  %6869 = vmatprep.subr.bf16.mxu0 %v7604_v36  ;;  %v2529_v57 = vsel %vm2485_vm1, %v2519_v41, %v2528_v49  ;;  %v2551_v0 = vrot.slane %v2549_v59, 1  ;;  %v2554_v1 = vrot.slane %v2552_v60, 2  ;;  %v2567_v9 = vshrl.u32 %v7325_v2, 16  ;;  %v7345_v47 = vld [vmem:[%s7576_s8 + $0x8] sm:$0xff]   ;;  %v7338_v52 = vld [vmem:[%s7576_s8 + $0x78] sm:$0xff]   ;;  %v7340_v53 = vld [vmem:[%s7576_s8 + $0x80] sm:$0xff]  }
  0x1f   : > { %v2538_v62 = vsel %vm2485_vm1, %v2528_v49, %v2537_v55  ;;  %v2546_v6 = vor.u32 %v2545_v58, %v2542_v56  ;;  %v2570_v10 = vshll.u32 %v7325_v2, 16  ;;  %v2560_v11 = vrot.slane %v2558_v3, 1  ;;  %v7339_v49 = vld [vmem:[%s7576_s8 + $0x30] sm:$0xff]   ;;  %v7341_v58 = vld [vmem:[%s7576_s8 + $0x38] sm:$0xff]   ;;  %v7343_v61 = vld [vmem:[%s7576_s8 + $0x40] sm:$0xff]  }
  0x20   : > { %v2555_v8 = vor.u32 %v2554_v1, %v2551_v0  ;;  %v2563_v12 = vrot.slane %v2561_v5, 2  ;;  %v2569_v16 = vrot.slane %v2567_v9, 1  ;;  %v2579_v22 = vshll.u32 %v7327_v13, 16  ;;  %v7347_v59 = vld [vmem:[%s7576_s8 + $0x10] sm:$0xff]   ;;  %v7342_v1 = vld [vmem:[%s7576_s8 + $0x88] sm:$0xff]  }
  0x21   : > { %v2547_v14 = vsel %vm2485_vm1, %v2537_v55, %v2546_v6  ;;  %v2572_v17 = vrot.slane %v2570_v10, 2  ;;  %v2578_v26 = vrot.slane %v2576_v21, 1  ;;  %v3134_v33 = vrot.slane %v7329_v29, 2  ;;  %v7346_v10 = vld [vmem:[%s7576_s8 + $0x48] sm:$0xff]   ;;  %v7350_v29 = vld [vmem:[%s7576_s8 + $0x58] sm:$0xff]  }
  0x22   : > { %v2556_v15 = vsel %vm2485_vm1, %v2546_v6, %v2555_v8  ;;  %v2564_v20 = vor.u32 %v2563_v12, %v2560_v11  ;;  %v2581_v27 = vrot.slane %v2579_v22, 2  ;;  %v3135_v34 = vrot.slane %v7330_v24, 2  ;;  %v7351_v12 = vld [vmem:[%s7576_s8 + $0x20] sm:$0xff]  }
  0x23   : > { %v2573_v23 = vor.u32 %v2572_v17, %v2569_v16  ;;  %v3137_v41 = vrot.slane %v7333_v37, 2  ;;  %v834_v50 = vshll.u32 %v7344_v44, 16  ;;  %v3141_v51 = vrot.slane %v7337_v45, 2  ;;  %v7355_v45 = vld [vmem:[%s7576_s8 + $0x68] sm:$0xff]  }
  0x24   : > { %6652 = vmatmul.mubr.msk.bf16.gmra.mrb[8].mxu1 %vm430_vm0, %v7316_v38  ;;  %6800 = vmatmul.mubr.msk.bf16.gmra.mrb[4].mxu0 %vm430_vm0, %v2529_v57  ;;  %v2565_v25 = vsel %vm2485_vm1, %v2555_v8, %v2564_v20  ;;  %v7645_v31 = vor.u32 %v2581_v27, %v2578_v26  ;;  %v3136_v38 = vsel %vm3133_vm2, %v3134_v33, %v3135_v34  ;;  %v839_v54 = vshll.u32 %v7345_v47, 16 }
  0x25   : > { %6655 = vmatprep.mubr.msk.bf16.mxu1 %vm430_vm0, %v7318_v43  ;;  %6803 = vmatprep.mubr.msk.bf16.mxu0 %vm430_vm0, %v2538_v62  ;;  %v2574_v28 = vsel %vm2485_vm1, %v2564_v20, %v2573_v23  ;;  %v3139_v43 = vrot.slane %v7335_v39, 2  ;;  %v3138_v46 = vsel %vm3133_vm2, %v3135_v34, %v3137_v41  ;;  %v3143_v55 = vrot.slane %v7339_v49, 2  ;;  %v7695_v20 = vld [vmem:[%s8390_s2 + $0x38] sm:$0xff]  }
  0x26   : > { %v2583_v35 = vsel %vm2485_vm1, %v2573_v23, %v7645_v31  ;;  %v832_v56 = vshrl.u32 %v7344_v44, 16  ;;  %v836_v57 = vrot.slane %v834_v50, 1  ;;  %v841_v62 = vrot.slane %v839_v54, 1  ;;  %v7360_v50 = vld [vmem:[%s7576_s8 + $0x40] sm:$0xff]   ;;  %v7362_v54 = vld [vmem:[%s7576_s8 + $0x48] sm:$0xff]  }
  0x27   : > { %v3140_v48 = vsel %vm3133_vm2, %v3137_v41, %v3139_v43  ;;  %v3142_v60 = vsel %vm3133_vm2, %v3139_v43, %v3141_v51  ;;  %v847_v2 = vshll.u32 %v7347_v59, 16  ;;  %v3145_v3 = vrot.slane %v7341_v58, 2 }
  0x28   : > { %v837_v0 = vor.u32 %v836_v57, %v832_v56  ;;  %v843_v5 = vshrl.u32 %v7345_v47, 16  ;;  %v3147_v6 = vrot.slane %v7343_v61, 2  ;;  %v851_v8 = vshrl.u32 %v7347_v59, 16  ;;  %v7357_v47 = vld [vmem:[%s7576_s8 + $0x70] sm:$0xff]  }
  0x29   : > { %v849_v11 = vrot.slane %v847_v2, 1  ;;  %v3146_v13 = vsel %vm3133_vm2, %v3143_v55, %v3145_v3  ;;  %v3149_v21 = vrot.slane %v7346_v10, 2  ;;  %v863_v22 = vshll.u32 %v7351_v12, 16 }
  0x2a   : > { %v3148_v16 = vsel %vm3133_vm2, %v3145_v3, %v3147_v6  ;;  %v867_v27 = vshrl.u32 %v7351_v12, 16  ;;  %v3153_v41 = vrot.slane %v7350_v29, 2  ;;  %v3157_v58 = vrot.slane %v7355_v45, 2  ;;  %v7364_v3 = vld [vmem:[%s7576_s8 + $0x50] sm:$0xff]  }
  0x2b   : > { %v853_v17 = vor.u32 %v851_v8, %v849_v11  ;;  %v3150_v33 = vsel %vm3133_vm2, %v3147_v6, %v3149_v21  ;;  %v3159_v59 = vrot.slane %v7357_v47, 2  ;;  %v7374_v45 = vld [vmem:[%s7576_s8 + $0x70] sm:$0xff]  }
  0x2c   : > { %6656 = vmatmul.mubr.msk.bf16.gmra.mrb[12].mxu1 %vm430_vm0, %v7320_v63  ;;  %6804 = vmatmul.mubr.msk.bf16.gmra.mrb[8].mxu0 %vm430_vm0, %v2547_v14  ;;  %v3144_v63 = vsel %vm3133_vm2, %v3141_v51, %v3143_v55  ;;  %v845_v14 = vor.u32 %v843_v5, %v841_v62 }
  0x2d   : > { %6659 = vmatprep.mubr.msk.bf16.mxu1 %vm430_vm0, %v7322_v7  ;;  %6807 = vmatprep.mubr.msk.bf16.mxu0 %vm430_vm0, %v2556_v15  ;;  %v842_v7 = vsel %vm830_vm3, %v837_v0, %v841_v62  ;;  %v7348_v15 = vld [vmem:[%s7576_s8 + $0x50] sm:$0xff]   ;;  %v3160_v10 = vsel %vm3133_vm2, %v3157_v58, %v3159_v59 }
  0x2e   : > { %v850_v23 = vsel %vm830_vm3, %v845_v14, %v849_v11  ;;  %v3151_v24 = vrot.slane %v7348_v15, 2  ;;  %v7738_v14 = vld [vmem:[%s8390_s2 + $0x18] sm:$0xff]  }
  0x30   : > { %v3152_v37 = vsel %vm3133_vm2, %v3149_v21, %v3151_v24 }
  0x34   : > { %6660 = vmatmul.mubr.msk.bf16.gmra.mrb[16].mxu1 %vm430_vm0, %v7324_v18  ;;  %6808 = vmatmul.mubr.msk.bf16.gmra.mrb[12].mxu0 %vm430_vm0, %v2565_v25 }
  0x35   : > { %6663 = vmatprep.mubr.msk.bf16.mxu1 %vm430_vm0, %v7326_v19  ;;  %6811 = vmatprep.mubr.msk.bf16.mxu0 %vm430_vm0, %v2574_v28  ;;  %v7354_v19 = vld [vmem:[%s7576_s8 + $0x28] sm:$0xff]  }
  0x36   : > { %v871_v28 = vshll.u32 %v7354_v19, 16 }
  0x38   : > { %v873_v39 = vrot.slane %v871_v28, 1 }
  0x3c   : > { %6664 = vmatmul.mubr.msk.bf16.gmra.mrb[20].mxu1 %vm430_vm0, %v7328_v30  ;;  %6812 = vmatmul.mubr.msk.bf16.gmra.mrb[16].mxu0 %vm430_vm0, %v2583_v35  ;;  %v865_v30 = vrot.slane %v863_v22, 1  ;;  %v7353_v35 = vld [vmem:[%s7576_s8 + $0x60] sm:$0xff]   ;;  %v7363_v22 = vld [vmem:[%s7576_s8 + $0x88] sm:$0xff]  }
  0x3d   : > { %6667 = vmatprep.mubr.msk.bf16.mxu1 %vm430_vm0, %v7332_v32  ;;  %6833 = vmatprep.mubr.msk.bf16.mxu0 %vm430_vm0, %v3136_v38  ;;  %v7356_v32 = vld [vmem:[%s7576_s8 + $0x30] sm:$0xff]   ;;  %v3155_v44 = vrot.slane %v7353_v35, 2 }
  0x3e   : > { %v869_v38 = vor.u32 %v867_v27, %v865_v30  ;;  %v7365_v27 = vld [vmem:[%s7576_s8 + $0x90] sm:$0xff]  }
  0x3f   : > { %v3156_v55 = vsel %vm3133_vm2, %v3153_v41, %v3155_v44  ;;  %v3158_v5 = vsel %vm3133_vm2, %v3155_v44, %v3157_v58 }
  0x44   : > { %6668 = vmatmul.mubr.msk.bf16.gmra.mrb[24].mxu1 %vm430_vm0, %v7334_v40  ;;  %6834 = vmatmul.mubr.msk.bf16.vlgmr.msra.gmra.mrb[0].mxu0 %vm430_vm0, %v3138_v46  ;;  %v7358_v40 = vld [vmem:[%s7576_s8 + $0x38] sm:$0xff]   ;;  %v875_v46 = vshrl.u32 %v7354_v19, 16  ;;  %v915_v19 = vshrl.u32 %v7364_v3, 16 }
  0x45   : > { %6671 = vmatprep.mubr.msk.bf16.mxu1 %vm430_vm0, %v7336_v42  ;;  %6870 = vmatpush3.bf16.msra.mxu0 %v7604_v36  ;;  %v7349_v36 = vld [vmem:[%s7576_s8 + $0x18] sm:$0xff]   ;;  %v879_v42 = vshll.u32 %v7356_v32, 16  ;;  %v887_v49 = vshll.u32 %v7358_v40, 16  ;;  %v891_v62 = vshrl.u32 %v7358_v40, 16 }
  0x46   : > { %6837 = vmatprep.mubr.msk.bf16.mxu0 %vm430_vm0, %v3140_v48  ;;  %v855_v9 = vshll.u32 %v7349_v36, 16  ;;  %v859_v25 = vshrl.u32 %v7349_v36, 16  ;;  %6907 = vmatprep.subr.bf16.mxu0 %v7695_v20  ;;  %v883_v48 = vshrl.u32 %v7356_v32, 16  ;;  %v899_v36 = vshrl.u32 %v7360_v50, 16  ;;  %v7372_v32 = vld [vmem:[%s7576_s8 + $0x68] sm:$0xff]  }
  0x47   : > { %v881_v51 = vrot.slane %v879_v42, 1  ;;  %v889_v57 = vrot.slane %v887_v49, 1  ;;  %v7367_v40 = vld [vmem:[%s7576_s8 + $0x98] ss:$0 sps:$4 sm:$0x33]   ;;  %v935_v42 = vshll.u32 %v7372_v32, 16 }
  0x48   : > { %v857_v18 = vrot.slane %v855_v9, 1  ;;  %v7366_v9 = vld [vmem:[%s7576_s8 + $0x58] sm:$0xff]  }
  0x49   : > { %v885_v56 = vor.u32 %v883_v48, %v881_v51  ;;  %v893_v6 = vor.u32 %v891_v62, %v889_v57  ;;  %v919_v21 = vshll.u32 %v7366_v9, 16 }
  0x4a   : > { %v858_v26 = vsel %vm830_vm3, %v853_v17, %v857_v18  ;;  %v861_v34 = vor.u32 %v859_v25, %v857_v18  ;;  %v907_v17 = vshrl.u32 %v7362_v54, 16 }
  0x4b   : > { %v890_v0 = vsel %vm830_vm3, %v885_v56, %v889_v57  ;;  %v939_v56 = vshrl.u32 %v7372_v32, 16 }
  0x4c   : > { %6672 = vmatmul.mubr.msk.bf16.gmra.mrb[28].mxu1 %vm430_vm0, %v7338_v52  ;;  %6838 = vmatmul.mubr.msk.bf16.gmra.mrb[4].mxu0 %vm430_vm0, %v3142_v60  ;;  %v866_v43 = vsel %vm830_vm3, %v861_v34, %v865_v30  ;;  %v3154_v52 = vsel %vm3133_vm2, %v3151_v24, %v3153_v41  ;;  %v895_v60 = vshll.u32 %v7360_v50, 16  ;;  %v7368_v24 = vld [vmem:[%s7576_s8 + $0x60] sm:$0xff]   ;;  %v921_v30 = vrot.slane %v919_v21, 1 }
  0x4d   : > { %6675 = vmatprep.mubr.msk.bf16.mxu1 %vm430_vm0, %v7340_v53  ;;  %6841 = vmatprep.mubr.msk.bf16.mxu0 %vm430_vm0, %v3144_v63  ;;  %v877_v53 = vor.u32 %v875_v46, %v873_v39  ;;  %v903_v63 = vshll.u32 %v7362_v54, 16  ;;  %v927_v34 = vshll.u32 %v7368_v24, 16  ;;  %v931_v41 = vshrl.u32 %v7368_v24, 16 }
  0x4e   : > { %v897_v2 = vrot.slane %v895_v60, 1  ;;  %v937_v50 = vrot.slane %v935_v42, 1 }
  0x4f   : > { %v882_v61 = vsel %vm830_vm3, %v877_v53, %v881_v51  ;;  %v905_v8 = vrot.slane %v903_v63, 1  ;;  %v929_v44 = vrot.slane %v927_v34, 1  ;;  %v7376_v51 = vld [vmem:[%s7576_s8 + $0x78] sm:$0xff]   ;;  %v943_v53 = vshll.u32 %v7374_v45, 16  ;;  %v7373_v63 = vld [vmem:[%s7576_s8 + $0x20] sm:$0xff]  }
  0x50   : > { %v901_v11 = vor.u32 %v899_v36, %v897_v2  ;;  %v898_v15 = vsel %vm830_vm3, %v893_v6, %v897_v2  ;;  %v951_v60 = vshll.u32 %v7376_v51, 16  ;;  %v7380_v6 = vld [vmem:[%s7576_s8 + $0x88] sm:$0xff]   ;;  %v7384_v34 = vld [vmem:[%s7576_s8] sm:$0xfe]  }
  0x51   : > { %v933_v49 = vor.u32 %v931_v41, %v929_v44  ;;  %v945_v62 = vrot.slane %v943_v53, 1  ;;  %v7383_v41 = vld [vmem:[%s7576_s8 + $0x48] sm:$0xff]   ;;  %v1457_v42 = vrot.slane %v7384_v34, 1  ;;  %v7388_v53 = vld [vmem:[%s7576_s8 + $0x58] sm:$0xff]  }
  0x52   : > { %v906_v18 = vsel %vm830_vm3, %v901_v11, %v905_v8  ;;  %v955_v11 = vshrl.u32 %v7376_v51, 16 }
  0x53   : > { %v938_v58 = vsel %vm830_vm3, %v933_v49, %v937_v50 }
  0x54   : > { %6676 = vmatmul.mubr.msk.bf16.gmra.mrb[32].mxu1 %vm430_vm0, %v7342_v1  ;;  %6842 = vmatmul.mubr.msk.bf16.gmra.mrb[8].mxu0 %vm430_vm0, %v3146_v13  ;;  %v7359_v1 = vld [vmem:[%s7576_s8 + $0x78] sm:$0xff]   ;;  %v911_v13 = vshll.u32 %v7364_v3, 16 }
  0x55   : > { %6681 = vmatprep.mubr.msk.bf16.mxu1 %vm430_vm0, %v842_v7  ;;  %6845 = vmatprep.mubr.msk.bf16.mxu0 %vm430_vm0, %v3148_v16  ;;  %v7361_v7 = vld [vmem:[%s7576_s8 + $0x80] sm:$0xff]   ;;  %v3161_v12 = vrot.slane %v7359_v1, 2  ;;  %v7375_v1 = vld [vmem:[%s7576_s8 + $0x28] sm:$0xff]  }
  0x56   : > { %v3163_v16 = vrot.slane %v7361_v7, 2 }
  0x57   : > { %v3162_v25 = vsel %vm3133_vm2, %v3159_v59, %v3161_v12  ;;  %v947_v59 = vshrl.u32 %v7374_v45, 16 }
  0x58   : > { %v3164_v28 = vsel %vm3133_vm2, %v3161_v12, %v3163_v16 }
  0x59   : > { %v949_v3 = vor.u32 %v947_v59, %v945_v62 }
  0x5c   : > { %6682 = vmatmul.mubr.msk.bf16.vlgmr.msra.gmra.mrb[0].mxu1 %vm430_vm0, %v850_v23  ;;  %6846 = vmatmul.mubr.msk.bf16.gmra.mrb[12].mxu0 %vm430_vm0, %v3150_v33  ;;  %v913_v23 = vrot.slane %v911_v13, 1  ;;  %v3165_v33 = vrot.slane %v7363_v22, 2 }
  0x5d   : > { %6685 = vmatprep.mubr.msk.bf16.mxu1 %vm430_vm0, %v858_v26  ;;  %6718 = vmatpush3.bf16.msra.mxu1 %v7581_v4  ;;  %v874_v4 = vsel %vm830_vm3, %v869_v38, %v873_v39  ;;  %v909_v26 = vor.u32 %v907_v17, %v905_v8  ;;  %v923_v38 = vshrl.u32 %v7366_v9, 16  ;;  %v3651_v8 = vrot.slane %v7373_v63, 2 }
  0x5e   : > { %6849 = vmatprep.mubr.msk.bf16.mxu0 %vm430_vm0, %v3152_v37  ;;  %6755 = vmatprep.subr.bf16.mxu1 %v7738_v14  ;;  %v917_v29 = vor.u32 %v915_v19, %v913_v23  ;;  %v3167_v37 = vrot.slane %v7365_v27, 2  ;;  %v3166_v46 = vsel %vm3133_vm2, %v3163_v16, %v3165_v33  ;;  %v7382_v16 = vld [vmem:[%s7576_s8 + $0x90] ss:$0 sps:$4 sm:$0x11]  }
  0x5f   : > { %v914_v35 = vsel %vm830_vm3, %v909_v26, %v913_v23  ;;  %v925_v47 = vor.u32 %v923_v38, %v921_v30  ;;  %v7377_v19 = vld [vmem:[%s7576_s8 + $0x30] sm:$0xff]   ;;  %v7379_v23 = vld [vmem:[%s7576_s8 + $0x38] sm:$0xff]   ;;  %v7792_v26 = vld [vmem:[%s8390_s2 + $0x40] sm:$0xff]   ;;  %v975_v27 = vshll.u32 %v7382_v16, 16 }
  0x60   : > { %v922_v39 = vsel %vm830_vm3, %v917_v29, %v921_v30  ;;  %v3168_v48 = vsel %vm3133_vm2, %v3165_v33, %v3167_v37  ;;  %v971_v30 = vshrl.u32 %v7380_v6, 16  ;;  %v3657_v32 = vrot.slane %v7379_v23, 2  ;;  %v7402_v23 = vld [vmem:[%s7576_s8 + $0x48] sm:$0xff]  }
  0x61   : > { %v930_v54 = vsel %vm830_vm3, %v925_v47, %v929_v44  ;;  %v977_v38 = vrot.slane %v975_v27, 1  ;;  %v3661_v47 = vrot.slane %v7383_v41, 2  ;;  %v7873_v41 = vld [vmem:[%s7576_s8 + $0x98] sm:$0xff]  }
  0x64   : > { %6686 = vmatmul.mubr.msk.bf16.gmra.mrb[4].mxu1 %vm430_vm0, %v866_v43  ;;  %6850 = vmatmul.mubr.msk.bf16.gmra.mrb[16].mxu0 %vm430_vm0, %v3154_v52  ;;  %v7370_v43 = vld [vmem:[%s7576_s8 + $0x18] sm:$0xff]   ;;  %v3169_v52 = vrot.slane %v7367_v40, 2 }
  0x65   : > { %6689 = vmatprep.mubr.msk.bf16.mxu1 %vm430_vm0, %v874_v4  ;;  %6853 = vmatprep.mubr.msk.bf16.mxu0 %vm430_vm0, %v3156_v55  ;;  %v7369_v4 = vld [vmem:[%s7576_s8 + $0x10] sm:$0xfc]   ;;  %v3649_v55 = vrot.slane %v7370_v43, 2 }
  0x66   : > { %v3648_v57 = vrot.slane %v7369_v4, 2  ;;  %v3170_v36 = vsel %vm3133_vm2, %v3167_v37, %v3169_v52  ;;  %v7381_v37 = vld [vmem:[%s7576_s8 + $0x40] sm:$0xff]  }
  0x67   : > { %v3659_v44 = vrot.slane %v7381_v37, 2 }
  0x68   : > { %v3650_v2 = vsel %vm3133_vm2, %v3648_v57, %v3649_v55  ;;  %v7391_v57 = vld [vmem:[%s7576_s8 + $0x20] sm:$0xff]  }
  0x69   : > { %v3660_v49 = vsel %vm3133_vm2, %v3657_v32, %v3659_v44  ;;  %v3662_v52 = vsel %vm3133_vm2, %v3659_v44, %v3661_v47 }
  0x6c   : > { %6690 = vmatmul.mubr.msk.bf16.gmra.mrb[8].mxu1 %vm430_vm0, %v882_v61  ;;  %6854 = vmatmul.mubr.msk.bf16.gmra.mrb[20].mxu0 %vm430_vm0, %v3158_v5  ;;  %v7378_v61 = vld [vmem:[%s7576_s8 + $0x80] sm:$0xff]   ;;  %v953_v5 = vrot.slane %v951_v60, 1  ;;  %v7394_v60 = vld [vmem:[%s7576_s8 + $0x28] sm:$0xff]  }
  0x6d   : > { %6693 = vmatprep.mubr.msk.bf16.mxu1 %vm430_vm0, %v890_v0  ;;  %6857 = vmatprep.mubr.msk.bf16.mxu0 %vm430_vm0, %v3160_v10  ;;  %v941_v0 = vor.u32 %v939_v56, %v937_v50  ;;  %v959_v7 = vshll.u32 %v7378_v61, 16  ;;  %v3653_v10 = vrot.slane %v7375_v1, 2  ;;  %v963_v13 = vshrl.u32 %v7378_v61, 16  ;;  %v7386_v50 = vld [vmem:[%s7576_s8 + $0x50] sm:$0xff]  }
  0x6e   : > { %v954_v12 = vsel %vm830_vm3, %v949_v3, %v953_v5  ;;  %v957_v21 = vor.u32 %v955_v11, %v953_v5  ;;  %v1466_v1 = vrot.slane %v7394_v60, 1  ;;  %v7396_v5 = vld [vmem:[%s7576_s8 + $0x30] sm:$0xff]   ;;  %v5412_v60 = vld [vmem:[%s8389_s1 + $0x18] sm:$0xff] }
  0x6f   : > { %v946_v9 = vsel %vm830_vm3, %v941_v0, %v945_v62  ;;  %v961_v17 = vrot.slane %v959_v7, 1  ;;  %v3654_v22 = vsel %vm3133_vm2, %v3651_v8, %v3653_v10  ;;  %v7390_v62 = vld [vmem:[%s7576_s8 + $0x60] sm:$0xff]   ;;  %v7393_v0 = vld [vmem:[%s7576_s8 + $0x68] sm:$0xff]   ;;  %v1468_v11 = vrot.slane %v7396_v5, 1 }
  0x70   : > { %v3667_v3 = vrot.slane %v7390_v62, 2 }
  0x71   : > { %v965_v24 = vor.u32 %v963_v13, %v961_v17  ;;  %v962_v29 = vsel %vm830_vm3, %v957_v21, %v961_v17 }
  0x74   : > { %6694 = vmatmul.mubr.msk.bf16.gmra.mrb[12].mxu1 %vm430_vm0, %v898_v15  ;;  %6858 = vmatmul.mubr.msk.bf16.gmra.mrb[24].mxu0 %vm430_vm0, %v3162_v25  ;;  %v967_v15 = vshll.u32 %v7380_v6, 16  ;;  %v3669_v6 = vrot.slane %v7393_v0, 2 }
  0x75   : > { %6697 = vmatprep.mubr.msk.bf16.mxu1 %vm430_vm0, %v906_v18  ;;  %6861 = vmatprep.mubr.msk.bf16.mxu0 %vm430_vm0, %v3164_v28  ;;  %v3652_v18 = vsel %vm3133_vm2, %v3649_v55, %v3651_v8  ;;  %v3655_v28 = vrot.slane %v7377_v19, 2  ;;  %v3663_v55 = vrot.slane %v7386_v50, 2  ;;  %v7398_v8 = vld [vmem:[%s7576_s8 + $0x38] sm:$0xff]   ;;  %v7400_v19 = vld [vmem:[%s7576_s8 + $0x40] sm:$0xff]  }
  0x76   : > { %v969_v25 = vrot.slane %v967_v15, 1  ;;  %v3670_v13 = vsel %vm3133_vm2, %v3667_v3, %v3669_v6  ;;  %v7397_v15 = vld [vmem:[%s7576_s8 + $0x78] sm:$0xff]   ;;  %v1470_v16 = vrot.slane %v7398_v8, 1  ;;  %v1472_v27 = vrot.slane %v7400_v19, 1 }
  0x77   : > { %v3658_v40 = vsel %vm3133_vm2, %v3655_v28, %v3657_v32  ;;  %v3664_v61 = vsel %vm3133_vm2, %v3661_v47, %v3663_v55  ;;  %v3673_v21 = vrot.slane %v7397_v15, 2  ;;  %v7404_v32 = vld [vmem:[%s7576_s8 + $0x50] sm:$0xff]  }
  0x78   : > { %v970_v33 = vsel %vm830_vm3, %v965_v24, %v969_v25  ;;  %v1473_v34 = vsel %vm1456_vm4, %v1470_v16, %v1472_v27 }
  0x7c   : > { %6698 = vmatmul.mubr.msk.bf16.gmra.mrb[16].mxu1 %vm430_vm0, %v914_v35  ;;  %6862 = vmatmul.mubr.msk.bf16.gmra.mrb[28].mxu0 %vm430_vm0, %v3166_v46  ;;  %v7385_v35 = vld [vmem:[%s7576_s8 + $0x8] sm:$0xff]   ;;  %v7387_v46 = vld [vmem:[%s7576_s8 + $0x10] sm:$0xff]  }
  0x7d   : > { %6701 = vmatprep.mubr.msk.bf16.mxu1 %vm430_vm0, %v922_v39  ;;  %6865 = vmatprep.mubr.msk.bf16.mxu0 %vm430_vm0, %v3168_v48  ;;  %v973_v39 = vor.u32 %v971_v30, %v969_v25  ;;  %v1458_v43 = vrot.slane %v7385_v35, 1  ;;  %v7389_v48 = vld [vmem:[%s7576_s8 + $0x18] sm:$0xff]   ;;  %v1460_v51 = vrot.slane %v7387_v46, 1  ;;  %v7399_v25 = vld [vmem:[%s7576_s8 + $0x80] sm:$0xff]   ;;  %v1474_v30 = vrot.slane %v7402_v23, 1  ;;  %v7403_v35 = vld [vmem:[%s7576_s8 + $0x90] sm:$0xff]  }
  0x7e   : > { %v5409_v46 = vld [vmem:[%s8389_s1] sm:$0xff]  ;;  %v3679_v47 = vrot.slane %v7403_v35, 2 }
  0x7f   : > { %v978_v45 = vsel %vm830_vm3, %v973_v39, %v977_v38  ;;  %v1459_v4 = vsel %vm1456_vm4, %v1457_v42, %v1458_v43  ;;  %v1461_v56 = vsel %vm1456_vm4, %v1458_v43, %v1460_v51  ;;  %v1475_v38 = vsel %vm1456_vm4, %v1472_v27, %v1474_v30  ;;  %v7410_v39 = vld [vmem:[%s7576_s8 + $0x18] sm:$0xff]   ;;  %v7409_v43 = vld [vmem:[%s7576_s8 + $0x10] sm:$0xfc]   ;;  %v5417_v27 = vld [vmem:[%s8389_s1 + $0x40] sm:$0xff] }
  0x80   : > { %v4175_v50 = vshll.u32 %v7410_v39, 16 }
  0x84   : > { %6702 = vmatmul.mubr.msk.bf16.gmra.mrb[20].mxu1 %vm430_vm0, %v930_v54  ;;  %6866 = vmatmul.mubr.msk.bf16.gmra.mrb[32].mxu0 %vm430_vm0, %v3170_v36  ;;  %v1462_v54 = vrot.slane %v7389_v48, 1  ;;  %v1464_v36 = vrot.slane %v7391_v57, 1  ;;  %v4172_v48 = vshrl.u32 %v7410_v39, 16  ;;  %v7412_v57 = vld [vmem:[%s7576_s8 + $0x68] sm:$0xff]  }
  0x85   : > { %6705 = vmatprep.mubr.msk.bf16.mxu1 %vm430_vm0, %v938_v58  ;;  %6871 = vmatprep.mubr.msk.bf16.mxu0 %vm430_vm0, %v3650_v2  ;;  %v3665_v58 = vrot.slane %v7388_v53, 2  ;;  %v7836_v2 = vld [vmem:[%s8390_s2 + $0x20] sm:$0xff]   ;;  %v4164_v53 = vshrl.u32 %v7409_v43, 16 }
  0x86   : > { %v1463_v59 = vsel %vm1456_vm4, %v1460_v51, %v1462_v54  ;;  %v1467_v7 = vsel %vm1456_vm4, %v1464_v36, %v1466_v1  ;;  %v5410_v51 = vld [vmem:[%s8389_s1 + $0x8] sm:$0xff]  ;;  %v4174_v62 = vrot.slane %v4172_v48, 2 }
  0x87   : > { %v3666_v63 = vsel %vm3133_vm2, %v3663_v55, %v3665_v58  ;;  %v3681_v55 = vrot.slane %v7873_v41, 2  ;;  %v4166_v0 = vrot.slane %v4164_v53, 2 }
  0x89   : > { %v3682_v5 = vsel %vm3133_vm2, %v3679_v47, %v3681_v55 }
  0x8c   : > { %6706 = vmatmul.mubr.msk.bf16.gmra.mrb[24].mxu1 %vm430_vm0, %v946_v9  ;;  %6872 = vmatmul.mubr.msk.bf16.vlgmr.msra.gmra.mrb[0].mxu0 %vm430_vm0, %v3652_v18  ;;  %v3668_v9 = vsel %vm3133_vm2, %v3665_v58, %v3667_v3  ;;  %v1469_v18 = vsel %vm1456_vm4, %v1466_v1, %v1468_v11  ;;  %v7407_v58 = vld [vmem:[%s7576_s8 + $0xa0] ss:$0 sps:$4 sm:$0x33]   ;;  %v4177_v3 = vrot.slane %v4175_v50, 3 }
  0x8d   : > { %6709 = vmatprep.mubr.msk.bf16.mxu1 %vm430_vm0, %v954_v12  ;;  %6908 = vmatpush3.bf16.msra.mxu0 %v7695_v20  ;;  %v3656_v20 = vsel %vm3133_vm2, %v3653_v10, %v3655_v28  ;;  %v7395_v10 = vld [vmem:[%s7576_s8 + $0x70] sm:$0xff]   ;;  %v7506_v12 = vmov 0   ;;  %v5421_v50 = vld [vmem:[%s8389_s1 + $0x60] sm:$0xff] }
  0x8e   : > { %6875 = vmatprep.mubr.msk.bf16.mxu0 %vm430_vm0, %v3654_v22  ;;  %6945 = vmatprep.subr.bf16.mxu0 %v7792_v26  ;;  %v3671_v17 = vrot.slane %v7395_v10, 2  ;;  %v1471_v22 = vsel %vm1456_vm4, %v1468_v11, %v1470_v16  ;;  %v7414_v10 = vld [vmem:[%s7576_s8 + $0x70] sm:$0xff]   ;;  %v4178_v15 = vor.u32 %v4177_v3, %v4174_v62  ;;  %v7919_v16 = vld [vmem:[%s7576_s8 + $0x78] sm:$0xff]  }
  0x8f   : > { %7300 = vset.pattern.permute.xlu0 %v7506_v12  ;;  %7301 = vset.pattern.permute.xlu1 %v7506_v12  ;;  %v5415_v11 = vld [vmem:[%s8389_s1 + $0x30] sm:$0xff]  ;;  %v3683_v12 = vrot.slane %v7407_v58, 2  ;;  %v5424_v3 = vld [vmem:[%s8389_s1 + $0x78] sm:$0xff] }
  0x90   : > { %v3672_v24 = vsel %vm3133_vm2, %v3669_v6, %v3671_v17  ;;  %v3674_v28 = vsel %vm3133_vm2, %v3671_v17, %v3673_v21  ;;  %5447 = vperm.xlu0 %7300, %v5409_v46   ;;  %v1482_v6 = vrot.slane %v7412_v57, 1  ;;  %v5416_v17 = vld [vmem:[%s8389_s1 + $0x38] sm:$0xff]  ;;  %v5423_v62 = vld [vmem:[%s8389_s1 + $0x70] sm:$0xff] }
  0x94   : > { %6710 = vmatmul.mubr.msk.bf16.gmra.mrb[28].mxu1 %vm430_vm0, %v962_v29  ;;  %6876 = vmatmul.mubr.msk.bf16.gmra.mrb[4].mxu0 %vm430_vm0, %v3656_v20  ;;  %v7401_v29 = vld [vmem:[%s7576_s8 + $0x88] sm:$0xff]   ;;  %v7406_v20 = vld [vmem:[%s7576_s8 + $0x58] sm:$0xff]  }
  0x95   : > { %6713 = vmatprep.mubr.msk.bf16.mxu1 %vm430_vm0, %v970_v33  ;;  %6879 = vmatprep.mubr.msk.bf16.mxu0 %vm430_vm0, %v3658_v40  ;;  %v3675_v33 = vrot.slane %v7399_v25, 2  ;;  %v3677_v37 = vrot.slane %v7401_v29, 2  ;;  %v1476_v40 = vrot.slane %v7404_v32, 1  ;;  %v1484_v29 = vrot.slane %v7414_v10, 1  ;;  %v7419_v32 = vld [vmem:[%s7576_s8 + $0x38] sm:$0xff]  }
  0x96   : > { %5452 = vperm.xlu0 %7300, %v5410_v51  }
  0x97   : > { %v3676_v42 = vsel %vm3133_vm2, %v3673_v21, %v3675_v33  ;;  %v3678_v44 = vsel %vm3133_vm2, %v3675_v33, %v3677_v37  ;;  %v5418_v33 = vld [vmem:[%s8389_s1 + $0x48] sm:$0xff] }
  0x9c   : > { %6714 = vmatmul.mubr.msk.bf16.gmra.mrb[32].mxu1 %vm430_vm0, %v978_v45  ;;  %6880 = vmatmul.mubr.msk.bf16.gmra.mrb[8].mxu0 %vm430_vm0, %v3660_v49  ;;  %v1478_v45 = vrot.slane %v7406_v20, 1  ;;  %v5411_v49 = vld [vmem:[%s8389_s1 + $0x10] sm:$0xff] }
  0x9d   : > { %6719 = vmatprep.mubr.msk.bf16.mxu1 %vm430_vm0, %v1459_v4  ;;  %6883 = vmatprep.mubr.msk.bf16.mxu0 %vm430_vm0, %v3662_v52  ;;  %v7408_v4 = vld [vmem:[%s7576_s8 + $0x60] sm:$0xff]   ;;  %v1477_v52 = vsel %vm1456_vm4, %v1474_v30, %v1476_v40  ;;  %v1486_v30 = vrot.slane %v7919_v16, 1  ;;  %v5419_v20 = vld [vmem:[%s8389_s1 + $0x50] sm:$0xff]  ;;  %v5426_v16 = vld [vmem:[%s8389_s1 + $0x88] sm:$0xff] }
  0x9e   : > { %5457 = vperm.xlu1 %7301, %v5411_v49   ;;  %v7421_v49 = vld [vmem:[%s7576_s8 + $0x40] sm:$0xff]  }
  0x9f   : > { %v1487_v46 = vsel %vm1456_vm4, %v1484_v29, %v1486_v30 }
  0xa2   : > { %5462 = vperm.xlu1 %7301, %v5412_v60   ;;  %v7422_v60 = vld [vmem:[%s7576_s8 + $0x90] ss:$0 sps:$4 sm:$0x11]  }
  0xa4   : > { %6720 = vmatmul.mubr.msk.bf16.vlgmr.msra.gmra.mrb[0].mxu1 %vm430_vm0, %v1461_v56  ;;  %6884 = vmatmul.mubr.msk.bf16.gmra.mrb[12].mxu0 %vm430_vm0, %v3664_v61  ;;  %v1479_v56 = vsel %vm1456_vm4, %v1476_v40, %v1478_v45  ;;  %v1480_v61 = vrot.slane %v7408_v4, 1  ;;  %v1485_v40 = vsel %vm1456_vm4, %v1482_v6, %v1484_v29  ;;  %v4211_v4 = vshll.u32 %v7419_v32, 16  ;;  %v7427_v29 = vld [vmem:[%s7576_s8 + $0x18] sm:$0xff]  }
  0xa5   : > { %6723 = vmatprep.mubr.msk.bf16.mxu1 %vm430_vm0, %v1463_v59  ;;  %6756 = vmatpush3.bf16.msra.mxu1 %v7738_v14  ;;  %v1465_v14 = vsel %vm1456_vm4, %v1462_v54, %v1464_v36  ;;  %v4167_v54 = vshll.u32 %v7409_v43, 16  ;;  %v7413_v59 = vld [vmem:[%s7576_s8 + $0x20] sm:$0xff]   ;;  %v7946_v43 = vld [vmem:[%s7576_s8 + $0x88] sm:$0xff]  }
  0xa6   : > { %6983 = vmatprep.subr.bf16.mxu1 %v7836_v2  ;;  %6887 = vmatprep.mubr.msk.bf16.mxu0 %vm430_vm0, %v3666_v63  ;;  %v5413_v36 = vld [vmem:[%s8389_s1 + $0x20] sm:$0xff]  ;;  %v3680_v63 = vsel %vm3133_vm2, %v3677_v37, %v3679_v47  ;;  %v4181_v8 = vshrl.u32 %v7413_v59, 16  ;;  %v1483_v19 = vsel %vm1456_vm4, %v1480_v61, %v1482_v6  ;;  %v4208_v47 = vshrl.u32 %v7419_v32, 16 }
  0xa7   : > { %v4169_v1 = vrot.slane %v4167_v54, 3  ;;  %5467 = vperm.xlu0 %7300, %v5413_v36   ;;  %v7423_v54 = vld [vmem:[%s7576_s8 + $0x48] sm:$0xff]   ;;  %v4213_v58 = vrot.slane %v4211_v4, 3 }
  0xa8   : > { %v4183_v23 = vrot.slane %v4181_v8, 2  ;;  %v4210_v57 = vrot.slane %v4208_v47, 2  ;;  %v4229_v6 = vshll.u32 %v7423_v54, 16  ;;  %v7425_v8 = vld [vmem:[%s7576_s8 + $0x10] sm:$0xff]   ;;  %v7432_v4 = vld [vmem:[%s7576_s8 + $0x68] sm:$0xff]  }
  0xab   : > { %5477 = vperm.xlu0 %7300, %v5415_v11  }
  0xac   : > { %6724 = vmatmul.mubr.msk.bf16.gmra.mrb[4].mxu1 %vm430_vm0, %v1465_v14  ;;  %6888 = vmatmul.mubr.msk.bf16.gmra.mrb[16].mxu0 %vm430_vm0, %v3668_v9  ;;  %v5414_v14 = vld [vmem:[%s8389_s1 + $0x28] sm:$0xff]  ;;  %v4184_v9 = vshll.u32 %v7413_v59, 16  ;;  %v1490_v59 = vrot.slane %v7946_v43, 1 }
  0xad   : > { %6727 = vmatprep.mubr.msk.bf16.mxu1 %vm430_vm0, %v1467_v7  ;;  %6891 = vmatprep.mubr.msk.bf16.mxu0 %vm430_vm0, %v3670_v13  ;;  %v7415_v7 = vld [vmem:[%s7576_s8 + $0x28] sm:$0xff]   ;;  %v1481_v13 = vsel %vm1456_vm4, %v1478_v45, %v1480_v61  ;;  %v4217_v61 = vshrl.u32 %v7421_v49, 16 }
  0xae   : > { %5472 = vperm.xlu1 %7301, %v5414_v14   ;;  %v4190_v21 = vshrl.u32 %v7415_v7, 16  ;;  %v4186_v25 = vrot.slane %v4184_v9, 3  ;;  %v4214_v14 = vor.u32 %v4213_v58, %v4210_v57  ;;  %v5425_v9 = vld [vmem:[%s8389_s1 + $0x80] sm:$0xff]  ;;  %v5430_v43 = vld [vmem:[%s8389_s1 + $0xa8] sm:$0xff]  ;;  %v4262_v57 = vshrl.u32 %v7432_v4, 16 }
  0xaf   : > { %5487 = vperm.xlu0 %7300, %v5417_v27   ;;  %v4265_v58 = vshll.u32 %v7432_v4, 16 }
  0xb0   : > { %v4192_v35 = vrot.slane %v4190_v21, 2  ;;  %v4187_v39 = vor.u32 %v4186_v25, %v4183_v23  ;;  %v1972_v21 = vrot.slane %v7425_v8, 1  ;;  %v5427_v23 = vld [vmem:[%s8389_s1 + $0x90] sm:$0xff] }
  0xb2   : > { %5482 = vperm.xlu1 %7301, %v5416_v17   ;;  %v4188_v51 = vsel %vm4162_vm5, %v4178_v15, %v4187_v39 }
  0xb3   : > { %5497 = vperm.xlu0 %7300, %v5419_v20  }
  0xb4   : > { %6728 = vmatmul.mubr.msk.bf16.gmra.mrb[8].mxu1 %vm430_vm0, %v1469_v18  ;;  %6892 = vmatmul.mubr.msk.bf16.gmra.mrb[20].mxu0 %vm430_vm0, %v3672_v24  ;;  %v4170_v18 = vor.u32 %v4169_v1, %v4166_v0  ;;  %v7417_v24 = vld [vmem:[%s7576_s8 + $0x30] sm:$0xff]   ;;  %v4220_v0 = vshll.u32 %v7421_v49, 16  ;;  %v4226_v1 = vshrl.u32 %v7423_v54, 16  ;;  %v5432_v54 = vld [vmem:[%s8389_s1 + $0xb8] sm:$0xff] }
  0xb5   : > { %6731 = vmatprep.mubr.msk.bf16.mxu1 %vm430_vm0, %v1471_v22  ;;  %6895 = vmatprep.mubr.msk.bf16.mxu0 %vm430_vm0, %v3674_v28  ;;  %v4193_v22 = vshll.u32 %v7415_v7, 16  ;;  %v3684_v28 = vsel %vm3133_vm2, %v3681_v55, %v3683_v12  ;;  %v4199_v41 = vshrl.u32 %v7417_v24, 16  ;;  %v5422_v55 = vld [vmem:[%s8389_s1 + $0x68] sm:$0xff]  ;;  %v1492_v12 = vrot.slane %v7422_v60, 1  ;;  %v5433_v60 = vld [vmem:[%s8389_s1 + $0xc0] sm:$0xff] }
  0xb6   : > { %5492 = vperm.xlu1 %7301, %v5418_v33   ;;  %v7424_v7 = vld [vmem:[%s7576_s8 + $0x8] sm:$0xfe]   ;;  %v4222_v11 = vrot.slane %v4220_v0, 3  ;;  %v7434_v0 = vld [vmem:[%s7576_s8 + $0x70] sm:$0xff]  }
  0xb7   : > { %v4195_v37 = vrot.slane %v4193_v22, 3  ;;  %5507 = vperm.xlu0 %7300, %v5421_v50   ;;  %v7428_v22 = vld [vmem:[%s7576_s8 + $0x58] sm:$0xff]   ;;  %v1493_v25 = vsel %vm1456_vm4, %v1490_v59, %v1492_v12 }
  0xb8   : > { %v5436_v12 = vld [vmem:[%s8389_s1 + $0xd8] sm:$0xff] }
  0xb9   : > { %v4196_v45 = vor.u32 %v4195_v37, %v4192_v35  ;;  %v4247_v35 = vshll.u32 %v7428_v22, 16  ;;  %v7429_v37 = vld [vmem:[%s7576_s8 + $0x20] sm:$0xff]  }
  0xba   : > { %v1976_v47 = vrot.slane %v7429_v37, 1 }
  0xbb   : > { %5517 = vperm.xlu0 %7300, %v5423_v62  }
  0xbc   : > { %6732 = vmatmul.mubr.msk.bf16.gmra.mrb[12].mxu1 %vm430_vm0, %v1473_v34  ;;  %6896 = vmatmul.mubr.msk.bf16.gmra.mrb[24].mxu0 %vm430_vm0, %v3676_v42  ;;  %v4179_v34 = vsel %vm4162_vm5, %v4170_v18, %v4178_v15  ;;  %v4202_v42 = vshll.u32 %v7417_v24, 16  ;;  %v7426_v15 = vld [vmem:[%s7576_s8 + $0x50] sm:$0xff]   ;;  %v4231_v18 = vrot.slane %v4229_v6, 3 }
  0xbd   : > { %6735 = vmatprep.mubr.msk.bf16.mxu1 %vm430_vm0, %v1475_v38  ;;  %6899 = vmatprep.mubr.msk.bf16.mxu0 %vm430_vm0, %v3678_v44  ;;  %v7418_v38 = vld [vmem:[%s7576_s8 + $0x80] sm:$0xff]   ;;  %v5420_v44 = vld [vmem:[%s8389_s1 + $0x58] sm:$0xff]  ;;  %v4235_v27 = vshrl.u32 %v7426_v15, 16 }
  0xbe   : > { %v1488_v48 = vrot.slane %v7418_v38, 1  ;;  %5502 = vperm.xlu1 %7301, %v5420_v44   ;;  %v4204_v53 = vrot.slane %v4202_v42, 3  ;;  %v5429_v38 = vld [vmem:[%s8389_s1 + $0xa0] sm:$0xff] }
  0xbf   : > { %5527 = vperm.xlu0 %7300, %v5425_v9   ;;  %v7430_v42 = vld [vmem:[%s7576_s8 + $0x60] sm:$0xff]   ;;  %v4271_v9 = vshrl.u32 %v7434_v0, 16 }
  0xc2   : > { %5512 = vperm.xlu1 %7301, %v5422_v55  }
  0xc3   : > { %5537 = vperm.xlu0 %7300, %v5427_v23  }
  0xc4   : > { %6736 = vmatmul.mubr.msk.bf16.gmra.mrb[16].mxu1 %vm430_vm0, %v1477_v52  ;;  %6900 = vmatmul.mubr.msk.bf16.gmra.mrb[28].mxu0 %vm430_vm0, %v3680_v63  ;;  %v4201_v52 = vrot.slane %v4199_v41, 2  ;;  %v1489_v63 = vsel %vm1456_vm4, %v1486_v30, %v1488_v48  ;;  %v5428_v30 = vld [vmem:[%s8389_s1 + $0x98] sm:$0xff]  ;;  %v1974_v41 = vrot.slane %v7427_v29, 1 }
  0xc5   : > { %6739 = vmatprep.mubr.msk.bf16.mxu1 %vm430_vm0, %v1479_v56  ;;  %6903 = vmatprep.mubr.msk.bf16.mxu0 %vm430_vm0, %v3682_v5  ;;  %v4197_v56 = vsel %vm4162_vm5, %v4187_v39, %v4196_v45  ;;  %v1491_v5 = vsel %vm1456_vm4, %v1488_v48, %v1490_v59  ;;  %v4237_v39 = vrot.slane %v4235_v27, 2  ;;  %v5431_v48 = vld [vmem:[%s8389_s1 + $0xb0] sm:$0xff]  ;;  %v5438_v27 = vld [vmem:[%s8389_s1 + $0xe8] sm:$0xff] }
  0xc6   : > { %v4205_v36 = vor.u32 %v4204_v53, %v4201_v52  ;;  %5522 = vperm.xlu1 %7301, %v5424_v3   ;;  %v1975_v50 = vsel %vm1456_vm4, %v1972_v21, %v1974_v41  ;;  %v4256_v52 = vshll.u32 %v7430_v42, 16  ;;  %v7431_v53 = vld [vmem:[%s7576_s8 + $0x28] sm:$0xff]   ;;  %v7433_v59 = vld [vmem:[%s7576_s8 + $0x30] sm:$0xff]  }
  0xc7   : > { %5547 = vperm.xlu0 %7300, %v5429_v38   ;;  %v1980_v6 = vrot.slane %v7433_v59, 1 }
  0xc8   : > { %v4206_v10 = vsel %vm4162_vm5, %v4196_v45, %v4205_v36  ;;  %v4215_v17 = vsel %vm4162_vm5, %v4205_v36, %v4214_v14  ;;  %v4258_v36 = vrot.slane %v4256_v52, 3 }
  0xca   : > { %5532 = vperm.xlu1 %7301, %v5426_v16  }
  0xcb   : > { %5557 = vperm.xlu0 %7300, %v5431_v48  }
  0xcc   : > { %6740 = vmatmul.mubr.msk.bf16.gmra.mrb[20].mxu1 %vm430_vm0, %v1481_v13  ;;  %6904 = vmatmul.mubr.msk.bf16.gmra.mrb[32].mxu0 %vm430_vm0, %v3684_v28  ;;  %v4228_v13 = vrot.slane %v4226_v1, 2  ;;  %v4238_v28 = vshll.u32 %v7426_v15, 16  ;;  %v5434_v1 = vld [vmem:[%s8389_s1 + $0xc8] sm:$0xff] }
  0xcd   : > { %6743 = vmatprep.mubr.msk.bf16.mxu1 %vm430_vm0, %v1483_v19  ;;  %6909 = vmatprep.mubr.msk.bf16.mxu0 %vm430_vm0, %v4179_v34  ;;  %v1971_v19 = vrot.slane %v7424_v7, 1  ;;  %v4244_v34 = vshrl.u32 %v7428_v22, 16  ;;  %v7436_v7 = vld [vmem:[%s7576_s8 + $0x78] sm:$0xff]   ;;  %v4273_v22 = vrot.slane %v4271_v9, 2 }
  0xce   : > { %v4232_v32 = vor.u32 %v4231_v18, %v4228_v13  ;;  %5542 = vperm.xlu1 %7301, %v5428_v30   ;;  %v4280_v16 = vshrl.u32 %v7436_v7, 16  ;;  %v7437_v18 = vld [vmem:[%s7576_s8 + $0x40] sm:$0xff]  }
  0xcf   : > { %v1973_v33 = vsel %vm1456_vm4, %v1971_v19, %v1972_v21  ;;  %v4246_v45 = vrot.slane %v4244_v34, 2  ;;  %5567 = vperm.xlu0 %7300, %v5433_v60   ;;  %v5437_v19 = vld [vmem:[%s8389_s1 + $0xe0] sm:$0xff]  ;;  %v5439_v34 = vld [vmem:[%s8389_s1 + $0xf0] sm:$0xff] }
  0xd0   : > { %v4282_v29 = vrot.slane %v4280_v16, 2 }
  0xd2   : > { %5552 = vperm.xlu1 %7301, %v5430_v43  }
  0xd4   : > { %6744 = vmatmul.mubr.msk.bf16.gmra.mrb[24].mxu1 %vm430_vm0, %v1485_v40  ;;  %6910 = vmatmul.mubr.msk.bf16.vlgmr.msra.gmra.mrb[0].mxu0 %vm430_vm0, %v4188_v51  ;;  %v4240_v40 = vrot.slane %v4238_v28, 3  ;;  %v4253_v51 = vshrl.u32 %v7430_v42, 16 }
  0xd5   : > { %6747 = vmatprep.mubr.msk.bf16.mxu1 %vm430_vm0, %v1487_v46  ;;  %6946 = vmatpush3.bf16.msra.mxu0 %v7792_v26  ;;  %v4219_v26 = vrot.slane %v4217_v61, 2  ;;  %v4249_v46 = vrot.slane %v4247_v35, 3 }
  0xd6   : > { %6913 = vmatprep.mubr.msk.bf16.mxu0 %vm430_vm0, %v4197_v56  ;;  %v4241_v49 = vor.u32 %v4240_v40, %v4237_v39  ;;  %v1977_v56 = vsel %vm1456_vm4, %v1974_v41, %v1976_v47  ;;  %5562 = vperm.xlu1 %7301, %v5432_v54   ;;  %v4255_v62 = vrot.slane %v4253_v51, 2  ;;  %v7439_v39 = vld [vmem:[%s7576_s8 + $0x48] sm:$0xff]   ;;  %v5440_v40 = vld [vmem:[%s8389_s1 + $0xf8] sm:$0xff] }
  0xd7   : > { %v4223_v24 = vor.u32 %v4222_v11, %v4219_v26  ;;  %v4250_v55 = vor.u32 %v4249_v46, %v4246_v45  ;;  %v7435_v11 = vld [vmem:[%s7576_s8 + $0x38] sm:$0xff]   ;;  %v7441_v45 = vld [vmem:[%s7576_s8 + $0x50] sm:$0xff]   ;;  %v5441_v46 = vld [vmem:[%s8389_s1 + $0x100] sm:$0xff] }
  0xd8   : > { %v4242_v61 = vsel %vm4162_vm5, %v4232_v32, %v4241_v49  ;;  %v4259_v8 = vor.u32 %v4258_v36, %v4255_v62  ;;  %v5442_v51 = vld [vmem:[%s8389_s1 + $0x108] sm:$0xff]  ;;  %v7443_v62 = vld [vmem:[%s7576_s8 + $0x58] sm:$0xff]  }
  0xd9   : > { %v4224_v20 = vsel %vm4162_vm5, %v4214_v14, %v4223_v24  ;;  %v4233_v44 = vsel %vm4162_vm5, %v4223_v24, %v4232_v32  ;;  %v4251_v3 = vsel %vm4162_vm5, %v4241_v49, %v4250_v55  ;;  %v4264_v14 = vrot.slane %v4262_v57, 2  ;;  %v5443_v57 = vld [vmem:[%s8389_s1 + $0x110] sm:$0xff]  ;;  %v5444_v36 = vld [vmem:[%s8389_s1 + $0x118] sm:$0xff] }
  0xda   : > { %5572 = vperm.xlu1 %7301, %v5434_v1   ;;  %v4260_v21 = vsel %vm4162_vm5, %v4250_v55, %v4259_v8  ;;  %v1982_v24 = vrot.slane %v7435_v11, 1  ;;  %v1984_v32 = vrot.slane %v7437_v18, 1  ;;  %v1986_v49 = vrot.slane %v7439_v39, 1 }
  0xdb   : > { %v1988_v55 = vrot.slane %v7441_v45, 1 }
  0xdc   : > { %6748 = vmatmul.mubr.msk.bf16.gmra.mrb[28].mxu1 %vm430_vm0, %v1489_v63  ;;  %6914 = vmatmul.mubr.msk.bf16.gmra.mrb[4].mxu0 %vm430_vm0, %v4206_v10  ;;  %v1978_v63 = vrot.slane %v7431_v53, 1  ;;  %v4274_v10 = vshll.u32 %v7434_v0, 16  ;;  %v1983_v37 = vsel %vm1456_vm4, %v1980_v6, %v1982_v24  ;;  %v1985_v42 = vsel %vm1456_vm4, %v1982_v24, %v1984_v32 }
  0xdd   : > { %6751 = vmatprep.mubr.msk.bf16.mxu1 %vm430_vm0, %v1491_v5  ;;  %6917 = vmatprep.mubr.msk.bf16.mxu0 %vm430_vm0, %v4215_v17  ;;  %v4267_v5 = vrot.slane %v4265_v58, 3  ;;  %v4283_v17 = vshll.u32 %v7436_v7, 16  ;;  %v1987_v59 = vsel %vm1456_vm4, %v1984_v32, %v1986_v49  ;;  %v1989_v0 = vsel %vm1456_vm4, %v1986_v49, %v1988_v55  ;;  %v7458_v49 = vld [vmem:[%s7576_s8 + $0x90] sm:$0xff]  }
  0xde   : > { %v1979_v26 = vsel %vm1456_vm4, %v1976_v47, %v1978_v63  ;;  %v1981_v15 = vsel %vm1456_vm4, %v1978_v63, %v1980_v6  ;;  %5582 = vperm.xlu1 %7301, %v5436_v12   ;;  %v4276_v23 = vrot.slane %v4274_v10, 3 }
  0xdf   : > { %v4268_v13 = vor.u32 %v4267_v5, %v4264_v14  ;;  %v4285_v30 = vrot.slane %v4283_v17, 3  ;;  %v7445_v14 = vld [vmem:[%s7576_s8 + $0x60] sm:$0xff]   ;;  %v7447_v17 = vld [vmem:[%s7576_s8 + $0x68] sm:$0xff]  }
  0xe0   : > { %v4277_v35 = vor.u32 %v4276_v23, %v4273_v22  ;;  %v1992_v11 = vrot.slane %v7445_v14, 1 }
  0xe1   : > { %v4269_v28 = vsel %vm4162_vm5, %v4259_v8, %v4268_v13  ;;  %v4286_v41 = vor.u32 %v4285_v30, %v4282_v29  ;;  %v7446_v8 = vld [vmem:[%s7576_s8 + $0xa0] ss:$0 sps:$4 sm:$0x77]   ;;  %v7449_v29 = vld [vmem:[%s7576_s8 + $0x18] sm:$0xff]  }
  0xe2   : > { %5592 = vperm.xlu1 %7301, %v5438_v27   ;;  %v4278_v47 = vsel %vm4162_vm5, %v4268_v13, %v4277_v35  ;;  %v4328_v16 = vshll.u32 %v7446_v8, 16 }
  0xe3   : > { %v4287_v52 = vsel %vm4162_vm5, %v4277_v35, %v4286_v41 }
  0xe4   : > { %6752 = vmatmul.mubr.msk.bf16.gmra.mrb[32].mxu1 %vm430_vm0, %v1493_v25  ;;  %6918 = vmatmul.mubr.msk.bf16.gmra.mrb[8].mxu0 %vm430_vm0, %v4224_v20  ;;  %v7438_v25 = vld [vmem:[%s7576_s8 + $0x80] sm:$0xff]   ;;  %v4330_v24 = vrot.slane %v4328_v16, 3 }
  0xe5   : > { %6757 = vmatprep.mubr.msk.bf16.mxu1 %vm430_vm0, %v1973_v33  ;;  %6921 = vmatprep.mubr.msk.bf16.mxu0 %vm430_vm0, %v4233_v44  ;;  %v7440_v33 = vld [vmem:[%s7576_s8 + $0x88] sm:$0xff]   ;;  %v4289_v38 = vshrl.u32 %v7438_v25, 16  ;;  %v4292_v20 = vshll.u32 %v7438_v25, 16  ;;  %v1994_v25 = vrot.slane %v7447_v17, 1  ;;  %v7468_v17 = vld [vmem:[%s7576_s8 + $0x78] sm:$0xff]  }
  0xe6   : > { %v4298_v43 = vshrl.u32 %v7440_v33, 16  ;;  %v4301_v44 = vshll.u32 %v7440_v33, 16  ;;  %5602 = vperm.xlu1 %7301, %v5440_v40   ;;  %v7451_v40 = vld [vmem:[%s7576_s8 + $0x20] sm:$0xff]  }
  0xe7   : > { %v4291_v4 = vrot.slane %v4289_v38, 2  ;;  %v4294_v48 = vrot.slane %v4292_v20, 3  ;;  %v1995_v33 = vsel %vm1456_vm4, %v1992_v11, %v1994_v25  ;;  %v7454_v20 = vld [vmem:[%s7576_s8 + $0x80] sm:$0xff]   ;;  %v4814_v45 = vrot.slane %v7451_v40, 3 }
  0xe8   : > { %v4300_v53 = vrot.slane %v4298_v43, 2  ;;  %v4303_v54 = vrot.slane %v4301_v44, 3  ;;  %v7453_v43 = vld [vmem:[%s7576_s8 + $0x28] sm:$0xff]   ;;  %v2000_v44 = vrot.slane %v7454_v20, 1 }
  0xe9   : > { %v4295_v58 = vor.u32 %v4294_v48, %v4291_v4  ;;  %v4816_v4 = vrot.slane %v7453_v43, 3 }
  0xea   : > { %5612 = vperm.xlu1 %7301, %v5442_v51   ;;  %v4304_v63 = vor.u32 %v4303_v54, %v4300_v53 }
  0xeb   : > { %v4296_v5 = vsel %vm4162_vm5, %v4286_v41, %v4295_v58  ;;  %v4817_v54 = vsel %vm4810_vm6, %v4814_v45, %v4816_v4 }
  0xec   : > { %6758 = vmatmul.mubr.msk.bf16.vlgmr.msra.gmra.mrb[0].mxu1 %vm430_vm0, %v1975_v50  ;;  %6922 = vmatmul.mubr.msk.bf16.gmra.mrb[12].mxu0 %vm430_vm0, %v4242_v61  ;;  %v7442_v50 = vld [vmem:[%s7576_s8 + $0x90] sm:$0xff]  }
  0xed   : > { %6761 = vmatprep.mubr.msk.bf16.mxu1 %vm430_vm0, %v1977_v56  ;;  %6984 = vmatpush3.bf16.msra.mxu1 %v7836_v2  ;;  %v5435_v2 = vld [vmem:[%s8389_s1 + $0xd0] sm:$0xff]  ;;  %v7444_v56 = vld [vmem:[%s7576_s8 + $0x98] sm:$0xff]   ;;  %v4307_v60 = vshrl.u32 %v7442_v50, 16  ;;  %v4310_v61 = vshll.u32 %v7442_v50, 16  ;;  %v7462_v50 = vld [vmem:[%s7576_s8 + $0x60] sm:$0xff]  }
  0xee   : > { %6925 = vmatprep.mubr.msk.bf16.mxu0 %vm430_vm0, %v4251_v3  ;;  %5577 = vperm.xlu0 %7300, %v5435_v2   ;;  %v4316_v1 = vshrl.u32 %v7444_v56, 16  ;;  %v4319_v3 = vshll.u32 %v7444_v56, 16  ;;  %v1990_v2 = vrot.slane %v7443_v62, 1  ;;  %v2004_v56 = vrot.slane %v7458_v49, 1  ;;  %v7464_v62 = vld [vmem:[%s7576_s8 + $0x68] sm:$0xff]  }
  0xef   : > { %5622 = vperm.xlu1 %7301, %v5444_v36   ;;  %v4309_v6 = vrot.slane %v4307_v60, 2  ;;  %v4312_v7 = vrot.slane %v4310_v61, 3  ;;  %v7460_v61 = vld [vmem:[%s7576_s8 + $0x98] ss:$0 sps:$4 sm:$0x11]  }
  0xf0   : > { %v4318_v9 = vrot.slane %v4316_v1, 2  ;;  %v4321_v10 = vrot.slane %v4319_v3, 3  ;;  %v1991_v13 = vsel %vm1456_vm4, %v1988_v55, %v1990_v2  ;;  %v7457_v55 = vld [vmem:[%s7576_s8 + $0x38] sm:$0xff]   ;;  %v7466_v3 = vld [vmem:[%s7576_s8 + $0x70] sm:$0xff]  }
  0xf1   : > { %v4313_v12 = vor.u32 %v4312_v7, %v4309_v6  ;;  %v4820_v36 = vrot.slane %v7457_v55, 3  ;;  %v2006_v6 = vrot.slane %v7460_v61, 1  ;;  %v2594_v7 = vshrl.u32 %v7464_v62, 16 }
  0xf2   : > { %5587 = vperm.xlu0 %7300, %v5437_v19   ;;  %v4322_v18 = vor.u32 %v4321_v10, %v4318_v9  ;;  %v1993_v19 = vsel %vm1456_vm4, %v1990_v2, %v1992_v11  ;;  %v2597_v2 = vshll.u32 %v7464_v62, 16  ;;  %v2603_v10 = vshrl.u32 %v7466_v3, 16 }
  0xf3   : > { %v4314_v22 = vsel %vm4162_vm5, %v4304_v63, %v4313_v12  ;;  %v2606_v11 = vshll.u32 %v7466_v3, 16 }
  0xf4   : > { %6762 = vmatmul.mubr.msk.bf16.gmra.mrb[4].mxu1 %vm430_vm0, %v1979_v26  ;;  %6926 = vmatmul.mubr.msk.bf16.gmra.mrb[16].mxu0 %vm430_vm0, %v4260_v21  ;;  %v4305_v26 = vsel %vm4162_vm5, %v4295_v58, %v4304_v63  ;;  %v7450_v21 = vld [vmem:[%s7576_s8 + $0x70] sm:$0xff]   ;;  %v4323_v27 = vsel %vm4162_vm5, %v4313_v12, %v4322_v18  ;;  %v2588_v58 = vshll.u32 %v7462_v50, 16  ;;  %v2599_v16 = vrot.slane %v2597_v2, 2 }
  0xf5   : > { %6765 = vmatprep.mubr.msk.bf16.mxu1 %vm430_vm0, %v1981_v15  ;;  %6929 = vmatprep.mubr.msk.bf16.mxu0 %vm430_vm0, %v4269_v28  ;;  %v4325_v15 = vshrl.u32 %v7446_v8, 16  ;;  %v7448_v28 = vld [vmem:[%s7576_s8 + $0x10] sm:$0xf8]   ;;  %v1996_v30 = vrot.slane %v7450_v21, 1  ;;  %v2605_v21 = vrot.slane %v2603_v10, 1 }
  0xf6   : > { %5597 = vperm.xlu0 %7300, %v5439_v34   ;;  %v7452_v34 = vld [vmem:[%s7576_s8 + $0x78] sm:$0xff]   ;;  %v4811_v35 = vrot.slane %v7448_v28, 3  ;;  %v2590_v1 = vrot.slane %v2588_v58, 2  ;;  %v2612_v28 = vshrl.u32 %v7468_v17, 16 }
  0xf7   : > { %v4327_v23 = vrot.slane %v4325_v15, 2  ;;  %v1997_v38 = vsel %vm1456_vm4, %v1994_v25, %v1996_v30  ;;  %v1998_v41 = vrot.slane %v7452_v34, 1  ;;  %v2596_v15 = vrot.slane %v2594_v7, 1  ;;  %v7463_v25 = vld [vmem:[%s7576_s8 + $0x50] sm:$0xff]  }
  0xf8   : > { %v7476_v58 = vld [vmem:[%s7576_s8 + $0x98] ss:$0 sps:$4 sm:$0x33]  }
  0xf9   : > { %v4331_v32 = vor.u32 %v4330_v24, %v4327_v23  ;;  %v2001_v48 = vsel %vm1456_vm4, %v1998_v41, %v2000_v44  ;;  %v7470_v23 = vld [vmem:[%s7576_s8 + $0x80] sm:$0xff]   ;;  %v2651_v3 = vshll.u32 %v7476_v58, 16 }
  0xfa   : > { %5607 = vperm.xlu0 %7300, %v5441_v46   ;;  %v1999_v46 = vsel %vm1456_vm4, %v1996_v30, %v1998_v41  ;;  %v2624_v34 = vshll.u32 %v7470_v23, 16 }
  0xfb   : > { %v4332_v39 = vsel %vm4162_vm5, %v4322_v18, %v4331_v32  ;;  %v7465_v32 = vld [vmem:[%s7576_s8 + $0x58] sm:$0xff]  }
  0xfc   : > { %6766 = vmatmul.mubr.msk.bf16.gmra.mrb[8].mxu1 %vm430_vm0, %v1983_v37  ;;  %6930 = vmatmul.mubr.msk.bf16.gmra.mrb[20].mxu0 %vm430_vm0, %v4278_v47  ;;  %v4812_v37 = vrot.slane %v7449_v29, 3  ;;  %v7456_v47 = vld [vmem:[%s7576_s8 + $0x88] sm:$0xff]   ;;  %v2615_v29 = vshll.u32 %v7468_v17, 16  ;;  %v4828_v40 = vrot.slane %v7465_v32, 3  ;;  %v2626_v43 = vrot.slane %v2624_v34, 2 }
  0xfd   : > { %6769 = vmatprep.mubr.msk.bf16.mxu1 %vm430_vm0, %v1985_v42  ;;  %6933 = vmatprep.mubr.msk.bf16.mxu0 %vm430_vm0, %v4287_v52  ;;  %v7455_v52 = vld [vmem:[%s7576_s8 + $0x30] sm:$0xff]   ;;  %v2002_v53 = vrot.slane %v7456_v47, 1 }
  0xfe   : > { %5617 = vperm.xlu0 %7300, %v5443_v57   ;;  %v4813_v42 = vsel %vm4810_vm6, %v4811_v35, %v4812_v37  ;;  %v4815_v51 = vsel %vm4810_vm6, %v4812_v37, %v4814_v45  ;;  %v2585_v57 = vshrl.u32 %v7462_v50, 16  ;;  %v4826_v35 = vrot.slane %v7463_v25, 3  ;;  %v7469_v50 = vld [vmem:[%s7576_s8 + $0x68] sm:$0xff]  }
  0xff   : > { %v2003_v60 = vsel %vm1456_vm4, %v2000_v44, %v2002_v53  ;;  %v2005_v63 = vsel %vm1456_vm4, %v2002_v53, %v2004_v56  ;;  %v2617_v20 = vrot.slane %v2615_v29, 2  ;;  %v7474_v44 = vld [vmem:[%s7576_s8 + $0x90] sm:$0xff]   ;;  %v7480_v29 = vld [vmem:[%s7576_s8 + $0xa0] ss:$0 sps:$4 sm:$0x77]  }
 0x100   : > { %v4829_v49 = vsel %vm4810_vm6, %v4826_v35, %v4828_v40  ;;  %v2642_v53 = vshll.u32 %v7474_v44, 16  ;;  %v4846_v32 = vrot.slane %v7480_v29, 3 }
 0x102   : > { %v2644_v62 = vrot.slane %v2642_v53, 2 }
 0x104   : > { %6770 = vmatmul.mubr.msk.bf16.gmra.mrb[12].mxu1 %vm430_vm0, %v1987_v59  ;;  %6934 = vmatmul.mubr.msk.bf16.gmra.mrb[24].mxu0 %vm430_vm0, %v4296_v5  ;;  %v4818_v59 = vrot.slane %v7455_v52, 3  ;;  %v7459_v5 = vld [vmem:[%s7576_s8 + $0x40] sm:$0xff]   ;;  %v2639_v52 = vshrl.u32 %v7474_v44, 16 }
 0x105   : > { %6773 = vmatprep.mubr.msk.bf16.mxu1 %vm430_vm0, %v1989_v0  ;;  %6937 = vmatprep.mubr.msk.bf16.mxu0 %vm430_vm0, %v4305_v26  ;;  %v2587_v0 = vrot.slane %v2585_v57, 1  ;;  %v7461_v26 = vld [vmem:[%s7576_s8 + $0x48] sm:$0xff]   ;;  %v4822_v12 = vrot.slane %v7459_v5, 3  ;;  %v7473_v5 = vld [vmem:[%s7576_s8 + $0x78] sm:$0xff]  }
 0x106   : > { %v4819_v14 = vsel %vm4810_vm6, %v4816_v4, %v4818_v59  ;;  %v4821_v8 = vsel %vm4810_vm6, %v4818_v59, %v4820_v36  ;;  %v4824_v18 = vrot.slane %v7461_v26, 3  ;;  %v4832_v59 = vrot.slane %v7469_v50, 3 }
 0x107   : > { %v2591_v9 = vor.u32 %v2590_v1, %v2587_v0  ;;  %v4823_v24 = vsel %vm4810_vm6, %v4820_v36, %v4822_v12  ;;  %v2641_v61 = vrot.slane %v2639_v52, 1  ;;  %v2648_v1 = vshrl.u32 %v7476_v58, 16 }
 0x108   : > { %v4825_v30 = vsel %vm4810_vm6, %v4822_v12, %v4824_v18  ;;  %v4827_v45 = vsel %vm4810_vm6, %v4824_v18, %v4826_v35  ;;  %v2653_v26 = vrot.slane %v2651_v3, 2  ;;  %v7475_v12 = vld [vmem:[%s7576_s8 + $0x80] sm:$0xff]  }
 0x109   : > { %v4838_v17 = vrot.slane %v7475_v12, 3 }
 0x10c   : > { %6774 = vmatmul.mubr.msk.bf16.gmra.mrb[16].mxu1 %vm430_vm0, %v1991_v13  ;;  %6938 = vmatmul.mubr.msk.bf16.gmra.mrb[28].mxu0 %vm430_vm0, %v4314_v22  ;;  %v2007_v13 = vsel %vm1456_vm4, %v2004_v56, %v2006_v6  ;;  %v2608_v22 = vrot.slane %v2606_v11, 2  ;;  %v2645_v6 = vor.u32 %v2644_v62, %v2641_v61 }
 0x10d   : > { %6777 = vmatprep.mubr.msk.bf16.mxu1 %vm430_vm0, %v1993_v19  ;;  %6941 = vmatprep.mubr.msk.bf16.mxu0 %vm430_vm0, %v4323_v27  ;;  %v2592_v19 = vsel %vm2485_vm1, %v7645_v31, %v2591_v9  ;;  %v2600_v27 = vor.u32 %v2599_v16, %v2596_v15  ;;  %v2621_v31 = vshrl.u32 %v7470_v23, 16  ;;  %v7477_v16 = vld [vmem:[%s7576_s8 + $0x88] sm:$0xff]  }
 0x10f   : > { %v2601_v37 = vsel %vm2485_vm1, %v2591_v9, %v2600_v27  ;;  %v4836_v9 = vrot.slane %v7473_v5, 3 }
 0x114   : > { %6778 = vmatmul.mubr.msk.bf16.gmra.mrb[20].mxu1 %vm430_vm0, %v1995_v33  ;;  %6942 = vmatmul.mubr.msk.bf16.gmra.mrb[32].mxu0 %vm430_vm0, %v4332_v39  ;;  %v2609_v33 = vor.u32 %v2608_v22, %v2605_v21  ;;  %v7472_v39 = vld [vmem:[%s7576_s8 + $0x88] sm:$0xff]   ;;  %v4839_v21 = vsel %vm4810_vm6, %v4836_v9, %v4838_v17  ;;  %v7478_v22 = vld [vmem:[%s7576_s8 + $0x90] sm:$0xff]  }
 0x115   : > { %6781 = vmatprep.mubr.msk.bf16.mxu1 %vm430_vm0, %v1997_v38  ;;  %6947 = vmatprep.mubr.msk.bf16.mxu0 %vm430_vm0, %v4813_v42  ;;  %v2614_v38 = vrot.slane %v2612_v28, 1  ;;  %v2623_v42 = vrot.slane %v2621_v31, 1  ;;  %v2630_v4 = vshrl.u32 %v7472_v39, 16  ;;  %v4842_v25 = vrot.slane %v7478_v22, 3 }
 0x116   : > { %v2610_v41 = vsel %vm2485_vm1, %v2600_v27, %v2609_v33 }
 0x117   : > { %v2618_v47 = vor.u32 %v2617_v20, %v2614_v38  ;;  %v2632_v56 = vrot.slane %v2630_v4, 1 }
 0x119   : > { %v2619_v55 = vsel %vm2485_vm1, %v2609_v33, %v2618_v47 }
 0x11c   : > { %6782 = vmatmul.mubr.msk.bf16.gmra.mrb[24].mxu1 %vm430_vm0, %v1999_v46  ;;  %6948 = vmatmul.mubr.msk.bf16.vlgmr.msra.gmra.mrb[0].mxu0 %vm430_vm0, %v4815_v51  ;;  %v7467_v46 = vld [vmem:[%s7576_s8 + $0x60] sm:$0xff]   ;;  %v2627_v51 = vor.u32 %v2626_v43, %v2623_v42 }
 0x11d   : > { %6785 = vmatprep.mubr.msk.bf16.mxu1 %vm430_vm0, %v2001_v48  ;;  %6951 = vmatprep.mubr.msk.bf16.mxu0 %vm430_vm0, %v4817_v54  ;;  %v2633_v48 = vshll.u32 %v7472_v39, 16  ;;  %v4830_v54 = vrot.slane %v7467_v46, 3  ;;  %v5458_v46 = vpop.permute.xlu1 %5457 }
 0x11f   : > { %v2635_v57 = vrot.slane %v2633_v48, 2  ;;  %v4831_v36 = vsel %vm4810_vm6, %v4828_v40, %v4830_v54 }
 0x121   : > { %v2636_v0 = vor.u32 %v2635_v57, %v2632_v56 }
 0x123   : > { %v2637_v2 = vsel %vm2485_vm1, %v2627_v51, %v2636_v0  ;;  %v2646_v10 = vsel %vm2485_vm1, %v2636_v0, %v2645_v6 }
 0x124   : > { %6786 = vmatmul.mubr.msk.bf16.gmra.mrb[28].mxu1 %vm430_vm0, %v2003_v60  ;;  %6952 = vmatmul.mubr.msk.bf16.gmra.mrb[4].mxu0 %vm430_vm0, %v4819_v14  ;;  %v2628_v60 = vsel %vm2485_vm1, %v2618_v47, %v2627_v51  ;;  %v4833_v14 = vsel %vm4810_vm6, %v4830_v54, %v4832_v59  ;;  %v5463_v51 = vpop.permute.xlu1 %5462 }
 0x125   : > { %6789 = vmatprep.mubr.msk.bf16.mxu1 %vm430_vm0, %v2005_v63  ;;  %6955 = vmatprep.mubr.msk.bf16.mxu0 %vm430_vm0, %v4821_v8  ;;  %v7471_v63 = vld [vmem:[%s7576_s8 + $0x70] sm:$0xff]   ;;  %v2650_v8 = vrot.slane %v2648_v1, 1 }
 0x126   : > { %v4834_v7 = vrot.slane %v7471_v63, 3 }
 0x128   : > { %v4835_v11 = vsel %vm4810_vm6, %v4832_v59, %v4834_v7  ;;  %v4837_v15 = vsel %vm4810_vm6, %v4834_v7, %v4836_v9 }
 0x12c   : > { %6790 = vmatmul.mubr.msk.bf16.gmra.mrb[32].mxu1 %vm430_vm0, %v2007_v13  ;;  %6956 = vmatmul.mubr.msk.bf16.gmra.mrb[8].mxu0 %vm430_vm0, %v4823_v24  ;;  %v2654_v13 = vor.u32 %v2653_v26, %v2650_v8  ;;  %v7479_v24 = vld [vmem:[%s7576_s8 + $0x98] sm:$0xff]   ;;  %s7274_s8 = smul.u32 144, %s8399_s18 }
 0x12d   : > { %6815 = vmatprep.mubr.msk.bf16.mxu1 %vm430_vm0, %v2592_v19  ;;  %6959 = vmatprep.mubr.msk.bf16.mxu0 %vm430_vm0, %v4825_v30  ;;  %v4840_v19 = vrot.slane %v7477_v16, 3  ;;  %v4844_v27 = vrot.slane %v7479_v24, 3 }
 0x12e   : > { %v2655_v18 = vsel %vm2485_vm1, %v2645_v6, %v2654_v13  ;;  %s8258_s15 = scalar_lea.vmem %s8391_s3, %s7274_s8 }
 0x12f   : > { %v4841_v23 = vsel %vm4810_vm6, %v4838_v17, %v4840_v19  ;;  %v4843_v28 = vsel %vm4810_vm6, %v4840_v19, %v4842_v25  ;;  %v4845_v30 = vsel %vm4810_vm6, %v4842_v25, %v4844_v27  ;;  %v4847_v33 = vsel %vm4810_vm6, %v4844_v27, %v4846_v32 }
 0x134   : > { %6816 = vmatmul.mubr.msk.bf16.vlgmr.msra.gmra.mrb[20].mxu1 %vm430_vm0, %v2601_v37  ;;  %6960 = vmatmul.mubr.msk.bf16.gmra.mrb[12].mxu0 %vm430_vm0, %v4827_v45  ;;  %v5448_v45 = vpop.permute.xlu0 %5447 }
 0x135   : > { %6819 = vmatprep.mubr.msk.bf16.mxu1 %vm430_vm0, %v2610_v41  ;;  %6963 = vmatprep.mubr.msk.bf16.mxu0 %vm430_vm0, %v4829_v49 }
 0x138   : > { %v5453_v48 = vpop.permute.xlu0 %5452 }
 0x13c   : > { %6820 = vmatmul.mubr.msk.bf16.gmra.mrb[24].mxu1 %vm430_vm0, %v2619_v55  ;;  %6964 = vmatmul.mubr.msk.bf16.gmra.mrb[16].mxu0 %vm430_vm0, %v4831_v36  ;;  %v5468_v52 = vpop.permute.xlu0 %5467  ;;  %v5473_v55 = vpop.permute.xlu1 %5472 }
 0x13d   : > { %6823 = vmatprep.mubr.msk.bf16.mxu1 %vm430_vm0, %v2628_v60  ;;  %6967 = vmatprep.mubr.msk.bf16.mxu0 %vm430_vm0, %v4833_v14 }
 0x140   : > { %v5478_v58 = vpop.permute.xlu0 %5477  ;;  %v5483_v59 = vpop.permute.xlu1 %5482 }
 0x144   : > { %6824 = vmatmul.mubr.msk.bf16.gmra.mrb[28].mxu1 %vm430_vm0, %v2637_v2  ;;  %6968 = vmatmul.mubr.msk.bf16.gmra.mrb[20].mxu0 %vm430_vm0, %v4835_v11  ;;  %v8244_v60 = vpop.permute.xlu0 %5487  ;;  %v8246_v61 = vpop.permute.xlu1 %5492 }
 0x145   : > { %6827 = vmatprep.mubr.msk.bf16.mxu1 %vm430_vm0, %v2646_v10  ;;  %6971 = vmatprep.mubr.msk.bf16.mxu0 %vm430_vm0, %v4837_v15 }
 0x148   : > { %v8248_v62 = vpop.permute.xlu0 %5497  ;;  %v8250_v36 = vpop.permute.xlu1 %5502 }
 0x14c   : > { %6828 = vmatmul.mubr.msk.bf16.gmra.mrb[32].mxu1 %vm430_vm0, %v2655_v18  ;;  %6972 = vmatmul.mubr.msk.bf16.gmra.mrb[24].mxu0 %vm430_vm0, %v4839_v21  ;;  %v8253_v7 = vpop.permute.xlu0 %5507  ;;  %v8260_v9 = vpop.permute.xlu1 %5512 }
 0x14d   : > { %6975 = vmatprep.mubr.msk.bf16.mxu0 %vm430_vm0, %v4841_v23 }
 0x150   : > { %v8264_v22 = vpop.permute.xlu0 %5517 }
 0x154   : > { %6976 = vmatmul.mubr.msk.bf16.gmra.mrb[28].mxu0 %vm430_vm0, %v4843_v28 }
 0x155   : > { %6979 = vmatprep.mubr.msk.bf16.mxu0 %vm430_vm0, %v4845_v30 }
 0x15c   : > { %6980 = vmatmul.mubr.msk.bf16.gmra.mrb[32].mxu0 %vm430_vm0, %v4847_v33  ;;  %v8266_v33 = vpop.permute.xlu1 %5522 }
 0x1bf   : > { %v6759_v31 = vpop.f32.mrb[0].mxu1 }
 0x1c0   : > { %v2102_v34 = vpop.f32.mrb[1].mxu1 }
 0x1c1   : > { %v6760_v35 = vpop.f32.mrb[2].mxu1 }
 0x1c2   : > { %v2105_v37 = vpop.f32.mrb[3].mxu1 }
 0x1c7   : > { %v6763_v38 = vpop.f32.mrb[4].mxu1 }
 0x1c8   : > { %v2118_v20 = vpop.f32.mrb[5].mxu1 }
 0x1c9   : > { %v6764_v39 = vpop.f32.mrb[6].mxu1 }
 0x1ca   : > { %v8218_v40 = vpop.f32.mrb[7].mxu1 }
 0x1cf   : > { %v8220_v41 = vpop.f32.mrb[8].mxu1 }
 0x1d0   : > { %v8222_v42 = vpop.f32.mrb[9].mxu1 }
 0x1d1   : > { %v8224_v43 = vpop.f32.mrb[10].mxu1 }
 0x1d2   : > { %v8226_v44 = vpop.f32.mrb[11].mxu1 }
 0x1d7   : > { %v8228_v47 = vpop.f32.mrb[12].mxu1 }
 0x1d8   : > { %v8230_v4 = vpop.f32.mrb[13].mxu1 }
 0x1d9   : > { %v8232_v49 = vpop.f32.mrb[14].mxu1 }
 0x1da   : > { %v8234_v50 = vpop.f32.mrb[15].mxu1 }
 0x1df   : > { %v8236_v53 = vpop.f32.mrb[16].mxu1 }
 0x1e0   : > { %v8238_v54 = vpop.f32.mrb[17].mxu1 }
 0x1e1   : > { %v8240_v56 = vpop.f32.mrb[18].mxu1 }
 0x1e2   : > { %v8242_v57 = vpop.f32.mrb[19].mxu1 }
 0x1ef   : > { %v6949_v63 = vpop.f32.mrb[0].mxu0 }
 0x1f0   : > { %v6985_v0 = vadd.f32 %v6949_v63, %v6759_v31  ;;  %v4942_v1 = vpop.f32.mrb[1].mxu0 }
 0x1f1   : > { %v6986_v3 = vadd.f32 %v4942_v1, %v2102_v34  ;;  %v6950_v14 = vpop.f32.mrb[2].mxu0 }
 0x1f2   : > { %v6987_v5 = vadd.f32 %v6950_v14, %v6760_v35  ;;  %v4945_v6 = vpop.f32.mrb[3].mxu0  ;;  %v5627_v10 = vmul.f32 %v6985_v0, %v5458_v46 }
 0x1f3   : > { %v5625_v2 = vmul.f32 %v6986_v3, %v5448_v45  ;;  %v6988_v8 = vadd.f32 %v4945_v6, %v2105_v37 }
 0x1f4   : > { %v6371_v26 = vpack.c.bf16 %v6987_v5, %v6985_v0  ;;  %v5628_v13 = vmul.f32 %v6987_v5, %v5463_v51  ;;  %v5705_v23 = vmul.f32 %v6985_v0, %v5627_v10  ;;  %v8270_v0 = vpop.permute.xlu0 %5527 }
 0x1f5   : > { %v6366_v11 = vpack.c.bf16 %v6988_v8, %v6986_v3  ;;  %v5626_v12 = vmul.f32 %v6988_v8, %v5453_v48  ;;  %v5703_v15 = vmul.f32 %v6986_v3, %v5625_v2 }
 0x1f6   : > { %6453 = vst [vmem:[%s8258_s15 + $0x8] sm:$0xff] %v6371_v26   ;;  %v5706_v29 = vmul.f32 %v6987_v5, %v5628_v13 }
 0x1f7   : > { %6367 = vst [vmem:[%s8258_s15] sm:$0xff] %v6366_v11   ;;  %v5661_v16 = vadd.f32 %v5626_v12, %v5625_v2  ;;  %v5704_v17 = vmul.f32 %v6988_v8, %v5626_v12  ;;  %v6953_v18 = vpop.f32.mrb[4].mxu0 }
 0x1f8   : > { %v6989_v19 = vadd.f32 %v6953_v18, %v6763_v38  ;;  %v4958_v21 = vpop.f32.mrb[5].mxu0  ;;  %v8284_v18 = vpop.permute.xlu0 %5537 }
 0x1f9   : > { %v5662_v24 = vadd.f32 %v5661_v16, %v5627_v10  ;;  %v5739_v25 = vadd.f32 %v5704_v17, %v5703_v15  ;;  %v6990_v27 = vadd.f32 %v4958_v21, %v2118_v20  ;;  %v6954_v28 = vpop.f32.mrb[6].mxu0 }
 0x1fa   : > { %v6991_v30 = vadd.f32 %v6954_v28, %v6764_v39  ;;  %v4961_v32 = vpop.f32.mrb[7].mxu0  ;;  %v5631_v63 = vmul.f32 %v6989_v19, %v5478_v58 }
 0x1fb   : > { %v5740_v31 = vadd.f32 %v5739_v25, %v5705_v23  ;;  %v5629_v34 = vmul.f32 %v6990_v27, %v5468_v52  ;;  %v5663_v35 = vadd.f32 %v5662_v24, %v5628_v13  ;;  %v6992_v37 = vadd.f32 %v4961_v32, %v8218_v40  ;;  %v8274_v40 = vpop.permute.xlu1 %5532 }
 0x1fc   : > { %v6381_v38 = vpack.c.bf16 %v6991_v30, %v6989_v19  ;;  %v5632_v3 = vmul.f32 %v6991_v30, %v5483_v59  ;;  %v5709_v26 = vmul.f32 %v6989_v19, %v5631_v63 }
 0x1fd   : > { %v5664_v45 = vadd.f32 %v5663_v35, %v5629_v34  ;;  %v5707_v46 = vmul.f32 %v6990_v27, %v5629_v34  ;;  %v5741_v48 = vadd.f32 %v5740_v31, %v5706_v29  ;;  %v6376_v51 = vpack.c.bf16 %v6992_v37, %v6990_v27 }
 0x1fe   : > { %6455 = vst [vmem:[%s8258_s15 + $0x18] sm:$0xff] %v6381_v38   ;;  %v5630_v20 = vmul.f32 %v6992_v37, %v5473_v55 }
 0x1ff   : > { %v5742_v39 = vadd.f32 %v5741_v48, %v5707_v46  ;;  %6454 = vst [vmem:[%s8258_s15 + $0x10] sm:$0xff] %v6376_v51   ;;  %v6957_v1 = vpop.f32.mrb[8].mxu0  ;;  %v8293_v27 = vpop.permute.xlu1 %5542 }
 0x200   : > { %v5665_v14 = vadd.f32 %v5664_v45, %v5630_v20  ;;  %v5708_v5 = vmul.f32 %v6992_v37, %v5630_v20  ;;  %v6993_v52 = vadd.f32 %v6957_v1, %v8220_v41  ;;  %v4974_v6 = vpop.f32.mrb[9].mxu0  ;;  %v5710_v41 = vmul.f32 %v6991_v30, %v5632_v3  ;;  %v8300_v51 = vpop.permute.xlu0 %5547 }
 0x201   : > { %v6994_v2 = vadd.f32 %v4974_v6, %v8222_v42  ;;  %v6958_v8 = vpop.f32.mrb[10].mxu0 }
 0x202   : > { %v5666_v58 = vadd.f32 %v5665_v14, %v5631_v63  ;;  %v5743_v10 = vadd.f32 %v5742_v39, %v5708_v5  ;;  %v6995_v55 = vadd.f32 %v6958_v8, %v8224_v43  ;;  %v4977_v11 = vpop.f32.mrb[11].mxu0 }
 0x203   : > { %v5633_v12 = vmul.f32 %v6994_v2, %v8244_v60  ;;  %v6996_v59 = vadd.f32 %v4977_v11, %v8226_v44  ;;  %v5635_v60 = vmul.f32 %v6993_v52, %v8248_v62  ;;  %v8308_v14 = vpop.permute.xlu1 %5552 }
 0x204   : > { %v5744_v15 = vadd.f32 %v5743_v10, %v5709_v26  ;;  %v5667_v16 = vadd.f32 %v5666_v58, %v5632_v3  ;;  %v6391_v17 = vpack.c.bf16 %v6995_v55, %v6993_v52  ;;  %v5636_v32 = vmul.f32 %v6995_v55, %v8250_v36 }
 0x205   : > { %v5711_v19 = vmul.f32 %v6994_v2, %v5633_v12  ;;  %v6386_v21 = vpack.c.bf16 %v6996_v59, %v6994_v2  ;;  %v5634_v43 = vmul.f32 %v6996_v59, %v8246_v61  ;;  %v5713_v37 = vmul.f32 %v6993_v52, %v5635_v60 }
 0x206   : > { %v5668_v44 = vadd.f32 %v5667_v16, %v5633_v12  ;;  %v5745_v24 = vadd.f32 %v5744_v15, %v5710_v41  ;;  %6457 = vst [vmem:[%s8258_s15 + $0x28] sm:$0xff] %v6391_v17  }
 0x207   : > { %v8280_v13 = vpop.f32.mrb[20].mxu1  ;;  %6456 = vst [vmem:[%s8258_s15 + $0x20] sm:$0xff] %v6386_v21   ;;  %v5712_v28 = vmul.f32 %v6996_v59, %v5634_v43  ;;  %v6961_v29 = vpop.f32.mrb[12].mxu0 }
 0x208   : > { %v8282_v42 = vpop.f32.mrb[21].mxu1  ;;  %v5746_v30 = vadd.f32 %v5745_v24, %v5711_v19  ;;  %v5669_v31 = vadd.f32 %v5668_v44, %v5634_v43  ;;  %v6997_v61 = vadd.f32 %v6961_v29, %v8228_v47  ;;  %v4990_v34 = vpop.f32.mrb[13].mxu0  ;;  %v5714_v47 = vmul.f32 %v6995_v55, %v5636_v32 }
 0x209   : > { %v8287_v23 = vpop.f32.mrb[22].mxu1  ;;  %v6998_v35 = vadd.f32 %v4990_v34, %v8230_v4  ;;  %v6962_v62 = vpop.f32.mrb[14].mxu0 }
 0x20a   : > { %v8291_v25 = vpop.f32.mrb[23].mxu1  ;;  %v5670_v38 = vadd.f32 %v5669_v31, %v5635_v60  ;;  %v5747_v45 = vadd.f32 %v5746_v30, %v5712_v28  ;;  %v6999_v46 = vadd.f32 %v6962_v62, %v8232_v49  ;;  %v4993_v48 = vpop.f32.mrb[15].mxu0 }
 0x20b   : > { %v5637_v63 = vmul.f32 %v6998_v35, %v8253_v7  ;;  %v7000_v36 = vadd.f32 %v4993_v48, %v8234_v50  ;;  %v5639_v7 = vmul.f32 %v6997_v61, %v8264_v22  ;;  %v5563_v43 = vpop.permute.xlu1 %5562 }
 0x20c   : > { %v5748_v39 = vadd.f32 %v5747_v45, %v5713_v37  ;;  %v5671_v4 = vadd.f32 %v5670_v38, %v5636_v32  ;;  %v6401_v1 = vpack.c.bf16 %v6999_v46, %v6997_v61  ;;  %v5640_v55 = vmul.f32 %v6999_v46, %v8266_v33 }
 0x20d   : > { %v5715_v49 = vmul.f32 %v6998_v35, %v5637_v63  ;;  %v6396_v5 = vpack.c.bf16 %v7000_v36, %v6998_v35  ;;  %v5638_v52 = vmul.f32 %v7000_v36, %v8260_v9  ;;  %v5558_v9 = vpop.permute.xlu0 %5557  ;;  %v5717_v22 = vmul.f32 %v6997_v61, %v5639_v7 }
 0x20e   : > { %v5672_v50 = vadd.f32 %v5671_v4, %v5637_v63  ;;  %v5749_v2 = vadd.f32 %v5748_v39, %v5714_v47  ;;  %6459 = vst [vmem:[%s8258_s15 + $0x38] sm:$0xff] %v6401_v1  }
 0x20f   : > { %v8304_v20 = vpop.f32.mrb[24].mxu1  ;;  %6458 = vst [vmem:[%s8258_s15 + $0x30] sm:$0xff] %v6396_v5   ;;  %v5716_v26 = vmul.f32 %v7000_v36, %v5638_v52  ;;  %v6965_v58 = vpop.f32.mrb[16].mxu0 }
 0x210   : > { %v8306_v3 = vpop.f32.mrb[25].mxu1  ;;  %v5750_v10 = vadd.f32 %v5749_v2, %v5715_v49  ;;  %v5673_v11 = vadd.f32 %v5672_v50, %v5638_v52  ;;  %v7001_v12 = vadd.f32 %v6965_v58, %v8236_v53  ;;  %v5006_v59 = vpop.f32.mrb[17].mxu0  ;;  %v5718_v53 = vmul.f32 %v6999_v46, %v5640_v55 }
 0x211   : > { %v8311_v6 = vpop.f32.mrb[26].mxu1  ;;  %v7002_v41 = vadd.f32 %v5006_v59, %v8238_v54  ;;  %v6966_v15 = vpop.f32.mrb[18].mxu0 }
 0x212   : > { %v8315_v8 = vpop.f32.mrb[27].mxu1  ;;  %v5674_v16 = vadd.f32 %v5673_v11, %v5639_v7  ;;  %v5751_v17 = vadd.f32 %v5750_v10, %v5716_v26  ;;  %v7003_v19 = vadd.f32 %v6966_v15, %v8240_v56  ;;  %v5009_v21 = vpop.f32.mrb[19].mxu0  ;;  %v5643_v61 = vmul.f32 %v7001_v12, %v8284_v18 }
 0x213   : > { %v5641_v60 = vmul.f32 %v7002_v41, %v8270_v0  ;;  %v7004_v33 = vadd.f32 %v5009_v21, %v8242_v57  ;;  %v5568_v35 = vpop.permute.xlu0 %5567  ;;  %v5573_v63 = vpop.permute.xlu1 %5572 }
 0x214   : > { %v5752_v24 = vadd.f32 %v5751_v17, %v5717_v22  ;;  %v5675_v28 = vadd.f32 %v5674_v16, %v5640_v55  ;;  %v6411_v54 = vpack.c.bf16 %v7003_v19, %v7001_v12  ;;  %v5644_v45 = vmul.f32 %v7003_v19, %v8293_v27 }
 0x215   : > { %v5719_v30 = vmul.f32 %v7002_v41, %v5641_v60  ;;  %v6406_v32 = vpack.c.bf16 %v7004_v33, %v7002_v41  ;;  %v5642_v56 = vmul.f32 %v7004_v33, %v8274_v40  ;;  %v5721_v47 = vmul.f32 %v7001_v12, %v5643_v61 }
 0x216   : > { %v5676_v0 = vadd.f32 %v5675_v28, %v5641_v60  ;;  %v5753_v34 = vadd.f32 %v5752_v24, %v5718_v53  ;;  %6461 = vst [vmem:[%s8258_s15 + $0x48] sm:$0xff] %v6411_v54   ;;  %v5722_v7 = vmul.f32 %v7003_v19, %v5644_v45 }
 0x217   : > { %v8324_v44 = vpop.f32.mrb[28].mxu1  ;;  %6460 = vst [vmem:[%s8258_s15 + $0x40] sm:$0xff] %v6406_v32   ;;  %v5720_v62 = vmul.f32 %v7004_v33, %v5642_v56  ;;  %v6969_v37 = vpop.f32.mrb[20].mxu0 }
 0x218   : > { %v8326_v29 = vpop.f32.mrb[29].mxu1  ;;  %v5754_v38 = vadd.f32 %v5753_v34, %v5719_v30  ;;  %v5677_v46 = vadd.f32 %v5676_v0, %v5642_v56  ;;  %v7005_v48 = vadd.f32 %v6969_v37, %v8280_v13  ;;  %v5022_v40 = vpop.f32.mrb[21].mxu0 }
 0x219   : > { %v8329_v31 = vpop.f32.mrb[30].mxu1  ;;  %v7006_v36 = vadd.f32 %v5022_v40, %v8282_v42  ;;  %v6970_v18 = vpop.f32.mrb[22].mxu0 }
 0x21a   : > { %v8333_v57 = vpop.f32.mrb[31].mxu1  ;;  %v5678_v39 = vadd.f32 %v5677_v46, %v5643_v61  ;;  %v5755_v4 = vadd.f32 %v5754_v38, %v5720_v62  ;;  %v7007_v1 = vadd.f32 %v6970_v18, %v8287_v23  ;;  %v5025_v49 = vpop.f32.mrb[23].mxu0 }
 0x21b   : > { %v5645_v5 = vmul.f32 %v7006_v36, %v8300_v51  ;;  %v7008_v52 = vadd.f32 %v5025_v49, %v8291_v25  ;;  %v5578_v26 = vpop.permute.xlu0 %5577  ;;  %v5647_v51 = vmul.f32 %v7005_v48, %v5558_v9  ;;  %v5583_v59 = vpop.permute.xlu1 %5582 }
 0x21c   : > { %v5756_v13 = vadd.f32 %v5755_v4, %v5721_v47  ;;  %v5679_v50 = vadd.f32 %v5678_v39, %v5644_v45  ;;  %v6421_v2 = vpack.c.bf16 %v7007_v1, %v7005_v48  ;;  %v5648_v16 = vmul.f32 %v7007_v1, %v5563_v43 }
 0x21d   : > { %v5723_v58 = vmul.f32 %v7006_v36, %v5645_v5  ;;  %v6416_v10 = vpack.c.bf16 %v7008_v52, %v7006_v36  ;;  %v5646_v23 = vmul.f32 %v7008_v52, %v8308_v14  ;;  %v5725_v33 = vmul.f32 %v7005_v48, %v5647_v51 }
 0x21e   : > { %v5680_v11 = vadd.f32 %v5679_v50, %v5645_v5  ;;  %v5757_v12 = vadd.f32 %v5756_v13, %v5722_v7  ;;  %6463 = vst [vmem:[%s8258_s15 + $0x58] sm:$0xff] %v6421_v2   ;;  %v5726_v43 = vmul.f32 %v7007_v1, %v5648_v16 }
 0x21f   : > { %v8342_v27 = vpop.f32.mrb[32].mxu1  ;;  %6462 = vst [vmem:[%s8258_s15 + $0x50] sm:$0xff] %v6416_v10   ;;  %v5724_v41 = vmul.f32 %v7008_v52, %v5646_v23  ;;  %v6973_v15 = vpop.f32.mrb[24].mxu0 }
 0x220   : > { %v8344_v42 = vpop.f32.mrb[33].mxu1  ;;  %v5758_v22 = vadd.f32 %v5757_v12, %v5723_v58  ;;  %v5681_v17 = vadd.f32 %v5680_v11, %v5646_v23  ;;  %v7009_v19 = vadd.f32 %v6973_v15, %v8304_v20  ;;  %v5038_v21 = vpop.f32.mrb[25].mxu0 }
 0x221   : > { %v8347_v55 = vpop.f32.mrb[34].mxu1  ;;  %v7010_v14 = vadd.f32 %v5038_v21, %v8306_v3  ;;  %v6974_v60 = vpop.f32.mrb[26].mxu0 }
 0x222   : > { %v8350_v25 = vpop.f32.mrb[35].mxu1  ;;  %v5682_v9 = vadd.f32 %v5681_v17, %v5647_v51  ;;  %v5759_v53 = vadd.f32 %v5758_v22, %v5724_v41  ;;  %v7011_v24 = vadd.f32 %v6974_v60, %v8311_v6  ;;  %v5041_v28 = vpop.f32.mrb[27].mxu0  ;;  %v5651_v37 = vmul.f32 %v7009_v19, %v5578_v26 }
 0x223   : > { %v5588_v54 = vpop.permute.xlu0 %5587  ;;  %v5649_v30 = vmul.f32 %v7010_v14, %v5568_v35  ;;  %v7012_v32 = vadd.f32 %v5041_v28, %v8315_v8  ;;  %v5593_v0 = vpop.permute.xlu1 %5592 }
 0x224   : > { %v5760_v56 = vadd.f32 %v5759_v53, %v5725_v33  ;;  %v5683_v61 = vadd.f32 %v5682_v9, %v5648_v16  ;;  %v6431_v20 = vpack.c.bf16 %v7011_v24, %v7009_v19  ;;  %v5652_v40 = vmul.f32 %v7011_v24, %v5583_v59 }
 0x225   : > { %v5727_v34 = vmul.f32 %v7010_v14, %v5649_v30  ;;  %v6426_v3 = vpack.c.bf16 %v7012_v32, %v7010_v14  ;;  %v5650_v62 = vmul.f32 %v7012_v32, %v5573_v63  ;;  %v5729_v4 = vmul.f32 %v7009_v19, %v5651_v37 }
 0x226   : > { %v5684_v38 = vadd.f32 %v5683_v61, %v5649_v30  ;;  %v5761_v45 = vadd.f32 %v5760_v56, %v5726_v43  ;;  %6465 = vst [vmem:[%s8258_s15 + $0x68] sm:$0xff] %v6431_v20   ;;  %v5730_v50 = vmul.f32 %v7011_v24, %v5652_v40 }
 0x227   : > { %6464 = vst [vmem:[%s8258_s15 + $0x60] sm:$0xff] %v6426_v3   ;;  %v5728_v6 = vmul.f32 %v7012_v32, %v5650_v62  ;;  %v6977_v46 = vpop.f32.mrb[28].mxu0  ;;  %v5598_v18 = vpop.permute.xlu0 %5597 }
 0x228   : > { %v5762_v48 = vadd.f32 %v5761_v45, %v5727_v34  ;;  %v5685_v35 = vadd.f32 %v5684_v38, %v5650_v62  ;;  %v7013_v8 = vadd.f32 %v6977_v46, %v8324_v44  ;;  %v5054_v36 = vpop.f32.mrb[29].mxu0  ;;  %v5603_v52 = vpop.permute.xlu1 %5602 }
 0x229   : > { %v7014_v47 = vadd.f32 %v5054_v36, %v8326_v29  ;;  %v6978_v39 = vpop.f32.mrb[30].mxu0 }
 0x22a   : > { %v5686_v1 = vadd.f32 %v5685_v35, %v5651_v37  ;;  %v5763_v63 = vadd.f32 %v5762_v48, %v5728_v6  ;;  %v7015_v49 = vadd.f32 %v6978_v39, %v8329_v31  ;;  %v5057_v5 = vpop.f32.mrb[31].mxu0  ;;  %v5655_v23 = vmul.f32 %v7013_v8, %v5598_v18 }
 0x22b   : > { %v5653_v7 = vmul.f32 %v7014_v47, %v5588_v54  ;;  %v7016_v13 = vadd.f32 %v5057_v5, %v8333_v57  ;;  %v5608_v12 = vpop.permute.xlu0 %5607 }
 0x22c   : > { %v5764_v2 = vadd.f32 %v5763_v63, %v5729_v4  ;;  %v5687_v44 = vadd.f32 %v5686_v1, %v5652_v40  ;;  %v6441_v26 = vpack.c.bf16 %v7015_v49, %v7013_v8  ;;  %v5656_v15 = vmul.f32 %v7015_v49, %v5603_v52  ;;  %v5613_v17 = vpop.permute.xlu1 %5612 }
 0x22d   : > { %v5731_v58 = vmul.f32 %v7014_v47, %v5653_v7  ;;  %v6436_v10 = vpack.c.bf16 %v7016_v13, %v7014_v47  ;;  %v5654_v29 = vmul.f32 %v7016_v13, %v5593_v0  ;;  %v5733_v14 = vmul.f32 %v7013_v8, %v5655_v23 }
 0x22e   : > { %v5688_v51 = vadd.f32 %v5687_v44, %v5653_v7  ;;  %v5765_v11 = vadd.f32 %v5764_v2, %v5730_v50  ;;  %6467 = vst [vmem:[%s8258_s15 + $0x78] sm:$0xff] %v6441_v26   ;;  %v5734_v54 = vmul.f32 %v7015_v49, %v5656_v15 }
 0x22f   : > { %6466 = vst [vmem:[%s8258_s15 + $0x70] sm:$0xff] %v6436_v10   ;;  %v5732_v31 = vmul.f32 %v7016_v13, %v5654_v29  ;;  %v6981_v59 = vpop.f32.mrb[32].mxu0  ;;  %v5618_v43 = vpop.permute.xlu0 %5617 }
 0x230   : > { %v5766_v41 = vadd.f32 %v5765_v11, %v5731_v58  ;;  %v5689_v22 = vadd.f32 %v5688_v51, %v5654_v29  ;;  %v7017_v57 = vadd.f32 %v6981_v59, %v8342_v27  ;;  %v5070_v16 = vpop.f32.mrb[33].mxu0  ;;  %v5623_v3 = vpop.permute.xlu1 %5622 }
 0x231   : > { %v7018_v19 = vadd.f32 %v5070_v16, %v8344_v42  ;;  %v6982_v21 = vpop.f32.mrb[34].mxu0 }
 0x232   : > { %v5690_v60 = vadd.f32 %v5689_v22, %v5655_v23  ;;  %v5767_v33 = vadd.f32 %v5766_v41, %v5732_v31  ;;  %v7019_v9 = vadd.f32 %v6982_v21, %v8347_v55  ;;  %v5073_v53 = vpop.f32.mrb[35].mxu0  ;;  %v5659_v20 = vmul.f32 %v7017_v57, %v5618_v43 }
 0x233   : > { %v5657_v24 = vmul.f32 %v7018_v19, %v5608_v12  ;;  %v7020_v28 = vadd.f32 %v5073_v53, %v8350_v25 }
 0x234   : > { %v5768_v30 = vadd.f32 %v5767_v33, %v5733_v14  ;;  %v5691_v32 = vadd.f32 %v5690_v60, %v5656_v15  ;;  %v6451_v27 = vpack.c.bf16 %v7019_v9, %v7017_v57  ;;  %v5660_v37 = vmul.f32 %v7019_v9, %v5623_v3 }
 0x235   : > { %v5735_v56 = vmul.f32 %v7018_v19, %v5657_v24  ;;  %v6446_v61 = vpack.c.bf16 %v7020_v28, %v7018_v19  ;;  %v5658_v42 = vmul.f32 %v7020_v28, %v5613_v17  ;;  %v5737_v45 = vmul.f32 %v7017_v57, %v5659_v20 }
 0x236   : > { %v5692_v0 = vadd.f32 %v5691_v32, %v5657_v24  ;;  %v5769_v34 = vadd.f32 %v5768_v30, %v5734_v54  ;;  %6469 = vst [vmem:[%s8258_s15 + $0x88] sm:$0xff] %v6451_v27   ;;  %v5738_v46 = vmul.f32 %v7019_v9, %v5660_v37 }
 0x237   : > { %6468 = vst [vmem:[%s8258_s15 + $0x80] sm:$0xff] %v6446_v61   ;;  %v5736_v55 = vmul.f32 %v7020_v28, %v5658_v42 }
 0x238   : > { %v5770_v62 = vadd.f32 %v5769_v34, %v5735_v56  ;;  %v5693_v38 = vadd.f32 %v5692_v0, %v5658_v42 }
 0x23a   : > { %v5694_v25 = vadd.f32 %v5693_v38, %v5659_v20  ;;  %v5771_v6 = vadd.f32 %v5770_v62, %v5736_v55 }
 0x23c   : > { %v5695_v48 = vadd.f32 %v5694_v25, %v5660_v37  ;;  %v5772_v40 = vadd.f32 %v5771_v6, %v5737_v45 }
 0x23e   : > { %v5696_v35 = vrot.slane %v5695_v48, 4  ;;  %v5773_v8 = vadd.f32 %v5772_v40, %v5738_v46 }
 0x240   : > { %v5697_v36 = vadd.f32 %v5696_v35, %v5695_v48  ;;  %v5774_v18 = vrot.slane %v5773_v8, 4 }
 0x242   : > { %v5698_v47 = vrot.slane %v5697_v36, 2  ;;  %v5775_v39 = vadd.f32 %v5774_v18, %v5773_v8 }
 0x244   : > { %v5699_v4 = vadd.f32 %v5698_v47, %v5697_v36  ;;  %v5776_v1 = vrot.slane %v5775_v39, 2 }
 0x246   : > { %v5700_v63 = vrot.slane %v5699_v4, 1  ;;  %v5777_v49 = vadd.f32 %v5776_v1, %v5775_v39 }
 0x248   : > { %v5701_v5 = vadd.f32 %v5700_v63, %v5699_v4  ;;  %v5778_v52 = vrot.slane %v5777_v49, 1 }
 0x24a   : > { %5702 = vst [vmem:[%s288_s22] sm:$0x1] %v5701_v5  ;;  %v5779_v7 = vadd.f32 %v5778_v52, %v5777_v49 }
 0x24c   : > { %5780 = vst [vmem:[%s294_s25] sm:$0x1] %v5779_v7 }
 0x24d PF: > { %s16_s20 = sadd.s32 1, %s7504_s20   ;;  %s8394_s18 = smov %s7500_s19 }
 0x24e   : > { %p13_p5 = scmp.ge.s32.totalorder %s16_s20, 4   ;;  %s8395_s19 = smov %s8397_s21 }
 0x250   :  { %15 = sbr.rel (!%p13_p5) target bundleno = 2 (0x2), region = 86 }

</bundles_post_ra>
